<compile_context>
chip_gen: v7x
topology: tpu7x:2x2x1
jax: 0.10.0
libtpu: 0.0.40
codegen_flags: <defaults>
</compile_context>

<pallas_src>
import math
import jax
import jax.numpy as jnp
from jax import lax
from jax.experimental import pallas as pl
from jax.experimental.pallas import tpu as pltpu  # noqa: F401  (kept for TPU-specific tuning)


# ----------------------------- fused forward kernel ---------------------------
def make_fused_kernel(S, B, H):
    """Returns a kernel computing 2-layer LSTM -> last step -> FC -> softmax."""

    def lstm_cell(gates, c):
        i = jax.nn.sigmoid(gates[:, 0:H])
        f = jax.nn.sigmoid(gates[:, H:2 * H])
        g = jnp.tanh(gates[:, 2 * H:3 * H])
        o = jax.nn.sigmoid(gates[:, 3 * H:4 * H])
        c_new = f * c + i * g
        h_new = o * jnp.tanh(c_new)
        return h_new, c_new

    def kernel(x_ref, wih1_ref, whh1_ref, b1_ref,
               w2_ref, b2_ref, wfc_ref, bfc_ref, out_ref):
        # Hoisted layer-1 input projection: ONE (S*B, D) x (D, 4H) matmul,
        # bias folded in.  Rows [t*B : (t+1)*B] hold time step t (time-major).
        xp = (jnp.dot(x_ref[...], wih1_ref[...],
                      preferred_element_type=jnp.float32)
              + b1_ref[...])                                   # (S*B, 4H)

        whh1 = whh1_ref[...]                                   # (H, 4H)
        w2 = w2_ref[...]                                       # (2H, 4H)
        b2 = b2_ref[...]                                       # (1, 4H)

        h1 = jnp.zeros((B, H), jnp.float32)
        c1 = jnp.zeros((B, H), jnp.float32)
        h2 = jnp.zeros((B, H), jnp.float32)
        c2 = jnp.zeros((B, H), jnp.float32)

        # Fully unrolled time loop (S is small & static); equivalent to
        # lax.fori_loop(..., unroll=True) -- straight-line code for the LLO.
        for t in range(S):
            # Layer 1: recurrent part only (input part precomputed above).
            g1 = xp[t * B:(t + 1) * B, :] + jnp.dot(
                h1, whh1, preferred_element_type=jnp.float32)
            h1, c1 = lstm_cell(g1, c1)

            # Layer 2: single fused dot  [h1 | h2] @ [W_ih2^T ; W_hh2^T].
            hcat = jnp.concatenate([h1, h2], axis=1)           # (B, 2H)
            g2 = jnp.dot(hcat, w2, preferred_element_type=jnp.float32) + b2
            h2, c2 = lstm_cell(g2, c2)

        # FC + numerically-stable softmax on the last hidden state only.
        logits = (jnp.dot(h2, wfc_ref[...], preferred_element_type=jnp.float32)
                  + bfc_ref[...])                              # (B, O)
        m = jnp.max(logits, axis=1, keepdims=True)
        e = jnp.exp(logits - m)
        out_ref[...] = e / jnp.sum(e, axis=1, keepdims=True)

    return kernel


def custom_lstm_forward(x, params):
    """x: (B, S, D) batch_first (like PyTorch). Returns softmax probs (B, O)."""
    B, S, D = x.shape
    layers = params["layers"]
    assert len(layers) == 2, "fused kernel implements the module's 2-layer LSTM"
    (w_ih1, w_hh1, b_ih1, b_hh1), (w_ih2, w_hh2, b_ih2, b_hh2) = layers
    H = w_hh1.shape[1]
    O = params["fc_w"].shape[0]

    # Time-major, flattened input: contiguous (B, D) slab per time step.
    x2d = jnp.transpose(x, (1, 0, 2)).reshape(S * B, D)

    wih1_t = w_ih1.T                                           # (D, 4H)
    whh1_t = w_hh1.T                                           # (H, 4H)
    b1 = (b_ih1 + b_hh1)[None, :]                              # (1, 4H)
    w2_t = jnp.concatenate([w_ih2.T, w_hh2.T], axis=0)         # (2H, 4H)
    b2 = (b_ih2 + b_hh2)[None, :]                              # (1, 4H)
    wfc_t = params["fc_w"].T                                   # (H, O)
    bfc = params["fc_b"][None, :]                              # (1, O)

    # TODO(synk): for v7x / large batch, add a leading batch grid axis marked
    # "parallel" (or pl.core_map) to split the recurrence across both TensorCores.
    return pl.pallas_call(
        make_fused_kernel(S=S, B=B, H=H),
        out_shape=jax.ShapeDtypeStruct((B, O), jnp.float32),
        in_specs=[
            pl.BlockSpec((S * B, D), lambda: (0, 0)),
            pl.BlockSpec((D, 4 * H), lambda: (0, 0)),
            pl.BlockSpec((H, 4 * H), lambda: (0, 0)),
            pl.BlockSpec((1, 4 * H), lambda: (0, 0)),
            pl.BlockSpec((2 * H, 4 * H), lambda: (0, 0)),
            pl.BlockSpec((1, 4 * H), lambda: (0, 0)),
            pl.BlockSpec((H, O), lambda: (0, 0)),
            pl.BlockSpec((1, O), lambda: (0, 0)),
        ],
        out_specs=pl.BlockSpec((B, O), lambda: (0, 0)),
    )(x2d, wih1_t, whh1_t, b1, w2_t, b2, wfc_t, bfc)


# ------------------------------- parameter init --------------------------------
def init_params(key, input_dim, hidden_dim, num_layers, output_dim):
    """PyTorch-style uniform(-1/sqrt(H), 1/sqrt(H)) init, deterministic."""
    params = {"layers": []}
    k = 1.0 / math.sqrt(hidden_dim)
    for layer in range(num_layers):
        d_in = input_dim if layer == 0 else hidden_dim
        key, k1, k2, k3, k4 = jax.random.split(key, 5)
        w_ih = jax.random.uniform(k1, (4 * hidden_dim, d_in), jnp.float32, -k, k)
        w_hh = jax.random.uniform(k2, (4 * hidden_dim, hidden_dim), jnp.float32, -k, k)
        b_ih = jax.random.uniform(k3, (4 * hidden_dim,), jnp.float32, -k, k)
        b_hh = jax.random.uniform(k4, (4 * hidden_dim,), jnp.float32, -k, k)
        params["layers"].append((w_ih, w_hh, b_ih, b_hh))
    kf = 1.0 / math.sqrt(hidden_dim)
    key, k5, k6 = jax.random.split(key, 3)
    params["fc_w"] = jax.random.uniform(k5, (output_dim, hidden_dim), jnp.float32, -kf, kf)
    params["fc_b"] = jax.random.uniform(k6, (output_dim,), jnp.float32, -kf, kf)
    return params


# ------------------------------- pure-JAX reference ----------------------------
def ref_lstm_layer(x, w_ih, w_hh, b_ih, b_hh):
    B, S, D = x.shape
    H = w_hh.shape[1]

    def step(carry, x_t):
        h, c = carry
        gates = x_t @ w_ih.T + b_ih + h @ w_hh.T + b_hh
        i, f, g, o = jnp.split(gates, 4, axis=1)
        i, f, o = jax.nn.sigmoid(i), jax.nn.sigmoid(f), jax.nn.sigmoid(o)
        g = jnp.tanh(g)
        c = f * c + i * g
        h = o * jnp.tanh(c)
        return (h, c), h

    h0 = jnp.zeros((B, H), jnp.float32)
    c0 = jnp.zeros((B, H), jnp.float32)
    (_, _), ys = lax.scan(step, (h0, c0), jnp.swapaxes(x, 0, 1))
    return jnp.swapaxes(ys, 0, 1)


def ref_forward(x, params):
    h = x
    for (w_ih, w_hh, b_ih, b_hh) in params["layers"]:
        h = ref_lstm_layer(h, w_ih, w_hh, b_ih, b_hh)
    h_last = h[:, -1, :]
    logits = h_last @ params["fc_w"].T + params["fc_b"]
    return jax.nn.softmax(logits, axis=1)


# ------------------------------------ main -------------------------------------
if __name__ == "__main__":
    # Small shapes consistent with the module (input_dim/hidden_dim scaled down).
    B, S, D, H, O, L = 8, 8, 256, 128, 2, 2

    key = jax.random.PRNGKey(0)
    key, kx = jax.random.split(key)
    x = jax.random.normal(kx, (B, S, D), jnp.float32)

    params = init_params(key, input_dim=D, hidden_dim=H, num_layers=L, output_dim=O)

    fwd = jax.jit(custom_lstm_forward)
    out = jax.block_until_ready(fwd(x, params))
    ref = jax.block_until_ready(ref_forward(x, params))

    assert out.shape == (B, O)
    assert jnp.allclose(out, ref, rtol=1e-4, atol=1e-5), (
        f"max abs err = {jnp.max(jnp.abs(out - ref))}"
    )
    print("KERNEL_OK")
</pallas_src>

<mosaic_0001>
module attributes {stable_mosaic.version = 11 : i64} {
  func.func @kernel(%arg0: memref<64x256xf32, #tpu.memory_space<vmem>>, %arg1: memref<256x512xf32, #tpu.memory_space<vmem>>, %arg2: memref<128x512xf32, #tpu.memory_space<vmem>>, %arg3: memref<1x512xf32, #tpu.memory_space<vmem>>, %arg4: memref<256x512xf32, #tpu.memory_space<vmem>>, %arg5: memref<1x512xf32, #tpu.memory_space<vmem>>, %arg6: memref<128x2xf32, #tpu.memory_space<vmem>>, %arg7: memref<1x2xf32, #tpu.memory_space<vmem>>, %arg8: memref<8x2xf32, #tpu.memory_space<vmem>>) attributes {dimension_semantics = [], scalar_prefetch = 0 : i64, scratch_operands = 0 : i64, tpu.core_type = #tpu.core_type<tc>} {
    %c0 = arith.constant 0 : index
    %c0_0 = arith.constant 0 : index
    %0 = vector.load %arg0[%c0, %c0_0] : memref<64x256xf32, #tpu.memory_space<vmem>>, vector<64x256xf32>
    %c0_1 = arith.constant 0 : index
    %c0_2 = arith.constant 0 : index
    %1 = vector.load %arg1[%c0_1, %c0_2] : memref<256x512xf32, #tpu.memory_space<vmem>>, vector<256x512xf32>
    %cst = arith.constant dense<0.000000e+00> : vector<64x512xf32>
    %2 = tpu.matmul %0, %1, %cst {dimension_numbers = #tpu.dot_dimension_numbers<[1], [0], [0], [1], [0, 0, 1, 1], [], []>} : vector<64x256xf32>, vector<256x512xf32>, vector<64x512xf32> -> vector<64x512xf32>
    %c0_3 = arith.constant 0 : index
    %c0_4 = arith.constant 0 : index
    %3 = vector.load %arg3[%c0_3, %c0_4] : memref<1x512xf32, #tpu.memory_space<vmem>>, vector<1x512xf32>
    %4 = vector.broadcast %3 : vector<1x512xf32> to vector<64x512xf32>
    %5 = arith.addf %2, %4 : vector<64x512xf32>
    %c0_5 = arith.constant 0 : index
    %c0_6 = arith.constant 0 : index
    %6 = vector.load %arg2[%c0_5, %c0_6] : memref<128x512xf32, #tpu.memory_space<vmem>>, vector<128x512xf32>
    %c0_7 = arith.constant 0 : index
    %c0_8 = arith.constant 0 : index
    %7 = vector.load %arg4[%c0_7, %c0_8] : memref<256x512xf32, #tpu.memory_space<vmem>>, vector<256x512xf32>
    %c0_9 = arith.constant 0 : index
    %c0_10 = arith.constant 0 : index
    %8 = vector.load %arg5[%c0_9, %c0_10] : memref<1x512xf32, #tpu.memory_space<vmem>>, vector<1x512xf32>
    %cst_11 = arith.constant 0.000000e+00 : f32
    %9 = vector.broadcast %cst_11 : f32 to vector<8x128xf32>
    %cst_12 = arith.constant 0.000000e+00 : f32
    %10 = vector.broadcast %cst_12 : f32 to vector<8x128xf32>
    %cst_13 = arith.constant 0.000000e+00 : f32
    %11 = vector.broadcast %cst_13 : f32 to vector<8x128xf32>
    %cst_14 = arith.constant 0.000000e+00 : f32
    %12 = vector.broadcast %cst_14 : f32 to vector<8x128xf32>
    %13 = vector.extract_strided_slice %5 {offsets = [0, 0], sizes = [8, 512], strides = [1, 1]} : vector<64x512xf32> to vector<8x512xf32>
    %cst_15 = arith.constant dense<0.000000e+00> : vector<8x512xf32>
    %14 = tpu.matmul %9, %6, %cst_15 {dimension_numbers = #tpu.dot_dimension_numbers<[1], [0], [0], [1], [0, 0, 1, 1], [], []>} : vector<8x128xf32>, vector<128x512xf32>, vector<8x512xf32> -> vector<8x512xf32>
    %15 = arith.addf %13, %14 : vector<8x512xf32>
    %16 = vector.extract_strided_slice %15 {offsets = [0, 0], sizes = [8, 128], strides = [1, 1]} : vector<8x512xf32> to vector<8x128xf32>
    %17 = arith.negf %16 : vector<8x128xf32>
    %18 = math.exp %17 : vector<8x128xf32>
    %cst_16 = arith.constant 1.000000e+00 : f32
    %19 = vector.broadcast %cst_16 : f32 to vector<8x128xf32>
    %20 = arith.addf %19, %18 : vector<8x128xf32>
    %21 = arith.divf %19, %20 : vector<8x128xf32>
    %22 = vector.extract_strided_slice %15 {offsets = [0, 128], sizes = [8, 128], strides = [1, 1]} : vector<8x512xf32> to vector<8x128xf32>
    %23 = arith.negf %22 : vector<8x128xf32>
    %24 = math.exp %23 : vector<8x128xf32>
    %cst_17 = arith.constant 1.000000e+00 : f32
    %25 = vector.broadcast %cst_17 : f32 to vector<8x128xf32>
    %26 = arith.addf %25, %24 : vector<8x128xf32>
    %27 = arith.divf %25, %26 : vector<8x128xf32>
    %28 = vector.extract_strided_slice %15 {offsets = [0, 256], sizes = [8, 128], strides = [1, 1]} : vector<8x512xf32> to vector<8x128xf32>
    %29 = math.tanh %28 : vector<8x128xf32>
    %30 = vector.extract_strided_slice %15 {offsets = [0, 384], sizes = [8, 128], strides = [1, 1]} : vector<8x512xf32> to vector<8x128xf32>
    %31 = arith.negf %30 : vector<8x128xf32>
    %32 = math.exp %31 : vector<8x128xf32>
    %cst_18 = arith.constant 1.000000e+00 : f32
    %33 = vector.broadcast %cst_18 : f32 to vector<8x128xf32>
    %34 = arith.addf %33, %32 : vector<8x128xf32>
    %35 = arith.divf %33, %34 : vector<8x128xf32>
    %36 = arith.mulf %27, %10 : vector<8x128xf32>
    %37 = arith.mulf %21, %29 : vector<8x128xf32>
    %38 = arith.addf %36, %37 : vector<8x128xf32>
    %39 = math.tanh %38 : vector<8x128xf32>
    %40 = arith.mulf %35, %39 : vector<8x128xf32>
    %41 = tpu.concatenate %40, %11 in 1 : vector<8x128xf32>, vector<8x128xf32> -> vector<8x256xf32>
    %cst_19 = arith.constant dense<0.000000e+00> : vector<8x512xf32>
    %42 = tpu.matmul %41, %7, %cst_19 {dimension_numbers = #tpu.dot_dimension_numbers<[1], [0], [0], [1], [0, 0, 1, 1], [], []>} : vector<8x256xf32>, vector<256x512xf32>, vector<8x512xf32> -> vector<8x512xf32>
    %43 = vector.broadcast %8 : vector<1x512xf32> to vector<8x512xf32>
    %44 = arith.addf %42, %43 : vector<8x512xf32>
    %45 = vector.extract_strided_slice %44 {offsets = [0, 0], sizes = [8, 128], strides = [1, 1]} : vector<8x512xf32> to vector<8x128xf32>
    %46 = arith.negf %45 : vector<8x128xf32>
    %47 = math.exp %46 : vector<8x128xf32>
    %cst_20 = arith.constant 1.000000e+00 : f32
    %48 = vector.broadcast %cst_20 : f32 to vector<8x128xf32>
    %49 = arith.addf %48, %47 : vector<8x128xf32>
    %50 = arith.divf %48, %49 : vector<8x128xf32>
    %51 = vector.extract_strided_slice %44 {offsets = [0, 128], sizes = [8, 128], strides = [1, 1]} : vector<8x512xf32> to vector<8x128xf32>
    %52 = arith.negf %51 : vector<8x128xf32>
    %53 = math.exp %52 : vector<8x128xf32>
    %cst_21 = arith.constant 1.000000e+00 : f32
    %54 = vector.broadcast %cst_21 : f32 to vector<8x128xf32>
    %55 = arith.addf %54, %53 : vector<8x128xf32>
    %56 = arith.divf %54, %55 : vector<8x128xf32>
    %57 = vector.extract_strided_slice %44 {offsets = [0, 256], sizes = [8, 128], strides = [1, 1]} : vector<8x512xf32> to vector<8x128xf32>
    %58 = math.tanh %57 : vector<8x128xf32>
    %59 = vector.extract_strided_slice %44 {offsets = [0, 384], sizes = [8, 128], strides = [1, 1]} : vector<8x512xf32> to vector<8x128xf32>
    %60 = arith.negf %59 : vector<8x128xf32>
    %61 = math.exp %60 : vector<8x128xf32>
    %cst_22 = arith.constant 1.000000e+00 : f32
    %62 = vector.broadcast %cst_22 : f32 to vector<8x128xf32>
    %63 = arith.addf %62, %61 : vector<8x128xf32>
    %64 = arith.divf %62, %63 : vector<8x128xf32>
    %65 = arith.mulf %56, %12 : vector<8x128xf32>
    %66 = arith.mulf %50, %58 : vector<8x128xf32>
    %67 = arith.addf %65, %66 : vector<8x128xf32>
    %68 = math.tanh %67 : vector<8x128xf32>
    %69 = arith.mulf %64, %68 : vector<8x128xf32>
    %70 = vector.extract_strided_slice %5 {offsets = [8, 0], sizes = [8, 512], strides = [1, 1]} : vector<64x512xf32> to vector<8x512xf32>
    %cst_23 = arith.constant dense<0.000000e+00> : vector<8x512xf32>
    %71 = tpu.matmul %40, %6, %cst_23 {dimension_numbers = #tpu.dot_dimension_numbers<[1], [0], [0], [1], [0, 0, 1, 1], [], []>} : vector<8x128xf32>, vector<128x512xf32>, vector<8x512xf32> -> vector<8x512xf32>
    %72 = arith.addf %70, %71 : vector<8x512xf32>
    %73 = vector.extract_strided_slice %72 {offsets = [0, 0], sizes = [8, 128], strides = [1, 1]} : vector<8x512xf32> to vector<8x128xf32>
    %74 = arith.negf %73 : vector<8x128xf32>
    %75 = math.exp %74 : vector<8x128xf32>
    %cst_24 = arith.constant 1.000000e+00 : f32
    %76 = vector.broadcast %cst_24 : f32 to vector<8x128xf32>
    %77 = arith.addf %76, %75 : vector<8x128xf32>
    %78 = arith.divf %76, %77 : vector<8x128xf32>
    %79 = vector.extract_strided_slice %72 {offsets = [0, 128], sizes = [8, 128], strides = [1, 1]} : vector<8x512xf32> to vector<8x128xf32>
    %80 = arith.negf %79 : vector<8x128xf32>
    %81 = math.exp %80 : vector<8x128xf32>
    %cst_25 = arith.constant 1.000000e+00 : f32
    %82 = vector.broadcast %cst_25 : f32 to vector<8x128xf32>
    %83 = arith.addf %82, %81 : vector<8x128xf32>
    %84 = arith.divf %82, %83 : vector<8x128xf32>
    %85 = vector.extract_strided_slice %72 {offsets = [0, 256], sizes = [8, 128], strides = [1, 1]} : vector<8x512xf32> to vector<8x128xf32>
    %86 = math.tanh %85 : vector<8x128xf32>
    %87 = vector.extract_strided_slice %72 {offsets = [0, 384], sizes = [8, 128], strides = [1, 1]} : vector<8x512xf32> to vector<8x128xf32>
    %88 = arith.negf %87 : vector<8x128xf32>
    %89 = math.exp %88 : vector<8x128xf32>
    %cst_26 = arith.constant 1.000000e+00 : f32
    %90 = vector.broadcast %cst_26 : f32 to vector<8x128xf32>
    %91 = arith.addf %90, %89 : vector<8x128xf32>
    %92 = arith.divf %90, %91 : vector<8x128xf32>
    %93 = arith.mulf %84, %38 : vector<8x128xf32>
    %94 = arith.mulf %78, %86 : vector<8x128xf32>
    %95 = arith.addf %93, %94 : vector<8x128xf32>
    %96 = math.tanh %95 : vector<8x128xf32>
    %97 = arith.mulf %92, %96 : vector<8x128xf32>
    %98 = tpu.concatenate %97, %69 in 1 : vector<8x128xf32>, vector<8x128xf32> -> vector<8x256xf32>
    %cst_27 = arith.constant dense<0.000000e+00> : vector<8x512xf32>
    %99 = tpu.matmul %98, %7, %cst_27 {dimension_numbers = #tpu.dot_dimension_numbers<[1], [0], [0], [1], [0, 0, 1, 1], [], []>} : vector<8x256xf32>, vector<256x512xf32>, vector<8x512xf32> -> vector<8x512xf32>
    %100 = vector.broadcast %8 : vector<1x512xf32> to vector<8x512xf32>
    %101 = arith.addf %99, %100 : vector<8x512xf32>
    %102 = vector.extract_strided_slice %101 {offsets = [0, 0], sizes = [8, 128], strides = [1, 1]} : vector<8x512xf32> to vector<8x128xf32>
    %103 = arith.negf %102 : vector<8x128xf32>
    %104 = math.exp %103 : vector<8x128xf32>
    %cst_28 = arith.constant 1.000000e+00 : f32
    %105 = vector.broadcast %cst_28 : f32 to vector<8x128xf32>
    %106 = arith.addf %105, %104 : vector<8x128xf32>
    %107 = arith.divf %105, %106 : vector<8x128xf32>
    %108 = vector.extract_strided_slice %101 {offsets = [0, 128], sizes = [8, 128], strides = [1, 1]} : vector<8x512xf32> to vector<8x128xf32>
    %109 = arith.negf %108 : vector<8x128xf32>
    %110 = math.exp %109 : vector<8x128xf32>
    %cst_29 = arith.constant 1.000000e+00 : f32
    %111 = vector.broadcast %cst_29 : f32 to vector<8x128xf32>
    %112 = arith.addf %111, %110 : vector<8x128xf32>
    %113 = arith.divf %111, %112 : vector<8x128xf32>
    %114 = vector.extract_strided_slice %101 {offsets = [0, 256], sizes = [8, 128], strides = [1, 1]} : vector<8x512xf32> to vector<8x128xf32>
    %115 = math.tanh %114 : vector<8x128xf32>
    %116 = vector.extract_strided_slice %101 {offsets = [0, 384], sizes = [8, 128], strides = [1, 1]} : vector<8x512xf32> to vector<8x128xf32>
    %117 = arith.negf %116 : vector<8x128xf32>
    %118 = math.exp %117 : vector<8x128xf32>
    %cst_30 = arith.constant 1.000000e+00 : f32
    %119 = vector.broadcast %cst_30 : f32 to vector<8x128xf32>
    %120 = arith.addf %119, %118 : vector<8x128xf32>
    %121 = arith.divf %119, %120 : vector<8x128xf32>
    %122 = arith.mulf %113, %67 : vector<8x128xf32>
    %123 = arith.mulf %107, %115 : vector<8x128xf32>
    %124 = arith.addf %122, %123 : vector<8x128xf32>
    %125 = math.tanh %124 : vector<8x128xf32>
    %126 = arith.mulf %121, %125 : vector<8x128xf32>
    %127 = vector.extract_strided_slice %5 {offsets = [16, 0], sizes = [8, 512], strides = [1, 1]} : vector<64x512xf32> to vector<8x512xf32>
    %cst_31 = arith.constant dense<0.000000e+00> : vector<8x512xf32>
    %128 = tpu.matmul %97, %6, %cst_31 {dimension_numbers = #tpu.dot_dimension_numbers<[1], [0], [0], [1], [0, 0, 1, 1], [], []>} : vector<8x128xf32>, vector<128x512xf32>, vector<8x512xf32> -> vector<8x512xf32>
    %129 = arith.addf %127, %128 : vector<8x512xf32>
    %130 = vector.extract_strided_slice %129 {offsets = [0, 0], sizes = [8, 128], strides = [1, 1]} : vector<8x512xf32> to vector<8x128xf32>
    %131 = arith.negf %130 : vector<8x128xf32>
    %132 = math.exp %131 : vector<8x128xf32>
    %cst_32 = arith.constant 1.000000e+00 : f32
    %133 = vector.broadcast %cst_32 : f32 to vector<8x128xf32>
    %134 = arith.addf %133, %132 : vector<8x128xf32>
    %135 = arith.divf %133, %134 : vector<8x128xf32>
    %136 = vector.extract_strided_slice %129 {offsets = [0, 128], sizes = [8, 128], strides = [1, 1]} : vector<8x512xf32> to vector<8x128xf32>
    %137 = arith.negf %136 : vector<8x128xf32>
    %138 = math.exp %137 : vector<8x128xf32>
    %cst_33 = arith.constant 1.000000e+00 : f32
    %139 = vector.broadcast %cst_33 : f32 to vector<8x128xf32>
    %140 = arith.addf %139, %138 : vector<8x128xf32>
    %141 = arith.divf %139, %140 : vector<8x128xf32>
    %142 = vector.extract_strided_slice %129 {offsets = [0, 256], sizes = [8, 128], strides = [1, 1]} : vector<8x512xf32> to vector<8x128xf32>
    %143 = math.tanh %142 : vector<8x128xf32>
    %144 = vector.extract_strided_slice %129 {offsets = [0, 384], sizes = [8, 128], strides = [1, 1]} : vector<8x512xf32> to vector<8x128xf32>
    %145 = arith.negf %144 : vector<8x128xf32>
    %146 = math.exp %145 : vector<8x128xf32>
    %cst_34 = arith.constant 1.000000e+00 : f32
    %147 = vector.broadcast %cst_34 : f32 to vector<8x128xf32>
    %148 = arith.addf %147, %146 : vector<8x128xf32>
    %149 = arith.divf %147, %148 : vector<8x128xf32>
    %150 = arith.mulf %141, %95 : vector<8x128xf32>
    %151 = arith.mulf %135, %143 : vector<8x128xf32>
    %152 = arith.addf %150, %151 : vector<8x128xf32>
    %153 = math.tanh %152 : vector<8x128xf32>
    %154 = arith.mulf %149, %153 : vector<8x128xf32>
    %155 = tpu.concatenate %154, %126 in 1 : vector<8x128xf32>, vector<8x128xf32> -> vector<8x256xf32>
    %cst_35 = arith.constant dense<0.000000e+00> : vector<8x512xf32>
    %156 = tpu.matmul %155, %7, %cst_35 {dimension_numbers = #tpu.dot_dimension_numbers<[1], [0], [0], [1], [0, 0, 1, 1], [], []>} : vector<8x256xf32>, vector<256x512xf32>, vector<8x512xf32> -> vector<8x512xf32>
    %157 = vector.broadcast %8 : vector<1x512xf32> to vector<8x512xf32>
    %158 = arith.addf %156, %157 : vector<8x512xf32>
    %159 = vector.extract_strided_slice %158 {offsets = [0, 0], sizes = [8, 128], strides = [1, 1]} : vector<8x512xf32> to vector<8x128xf32>
    %160 = arith.negf %159 : vector<8x128xf32>
    %161 = math.exp %160 : vector<8x128xf32>
    %cst_36 = arith.constant 1.000000e+00 : f32
    %162 = vector.broadcast %cst_36 : f32 to vector<8x128xf32>
    %163 = arith.addf %162, %161 : vector<8x128xf32>
    %164 = arith.divf %162, %163 : vector<8x128xf32>
    %165 = vector.extract_strided_slice %158 {offsets = [0, 128], sizes = [8, 128], strides = [1, 1]} : vector<8x512xf32> to vector<8x128xf32>
    %166 = arith.negf %165 : vector<8x128xf32>
    %167 = math.exp %166 : vector<8x128xf32>
    %cst_37 = arith.constant 1.000000e+00 : f32
    %168 = vector.broadcast %cst_37 : f32 to vector<8x128xf32>
    %169 = arith.addf %168, %167 : vector<8x128xf32>
    %170 = arith.divf %168, %169 : vector<8x128xf32>
    %171 = vector.extract_strided_slice %158 {offsets = [0, 256], sizes = [8, 128], strides = [1, 1]} : vector<8x512xf32> to vector<8x128xf32>
    %172 = math.tanh %171 : vector<8x128xf32>
    %173 = vector.extract_strided_slice %158 {offsets = [0, 384], sizes = [8, 128], strides = [1, 1]} : vector<8x512xf32> to vector<8x128xf32>
    %174 = arith.negf %173 : vector<8x128xf32>
    %175 = math.exp %174 : vector<8x128xf32>
    %cst_38 = arith.constant 1.000000e+00 : f32
    %176 = vector.broadcast %cst_38 : f32 to vector<8x128xf32>
    %177 = arith.addf %176, %175 : vector<8x128xf32>
    %178 = arith.divf %176, %177 : vector<8x128xf32>
    %179 = arith.mulf %170, %124 : vector<8x128xf32>
    %180 = arith.mulf %164, %172 : vector<8x128xf32>
    %181 = arith.addf %179, %180 : vector<8x128xf32>
    %182 = math.tanh %181 : vector<8x128xf32>
    %183 = arith.mulf %178, %182 : vector<8x128xf32>
    %184 = vector.extract_strided_slice %5 {offsets = [24, 0], sizes = [8, 512], strides = [1, 1]} : vector<64x512xf32> to vector<8x512xf32>
    %cst_39 = arith.constant dense<0.000000e+00> : vector<8x512xf32>
    %185 = tpu.matmul %154, %6, %cst_39 {dimension_numbers = #tpu.dot_dimension_numbers<[1], [0], [0], [1], [0, 0, 1, 1], [], []>} : vector<8x128xf32>, vector<128x512xf32>, vector<8x512xf32> -> vector<8x512xf32>
    %186 = arith.addf %184, %185 : vector<8x512xf32>
    %187 = vector.extract_strided_slice %186 {offsets = [0, 0], sizes = [8, 128], strides = [1, 1]} : vector<8x512xf32> to vector<8x128xf32>
    %188 = arith.negf %187 : vector<8x128xf32>
    %189 = math.exp %188 : vector<8x128xf32>
    %cst_40 = arith.constant 1.000000e+00 : f32
    %190 = vector.broadcast %cst_40 : f32 to vector<8x128xf32>
    %191 = arith.addf %190, %189 : vector<8x128xf32>
    %192 = arith.divf %190, %191 : vector<8x128xf32>
    %193 = vector.extract_strided_slice %186 {offsets = [0, 128], sizes = [8, 128], strides = [1, 1]} : vector<8x512xf32> to vector<8x128xf32>
    %194 = arith.negf %193 : vector<8x128xf32>
    %195 = math.exp %194 : vector<8x128xf32>
    %cst_41 = arith.constant 1.000000e+00 : f32
    %196 = vector.broadcast %cst_41 : f32 to vector<8x128xf32>
    %197 = arith.addf %196, %195 : vector<8x128xf32>
    %198 = arith.divf %196, %197 : vector<8x128xf32>
    %199 = vector.extract_strided_slice %186 {offsets = [0, 256], sizes = [8, 128], strides = [1, 1]} : vector<8x512xf32> to vector<8x128xf32>
    %200 = math.tanh %199 : vector<8x128xf32>
    %201 = vector.extract_strided_slice %186 {offsets = [0, 384], sizes = [8, 128], strides = [1, 1]} : vector<8x512xf32> to vector<8x128xf32>
    %202 = arith.negf %201 : vector<8x128xf32>
    %203 = math.exp %202 : vector<8x128xf32>
    %cst_42 = arith.constant 1.000000e+00 : f32
    %204 = vector.broadcast %cst_42 : f32 to vector<8x128xf32>
    %205 = arith.addf %204, %203 : vector<8x128xf32>
    %206 = arith.divf %204, %205 : vector<8x128xf32>
    %207 = arith.mulf %198, %152 : vector<8x128xf32>
    %208 = arith.mulf %192, %200 : vector<8x128xf32>
    %209 = arith.addf %207, %208 : vector<8x128xf32>
    %210 = math.tanh %209 : vector<8x128xf32>
    %211 = arith.mulf %206, %210 : vector<8x128xf32>
    %212 = tpu.concatenate %211, %183 in 1 : vector<8x128xf32>, vector<8x128xf32> -> vector<8x256xf32>
    %cst_43 = arith.constant dense<0.000000e+00> : vector<8x512xf32>
    %213 = tpu.matmul %212, %7, %cst_43 {dimension_numbers = #tpu.dot_dimension_numbers<[1], [0], [0], [1], [0, 0, 1, 1], [], []>} : vector<8x256xf32>, vector<256x512xf32>, vector<8x512xf32> -> vector<8x512xf32>
    %214 = vector.broadcast %8 : vector<1x512xf32> to vector<8x512xf32>
    %215 = arith.addf %213, %214 : vector<8x512xf32>
    %216 = vector.extract_strided_slice %215 {offsets = [0, 0], sizes = [8, 128], strides = [1, 1]} : vector<8x512xf32> to vector<8x128xf32>
    %217 = arith.negf %216 : vector<8x128xf32>
    %218 = math.exp %217 : vector<8x128xf32>
    %cst_44 = arith.constant 1.000000e+00 : f32
    %219 = vector.broadcast %cst_44 : f32 to vector<8x128xf32>
    %220 = arith.addf %219, %218 : vector<8x128xf32>
    %221 = arith.divf %219, %220 : vector<8x128xf32>
    %222 = vector.extract_strided_slice %215 {offsets = [0, 128], sizes = [8, 128], strides = [1, 1]} : vector<8x512xf32> to vector<8x128xf32>
    %223 = arith.negf %222 : vector<8x128xf32>
    %224 = math.exp %223 : vector<8x128xf32>
    %cst_45 = arith.constant 1.000000e+00 : f32
    %225 = vector.broadcast %cst_45 : f32 to vector<8x128xf32>
    %226 = arith.addf %225, %224 : vector<8x128xf32>
    %227 = arith.divf %225, %226 : vector<8x128xf32>
    %228 = vector.extract_strided_slice %215 {offsets = [0, 256], sizes = [8, 128], strides = [1, 1]} : vector<8x512xf32> to vector<8x128xf32>
    %229 = math.tanh %228 : vector<8x128xf32>
    %230 = vector.extract_strided_slice %215 {offsets = [0, 384], sizes = [8, 128], strides = [1, 1]} : vector<8x512xf32> to vector<8x128xf32>
    %231 = arith.negf %230 : vector<8x128xf32>
    %232 = math.exp %231 : vector<8x128xf32>
    %cst_46 = arith.constant 1.000000e+00 : f32
    %233 = vector.broadcast %cst_46 : f32 to vector<8x128xf32>
    %234 = arith.addf %233, %232 : vector<8x128xf32>
    %235 = arith.divf %233, %234 : vector<8x128xf32>
    %236 = arith.mulf %227, %181 : vector<8x128xf32>
    %237 = arith.mulf %221, %229 : vector<8x128xf32>
    %238 = arith.addf %236, %237 : vector<8x128xf32>
    %239 = math.tanh %238 : vector<8x128xf32>
    %240 = arith.mulf %235, %239 : vector<8x128xf32>
    %241 = vector.extract_strided_slice %5 {offsets = [32, 0], sizes = [8, 512], strides = [1, 1]} : vector<64x512xf32> to vector<8x512xf32>
    %cst_47 = arith.constant dense<0.000000e+00> : vector<8x512xf32>
    %242 = tpu.matmul %211, %6, %cst_47 {dimension_numbers = #tpu.dot_dimension_numbers<[1], [0], [0], [1], [0, 0, 1, 1], [], []>} : vector<8x128xf32>, vector<128x512xf32>, vector<8x512xf32> -> vector<8x512xf32>
    %243 = arith.addf %241, %242 : vector<8x512xf32>
    %244 = vector.extract_strided_slice %243 {offsets = [0, 0], sizes = [8, 128], strides = [1, 1]} : vector<8x512xf32> to vector<8x128xf32>
    %245 = arith.negf %244 : vector<8x128xf32>
    %246 = math.exp %245 : vector<8x128xf32>
    %cst_48 = arith.constant 1.000000e+00 : f32
    %247 = vector.broadcast %cst_48 : f32 to vector<8x128xf32>
    %248 = arith.addf %247, %246 : vector<8x128xf32>
    %249 = arith.divf %247, %248 : vector<8x128xf32>
    %250 = vector.extract_strided_slice %243 {offsets = [0, 128], sizes = [8, 128], strides = [1, 1]} : vector<8x512xf32> to vector<8x128xf32>
    %251 = arith.negf %250 : vector<8x128xf32>
    %252 = math.exp %251 : vector<8x128xf32>
    %cst_49 = arith.constant 1.000000e+00 : f32
    %253 = vector.broadcast %cst_49 : f32 to vector<8x128xf32>
    %254 = arith.addf %253, %252 : vector<8x128xf32>
    %255 = arith.divf %253, %254 : vector<8x128xf32>
    %256 = vector.extract_strided_slice %243 {offsets = [0, 256], sizes = [8, 128], strides = [1, 1]} : vector<8x512xf32> to vector<8x128xf32>
    %257 = math.tanh %256 : vector<8x128xf32>
    %258 = vector.extract_strided_slice %243 {offsets = [0, 384], sizes = [8, 128], strides = [1, 1]} : vector<8x512xf32> to vector<8x128xf32>
    %259 = arith.negf %258 : vector<8x128xf32>
    %260 = math.exp %259 : vector<8x128xf32>
    %cst_50 = arith.constant 1.000000e+00 : f32
    %261 = vector.broadcast %cst_50 : f32 to vector<8x128xf32>
    %262 = arith.addf %261, %260 : vector<8x128xf32>
    %263 = arith.divf %261, %262 : vector<8x128xf32>
    %264 = arith.mulf %255, %209 : vector<8x128xf32>
    %265 = arith.mulf %249, %257 : vector<8x128xf32>
    %266 = arith.addf %264, %265 : vector<8x128xf32>
    %267 = math.tanh %266 : vector<8x128xf32>
    %268 = arith.mulf %263, %267 : vector<8x128xf32>
    %269 = tpu.concatenate %268, %240 in 1 : vector<8x128xf32>, vector<8x128xf32> -> vector<8x256xf32>
    %cst_51 = arith.constant dense<0.000000e+00> : vector<8x512xf32>
    %270 = tpu.matmul %269, %7, %cst_51 {dimension_numbers = #tpu.dot_dimension_numbers<[1], [0], [0], [1], [0, 0, 1, 1], [], []>} : vector<8x256xf32>, vector<256x512xf32>, vector<8x512xf32> -> vector<8x512xf32>
    %271 = vector.broadcast %8 : vector<1x512xf32> to vector<8x512xf32>
    %272 = arith.addf %270, %271 : vector<8x512xf32>
    %273 = vector.extract_strided_slice %272 {offsets = [0, 0], sizes = [8, 128], strides = [1, 1]} : vector<8x512xf32> to vector<8x128xf32>
    %274 = arith.negf %273 : vector<8x128xf32>
    %275 = math.exp %274 : vector<8x128xf32>
    %cst_52 = arith.constant 1.000000e+00 : f32
    %276 = vector.broadcast %cst_52 : f32 to vector<8x128xf32>
    %277 = arith.addf %276, %275 : vector<8x128xf32>
    %278 = arith.divf %276, %277 : vector<8x128xf32>
    %279 = vector.extract_strided_slice %272 {offsets = [0, 128], sizes = [8, 128], strides = [1, 1]} : vector<8x512xf32> to vector<8x128xf32>
    %280 = arith.negf %279 : vector<8x128xf32>
    %281 = math.exp %280 : vector<8x128xf32>
    %cst_53 = arith.constant 1.000000e+00 : f32
    %282 = vector.broadcast %cst_53 : f32 to vector<8x128xf32>
    %283 = arith.addf %282, %281 : vector<8x128xf32>
    %284 = arith.divf %282, %283 : vector<8x128xf32>
    %285 = vector.extract_strided_slice %272 {offsets = [0, 256], sizes = [8, 128], strides = [1, 1]} : vector<8x512xf32> to vector<8x128xf32>
    %286 = math.tanh %285 : vector<8x128xf32>
    %287 = vector.extract_strided_slice %272 {offsets = [0, 384], sizes = [8, 128], strides = [1, 1]} : vector<8x512xf32> to vector<8x128xf32>
    %288 = arith.negf %287 : vector<8x128xf32>
    %289 = math.exp %288 : vector<8x128xf32>
    %cst_54 = arith.constant 1.000000e+00 : f32
    %290 = vector.broadcast %cst_54 : f32 to vector<8x128xf32>
    %291 = arith.addf %290, %289 : vector<8x128xf32>
    %292 = arith.divf %290, %291 : vector<8x128xf32>
    %293 = arith.mulf %284, %238 : vector<8x128xf32>
    %294 = arith.mulf %278, %286 : vector<8x128xf32>
    %295 = arith.addf %293, %294 : vector<8x128xf32>
    %296 = math.tanh %295 : vector<8x128xf32>
    %297 = arith.mulf %292, %296 : vector<8x128xf32>
    %298 = vector.extract_strided_slice %5 {offsets = [40, 0], sizes = [8, 512], strides = [1, 1]} : vector<64x512xf32> to vector<8x512xf32>
    %cst_55 = arith.constant dense<0.000000e+00> : vector<8x512xf32>
    %299 = tpu.matmul %268, %6, %cst_55 {dimension_numbers = #tpu.dot_dimension_numbers<[1], [0], [0], [1], [0, 0, 1, 1], [], []>} : vector<8x128xf32>, vector<128x512xf32>, vector<8x512xf32> -> vector<8x512xf32>
    %300 = arith.addf %298, %299 : vector<8x512xf32>
    %301 = vector.extract_strided_slice %300 {offsets = [0, 0], sizes = [8, 128], strides = [1, 1]} : vector<8x512xf32> to vector<8x128xf32>
    %302 = arith.negf %301 : vector<8x128xf32>
    %303 = math.exp %302 : vector<8x128xf32>
    %cst_56 = arith.constant 1.000000e+00 : f32
    %304 = vector.broadcast %cst_56 : f32 to vector<8x128xf32>
    %305 = arith.addf %304, %303 : vector<8x128xf32>
    %306 = arith.divf %304, %305 : vector<8x128xf32>
    %307 = vector.extract_strided_slice %300 {offsets = [0, 128], sizes = [8, 128], strides = [1, 1]} : vector<8x512xf32> to vector<8x128xf32>
    %308 = arith.negf %307 : vector<8x128xf32>
    %309 = math.exp %308 : vector<8x128xf32>
    %cst_57 = arith.constant 1.000000e+00 : f32
    %310 = vector.broadcast %cst_57 : f32 to vector<8x128xf32>
    %311 = arith.addf %310, %309 : vector<8x128xf32>
    %312 = arith.divf %310, %311 : vector<8x128xf32>
    %313 = vector.extract_strided_slice %300 {offsets = [0, 256], sizes = [8, 128], strides = [1, 1]} : vector<8x512xf32> to vector<8x128xf32>
    %314 = math.tanh %313 : vector<8x128xf32>
    %315 = vector.extract_strided_slice %300 {offsets = [0, 384], sizes = [8, 128], strides = [1, 1]} : vector<8x512xf32> to vector<8x128xf32>
    %316 = arith.negf %315 : vector<8x128xf32>
    %317 = math.exp %316 : vector<8x128xf32>
    %cst_58 = arith.constant 1.000000e+00 : f32
    %318 = vector.broadcast %cst_58 : f32 to vector<8x128xf32>
    %319 = arith.addf %318, %317 : vector<8x128xf32>
    %320 = arith.divf %318, %319 : vector<8x128xf32>
    %321 = arith.mulf %312, %266 : vector<8x128xf32>
    %322 = arith.mulf %306, %314 : vector<8x128xf32>
    %323 = arith.addf %321, %322 : vector<8x128xf32>
    %324 = math.tanh %323 : vector<8x128xf32>
    %325 = arith.mulf %320, %324 : vector<8x128xf32>
    %326 = tpu.concatenate %325, %297 in 1 : vector<8x128xf32>, vector<8x128xf32> -> vector<8x256xf32>
    %cst_59 = arith.constant dense<0.000000e+00> : vector<8x512xf32>
    %327 = tpu.matmul %326, %7, %cst_59 {dimension_numbers = #tpu.dot_dimension_numbers<[1], [0], [0], [1], [0, 0, 1, 1], [], []>} : vector<8x256xf32>, vector<256x512xf32>, vector<8x512xf32> -> vector<8x512xf32>
    %328 = vector.broadcast %8 : vector<1x512xf32> to vector<8x512xf32>
    %329 = arith.addf %327, %328 : vector<8x512xf32>
    %330 = vector.extract_strided_slice %329 {offsets = [0, 0], sizes = [8, 128], strides = [1, 1]} : vector<8x512xf32> to vector<8x128xf32>
    %331 = arith.negf %330 : vector<8x128xf32>
    %332 = math.exp %331 : vector<8x128xf32>
    %cst_60 = arith.constant 1.000000e+00 : f32
    %333 = vector.broadcast %cst_60 : f32 to vector<8x128xf32>
    %334 = arith.addf %333, %332 : vector<8x128xf32>
    %335 = arith.divf %333, %334 : vector<8x128xf32>
    %336 = vector.extract_strided_slice %329 {offsets = [0, 128], sizes = [8, 128], strides = [1, 1]} : vector<8x512xf32> to vector<8x128xf32>
    %337 = arith.negf %336 : vector<8x128xf32>
    %338 = math.exp %337 : vector<8x128xf32>
    %cst_61 = arith.constant 1.000000e+00 : f32
    %339 = vector.broadcast %cst_61 : f32 to vector<8x128xf32>
    %340 = arith.addf %339, %338 : vector<8x128xf32>
    %341 = arith.divf %339, %340 : vector<8x128xf32>
    %342 = vector.extract_strided_slice %329 {offsets = [0, 256], sizes = [8, 128], strides = [1, 1]} : vector<8x512xf32> to vector<8x128xf32>
    %343 = math.tanh %342 : vector<8x128xf32>
    %344 = vector.extract_strided_slice %329 {offsets = [0, 384], sizes = [8, 128], strides = [1, 1]} : vector<8x512xf32> to vector<8x128xf32>
    %345 = arith.negf %344 : vector<8x128xf32>
    %346 = math.exp %345 : vector<8x128xf32>
    %cst_62 = arith.constant 1.000000e+00 : f32
    %347 = vector.broadcast %cst_62 : f32 to vector<8x128xf32>
    %348 = arith.addf %347, %346 : vector<8x128xf32>
    %349 = arith.divf %347, %348 : vector<8x128xf32>
    %350 = arith.mulf %341, %295 : vector<8x128xf32>
    %351 = arith.mulf %335, %343 : vector<8x128xf32>
    %352 = arith.addf %350, %351 : vector<8x128xf32>
    %353 = math.tanh %352 : vector<8x128xf32>
    %354 = arith.mulf %349, %353 : vector<8x128xf32>
    %355 = vector.extract_strided_slice %5 {offsets = [48, 0], sizes = [8, 512], strides = [1, 1]} : vector<64x512xf32> to vector<8x512xf32>
    %cst_63 = arith.constant dense<0.000000e+00> : vector<8x512xf32>
    %356 = tpu.matmul %325, %6, %cst_63 {dimension_numbers = #tpu.dot_dimension_numbers<[1], [0], [0], [1], [0, 0, 1, 1], [], []>} : vector<8x128xf32>, vector<128x512xf32>, vector<8x512xf32> -> vector<8x512xf32>
    %357 = arith.addf %355, %356 : vector<8x512xf32>
    %358 = vector.extract_strided_slice %357 {offsets = [0, 0], sizes = [8, 128], strides = [1, 1]} : vector<8x512xf32> to vector<8x128xf32>
    %359 = arith.negf %358 : vector<8x128xf32>
    %360 = math.exp %359 : vector<8x128xf32>
    %cst_64 = arith.constant 1.000000e+00 : f32
    %361 = vector.broadcast %cst_64 : f32 to vector<8x128xf32>
    %362 = arith.addf %361, %360 : vector<8x128xf32>
    %363 = arith.divf %361, %362 : vector<8x128xf32>
    %364 = vector.extract_strided_slice %357 {offsets = [0, 128], sizes = [8, 128], strides = [1, 1]} : vector<8x512xf32> to vector<8x128xf32>
    %365 = arith.negf %364 : vector<8x128xf32>
    %366 = math.exp %365 : vector<8x128xf32>
    %cst_65 = arith.constant 1.000000e+00 : f32
    %367 = vector.broadcast %cst_65 : f32 to vector<8x128xf32>
    %368 = arith.addf %367, %366 : vector<8x128xf32>
    %369 = arith.divf %367, %368 : vector<8x128xf32>
    %370 = vector.extract_strided_slice %357 {offsets = [0, 256], sizes = [8, 128], strides = [1, 1]} : vector<8x512xf32> to vector<8x128xf32>
    %371 = math.tanh %370 : vector<8x128xf32>
    %372 = vector.extract_strided_slice %357 {offsets = [0, 384], sizes = [8, 128], strides = [1, 1]} : vector<8x512xf32> to vector<8x128xf32>
    %373 = arith.negf %372 : vector<8x128xf32>
    %374 = math.exp %373 : vector<8x128xf32>
    %cst_66 = arith.constant 1.000000e+00 : f32
    %375 = vector.broadcast %cst_66 : f32 to vector<8x128xf32>
    %376 = arith.addf %375, %374 : vector<8x128xf32>
    %377 = arith.divf %375, %376 : vector<8x128xf32>
    %378 = arith.mulf %369, %323 : vector<8x128xf32>
    %379 = arith.mulf %363, %371 : vector<8x128xf32>
    %380 = arith.addf %378, %379 : vector<8x128xf32>
    %381 = math.tanh %380 : vector<8x128xf32>
    %382 = arith.mulf %377, %381 : vector<8x128xf32>
    %383 = tpu.concatenate %382, %354 in 1 : vector<8x128xf32>, vector<8x128xf32> -> vector<8x256xf32>
    %cst_67 = arith.constant dense<0.000000e+00> : vector<8x512xf32>
    %384 = tpu.matmul %383, %7, %cst_67 {dimension_numbers = #tpu.dot_dimension_numbers<[1], [0], [0], [1], [0, 0, 1, 1], [], []>} : vector<8x256xf32>, vector<256x512xf32>, vector<8x512xf32> -> vector<8x512xf32>
    %385 = vector.broadcast %8 : vector<1x512xf32> to vector<8x512xf32>
    %386 = arith.addf %384, %385 : vector<8x512xf32>
    %387 = vector.extract_strided_slice %386 {offsets = [0, 0], sizes = [8, 128], strides = [1, 1]} : vector<8x512xf32> to vector<8x128xf32>
    %388 = arith.negf %387 : vector<8x128xf32>
    %389 = math.exp %388 : vector<8x128xf32>
    %cst_68 = arith.constant 1.000000e+00 : f32
    %390 = vector.broadcast %cst_68 : f32 to vector<8x128xf32>
    %391 = arith.addf %390, %389 : vector<8x128xf32>
    %392 = arith.divf %390, %391 : vector<8x128xf32>
    %393 = vector.extract_strided_slice %386 {offsets = [0, 128], sizes = [8, 128], strides = [1, 1]} : vector<8x512xf32> to vector<8x128xf32>
    %394 = arith.negf %393 : vector<8x128xf32>
    %395 = math.exp %394 : vector<8x128xf32>
    %cst_69 = arith.constant 1.000000e+00 : f32
    %396 = vector.broadcast %cst_69 : f32 to vector<8x128xf32>
    %397 = arith.addf %396, %395 : vector<8x128xf32>
    %398 = arith.divf %396, %397 : vector<8x128xf32>
    %399 = vector.extract_strided_slice %386 {offsets = [0, 256], sizes = [8, 128], strides = [1, 1]} : vector<8x512xf32> to vector<8x128xf32>
    %400 = math.tanh %399 : vector<8x128xf32>
    %401 = vector.extract_strided_slice %386 {offsets = [0, 384], sizes = [8, 128], strides = [1, 1]} : vector<8x512xf32> to vector<8x128xf32>
    %402 = arith.negf %401 : vector<8x128xf32>
    %403 = math.exp %402 : vector<8x128xf32>
    %cst_70 = arith.constant 1.000000e+00 : f32
    %404 = vector.broadcast %cst_70 : f32 to vector<8x128xf32>
    %405 = arith.addf %404, %403 : vector<8x128xf32>
    %406 = arith.divf %404, %405 : vector<8x128xf32>
    %407 = arith.mulf %398, %352 : vector<8x128xf32>
    %408 = arith.mulf %392, %400 : vector<8x128xf32>
    %409 = arith.addf %407, %408 : vector<8x128xf32>
    %410 = math.tanh %409 : vector<8x128xf32>
    %411 = arith.mulf %406, %410 : vector<8x128xf32>
    %412 = vector.extract_strided_slice %5 {offsets = [56, 0], sizes = [8, 512], strides = [1, 1]} : vector<64x512xf32> to vector<8x512xf32>
    %cst_71 = arith.constant dense<0.000000e+00> : vector<8x512xf32>
    %413 = tpu.matmul %382, %6, %cst_71 {dimension_numbers = #tpu.dot_dimension_numbers<[1], [0], [0], [1], [0, 0, 1, 1], [], []>} : vector<8x128xf32>, vector<128x512xf32>, vector<8x512xf32> -> vector<8x512xf32>
    %414 = arith.addf %412, %413 : vector<8x512xf32>
    %415 = vector.extract_strided_slice %414 {offsets = [0, 0], sizes = [8, 128], strides = [1, 1]} : vector<8x512xf32> to vector<8x128xf32>
    %416 = arith.negf %415 : vector<8x128xf32>
    %417 = math.exp %416 : vector<8x128xf32>
    %cst_72 = arith.constant 1.000000e+00 : f32
    %418 = vector.broadcast %cst_72 : f32 to vector<8x128xf32>
    %419 = arith.addf %418, %417 : vector<8x128xf32>
    %420 = arith.divf %418, %419 : vector<8x128xf32>
    %421 = vector.extract_strided_slice %414 {offsets = [0, 128], sizes = [8, 128], strides = [1, 1]} : vector<8x512xf32> to vector<8x128xf32>
    %422 = arith.negf %421 : vector<8x128xf32>
    %423 = math.exp %422 : vector<8x128xf32>
    %cst_73 = arith.constant 1.000000e+00 : f32
    %424 = vector.broadcast %cst_73 : f32 to vector<8x128xf32>
    %425 = arith.addf %424, %423 : vector<8x128xf32>
    %426 = arith.divf %424, %425 : vector<8x128xf32>
    %427 = vector.extract_strided_slice %414 {offsets = [0, 256], sizes = [8, 128], strides = [1, 1]} : vector<8x512xf32> to vector<8x128xf32>
    %428 = math.tanh %427 : vector<8x128xf32>
    %429 = vector.extract_strided_slice %414 {offsets = [0, 384], sizes = [8, 128], strides = [1, 1]} : vector<8x512xf32> to vector<8x128xf32>
    %430 = arith.negf %429 : vector<8x128xf32>
    %431 = math.exp %430 : vector<8x128xf32>
    %cst_74 = arith.constant 1.000000e+00 : f32
    %432 = vector.broadcast %cst_74 : f32 to vector<8x128xf32>
    %433 = arith.addf %432, %431 : vector<8x128xf32>
    %434 = arith.divf %432, %433 : vector<8x128xf32>
    %435 = arith.mulf %426, %380 : vector<8x128xf32>
    %436 = arith.mulf %420, %428 : vector<8x128xf32>
    %437 = arith.addf %435, %436 : vector<8x128xf32>
    %438 = math.tanh %437 : vector<8x128xf32>
    %439 = arith.mulf %434, %438 : vector<8x128xf32>
    %440 = tpu.concatenate %439, %411 in 1 : vector<8x128xf32>, vector<8x128xf32> -> vector<8x256xf32>
    %cst_75 = arith.constant dense<0.000000e+00> : vector<8x512xf32>
    %441 = tpu.matmul %440, %7, %cst_75 {dimension_numbers = #tpu.dot_dimension_numbers<[1], [0], [0], [1], [0, 0, 1, 1], [], []>} : vector<8x256xf32>, vector<256x512xf32>, vector<8x512xf32> -> vector<8x512xf32>
    %442 = vector.broadcast %8 : vector<1x512xf32> to vector<8x512xf32>
    %443 = arith.addf %441, %442 : vector<8x512xf32>
    %444 = vector.extract_strided_slice %443 {offsets = [0, 0], sizes = [8, 128], strides = [1, 1]} : vector<8x512xf32> to vector<8x128xf32>
    %445 = arith.negf %444 : vector<8x128xf32>
    %446 = math.exp %445 : vector<8x128xf32>
    %cst_76 = arith.constant 1.000000e+00 : f32
    %447 = vector.broadcast %cst_76 : f32 to vector<8x128xf32>
    %448 = arith.addf %447, %446 : vector<8x128xf32>
    %449 = arith.divf %447, %448 : vector<8x128xf32>
    %450 = vector.extract_strided_slice %443 {offsets = [0, 128], sizes = [8, 128], strides = [1, 1]} : vector<8x512xf32> to vector<8x128xf32>
    %451 = arith.negf %450 : vector<8x128xf32>
    %452 = math.exp %451 : vector<8x128xf32>
    %cst_77 = arith.constant 1.000000e+00 : f32
    %453 = vector.broadcast %cst_77 : f32 to vector<8x128xf32>
    %454 = arith.addf %453, %452 : vector<8x128xf32>
    %455 = arith.divf %453, %454 : vector<8x128xf32>
    %456 = vector.extract_strided_slice %443 {offsets = [0, 256], sizes = [8, 128], strides = [1, 1]} : vector<8x512xf32> to vector<8x128xf32>
    %457 = math.tanh %456 : vector<8x128xf32>
    %458 = vector.extract_strided_slice %443 {offsets = [0, 384], sizes = [8, 128], strides = [1, 1]} : vector<8x512xf32> to vector<8x128xf32>
    %459 = arith.negf %458 : vector<8x128xf32>
    %460 = math.exp %459 : vector<8x128xf32>
    %cst_78 = arith.constant 1.000000e+00 : f32
    %461 = vector.broadcast %cst_78 : f32 to vector<8x128xf32>
    %462 = arith.addf %461, %460 : vector<8x128xf32>
    %463 = arith.divf %461, %462 : vector<8x128xf32>
    %464 = arith.mulf %455, %409 : vector<8x128xf32>
    %465 = arith.mulf %449, %457 : vector<8x128xf32>
    %466 = arith.addf %464, %465 : vector<8x128xf32>
    %467 = math.tanh %466 : vector<8x128xf32>
    %468 = arith.mulf %463, %467 : vector<8x128xf32>
    %c0_79 = arith.constant 0 : index
    %c0_80 = arith.constant 0 : index
    %469 = vector.load %arg6[%c0_79, %c0_80] : memref<128x2xf32, #tpu.memory_space<vmem>>, vector<128x2xf32>
    %cst_81 = arith.constant dense<0.000000e+00> : vector<8x2xf32>
    %470 = tpu.matmul %468, %469, %cst_81 {dimension_numbers = #tpu.dot_dimension_numbers<[1], [0], [0], [1], [0, 0, 1, 1], [], []>} : vector<8x128xf32>, vector<128x2xf32>, vector<8x2xf32> -> vector<8x2xf32>
    %c0_82 = arith.constant 0 : index
    %c0_83 = arith.constant 0 : index
    %471 = vector.load %arg7[%c0_82, %c0_83] : memref<1x2xf32, #tpu.memory_space<vmem>>, vector<1x2xf32>
    %472 = vector.broadcast %471 : vector<1x2xf32> to vector<8x2xf32>
    %473 = arith.addf %470, %472 : vector<8x2xf32>
    %cst_84 = arith.constant dense<0xFF800000> : vector<8xf32>
    %474 = vector.multi_reduction <maximumf>, %473, %cst_84 [1] : vector<8x2xf32> to vector<8xf32>
    %475 = vector.shape_cast %474 : vector<8xf32> to vector<8x1xf32>
    %476 = vector.broadcast %475 : vector<8x1xf32> to vector<8x2xf32>
    %477 = arith.subf %473, %476 : vector<8x2xf32>
    %478 = math.exp %477 : vector<8x2xf32>
    %cst_85 = arith.constant dense<0.000000e+00> : vector<8xf32>
    %479 = vector.multi_reduction <add>, %478, %cst_85 [1] : vector<8x2xf32> to vector<8xf32>
    %480 = vector.shape_cast %479 : vector<8xf32> to vector<8x1xf32>
    %481 = vector.broadcast %480 : vector<8x1xf32> to vector<8x2xf32>
    %482 = arith.divf %478, %481 : vector<8x2xf32>
    %c0_86 = arith.constant 0 : index
    %c0_87 = arith.constant 0 : index
    %483 = vector.load %arg8[%c0_86, %c0_87] : memref<8x2xf32, #tpu.memory_space<vmem>>, vector<8x2xf32>
    tpu.vector_store %arg8[%c0_86, %c0_87], %482 {strides = array<i32>} : memref<8x2xf32, #tpu.memory_space<vmem>>, vector<8x2xf32>,
    return
  }
}

</mosaic_0001>

<bundles_post_ra>
// kernel: custom_lstm_forward.1
= control target key start
LH: loop header
LB: loop body
LE: loop exit
PB: predicated region body
PF: predicated region fallthrough
CT: control target
= control target key end

     0   :  { %vm5551_vm0 = vmmov 0   ;;  %vm3416_vm1 = vcmask 15360   ;;  %s7807_s1 = inlined_call_operand.vmem [shape: f32[256,512], index: 1, kind: input, shape index: {}]   ;;  %s7808_s0 = inlined_call_operand.vmem [shape: f32[64,256], index: 0, kind: input, shape index: {}]   ;;  %s7809_s2 = inlined_call_operand.vmem [shape: f32[128,512], index: 2, kind: input, shape index: {}]   ;;  %s7810_s4 = inlined_call_operand.vmem [shape: f32[256,512], index: 4, kind: input, shape index: {}]   ;;  %s7811_s3 = inlined_call_operand.vmem [shape: f32[1,512], index: 3, kind: input, shape index: {}]   ;;  %s7812_s5 = inlined_call_operand.vmem [shape: f32[1,512], index: 5, kind: input, shape index: {}]   ;;  %s7813_s6 = inlined_call_operand.vmem [shape: f32[128,2], index: 6, kind: input, shape index: {}]   ;;  %s7814_s7 = inlined_call_operand.vmem [shape: f32[1,2], index: 7, kind: input, shape index: {}]   ;;  %s7815_s8 = inlined_call_operand.vmem [shape: f32[8,2], index: 8, kind: output, shape index: {}]  }
   0x1   :  { %v46_v0 = vld [vmem:[%s7807_s1 + $0x8] sm:$0xff]  ;;  %v48_v2 = vld [vmem:[%s7807_s1 + $0x18] sm:$0xff]  ;;  %v45_v5 = vld [vmem:[%s7807_s1] sm:$0xff] }
   0x2   :  { %v50_v1 = vld [vmem:[%s7807_s1 + $0x28] sm:$0xff]  ;;  %v52_v4 = vld [vmem:[%s7807_s1 + $0x38] sm:$0xff]  ;;  %v49_v6 = vld [vmem:[%s7807_s1 + $0x20] sm:$0xff] }
   0x3   :  { %v3534_v3 = vpack.c.bf16 %v50_v1, %v46_v0  ;;  %v3598_v7 = vpack.c.bf16 %v52_v4, %v48_v2  ;;  %v3536_v8 = vpack.c.bf16 %v49_v6, %v45_v5  ;;  %v47_v9 = vld [vmem:[%s7807_s1 + $0x10] sm:$0xff]  ;;  %v54_v11 = vld [vmem:[%s7807_s1 + $0x48] sm:$0xff]  ;;  %v56_v14 = vld [vmem:[%s7807_s1 + $0x58] sm:$0xff] }
   0x4   :  { %v51_v10 = vld [vmem:[%s7807_s1 + $0x30] sm:$0xff]  ;;  %v58_v13 = vld [vmem:[%s7807_s1 + $0x68] sm:$0xff]  ;;  %v60_v15 = vld [vmem:[%s7807_s1 + $0x78] sm:$0xff] }
   0x5   :  { %3535 = vmatprep.subr.bf16.mxu0 %v3534_v3  ;;  %v3600_v12 = vpack.c.bf16 %v51_v10, %v47_v9  ;;  %3599 = vmatprep.subr.bf16.mxu1 %v3598_v7  ;;  %v3538_v16 = vpack.c.bf16 %v58_v13, %v54_v11  ;;  %v3602_v17 = vpack.c.bf16 %v60_v15, %v56_v14  ;;  %v53_v18 = vld [vmem:[%s7807_s1 + $0x40] sm:$0xff]  ;;  %v55_v20 = vld [vmem:[%s7807_s1 + $0x50] sm:$0xff]  ;;  %v62_v23 = vld [vmem:[%s7807_s1 + $0x88] sm:$0xff] }
   0x6   :  { %3537 = vmatpush1.bf16.msra.mxu0 %v3536_v8  ;;  %v57_v19 = vld [vmem:[%s7807_s1 + $0x60] sm:$0xff]  ;;  %v59_v22 = vld [vmem:[%s7807_s1 + $0x70] sm:$0xff]  ;;  %v66_v24 = vld [vmem:[%s7807_s1 + $0xa8] sm:$0xff] }
   0x7   :  { %3601 = vmatpush1.bf16.msra.mxu1 %v3600_v12  ;;  %v3540_v21 = vpack.c.bf16 %v57_v19, %v53_v18  ;;  %3539 = vmatprep.subr.bf16.mxu0 %v3538_v16  ;;  %v3604_v25 = vpack.c.bf16 %v59_v22, %v55_v20  ;;  %v3542_v26 = vpack.c.bf16 %v66_v24, %v62_v23  ;;  %v64_v27 = vld [vmem:[%s7807_s1 + $0x98] sm:$0xff]  ;;  %v61_v29 = vld [vmem:[%s7807_s1 + $0x80] sm:$0xff]  ;;  %v63_v32 = vld [vmem:[%s7807_s1 + $0x90] sm:$0xff] }
   0x8   :  { %3603 = vmatprep.subr.bf16.mxu1 %v3602_v17  ;;  %v68_v28 = vld [vmem:[%s7807_s1 + $0xb8] sm:$0xff]  ;;  %v65_v31 = vld [vmem:[%s7807_s1 + $0xa0] sm:$0xff]  ;;  %v67_v33 = vld [vmem:[%s7807_s1 + $0xb0] sm:$0xff] }
   0x9   :  { %v3606_v30 = vpack.c.bf16 %v68_v28, %v64_v27  ;;  %v3544_v34 = vpack.c.bf16 %v65_v31, %v61_v29  ;;  %v70_v35 = vld [vmem:[%s7807_s1 + $0xc8] sm:$0xff]  ;;  %v72_v37 = vld [vmem:[%s7807_s1 + $0xd8] sm:$0xff]  ;;  %v3608_v38 = vpack.c.bf16 %v67_v33, %v63_v32  ;;  %v69_v41 = vld [vmem:[%s7807_s1 + $0xc0] sm:$0xff] }
   0xa   :  { %3541 = vmatpush1.bf16.msra.mxu0 %v3540_v21  ;;  %v74_v36 = vld [vmem:[%s7807_s1 + $0xe8] sm:$0xff]  ;;  %v76_v40 = vld [vmem:[%s7807_s1 + $0xf8] sm:$0xff]  ;;  %v73_v42 = vld [vmem:[%s7807_s1 + $0xe0] sm:$0xff] }
   0xb   :  { %3605 = vmatpush1.bf16.msra.mxu1 %v3604_v25  ;;  %3543 = vmatprep.subr.bf16.mxu0 %v3542_v26  ;;  %v3546_v39 = vpack.c.bf16 %v74_v36, %v70_v35  ;;  %v3610_v43 = vpack.c.bf16 %v76_v40, %v72_v37  ;;  %v71_v44 = vld [vmem:[%s7807_s1 + $0xd0] sm:$0xff]  ;;  %v78_v46 = vld [vmem:[%s7807_s1 + $0x108] sm:$0xff]  ;;  %v80_v48 = vld [vmem:[%s7807_s1 + $0x118] sm:$0xff]  ;;  %v3548_v50 = vpack.c.bf16 %v73_v42, %v69_v41 }
   0xc   :  { %3607 = vmatprep.subr.bf16.mxu1 %v3606_v30  ;;  %v75_v45 = vld [vmem:[%s7807_s1 + $0xf0] sm:$0xff]  ;;  %v82_v47 = vld [vmem:[%s7807_s1 + $0x128] sm:$0xff]  ;;  %v84_v49 = vld [vmem:[%s7807_s1 + $0x138] sm:$0xff] }
   0xd   :  { %v3612_v51 = vpack.c.bf16 %v75_v45, %v71_v44  ;;  %v3550_v52 = vpack.c.bf16 %v82_v47, %v78_v46  ;;  %v77_v53 = vld [vmem:[%s7807_s1 + $0x100] sm:$0xff]  ;;  %v79_v55 = vld [vmem:[%s7807_s1 + $0x110] sm:$0xff]  ;;  %v3614_v56 = vpack.c.bf16 %v84_v49, %v80_v48  ;;  %v86_v58 = vld [vmem:[%s7807_s1 + $0x148] sm:$0xff] }
   0xe   :  { %3545 = vmatpush1.bf16.msra.mxu0 %v3544_v34  ;;  %v81_v54 = vld [vmem:[%s7807_s1 + $0x120] sm:$0xff]  ;;  %v83_v57 = vld [vmem:[%s7807_s1 + $0x130] sm:$0xff]  ;;  %v90_v59 = vld [vmem:[%s7807_s1 + $0x168] sm:$0xff] }
   0xf   :  { %3609 = vmatpush1.bf16.msra.mxu1 %v3608_v38  ;;  %3547 = vmatprep.subr.bf16.mxu0 %v3546_v39  ;;  %v88_v60 = vld [vmem:[%s7807_s1 + $0x158] sm:$0xff]  ;;  %v3552_v62 = vpack.c.bf16 %v81_v54, %v77_v53  ;;  %v3616_v63 = vpack.c.bf16 %v83_v57, %v79_v55  ;;  %v3554_v0 = vpack.c.bf16 %v90_v59, %v86_v58  ;;  %v85_v1 = vld [vmem:[%s7807_s1 + $0x140] sm:$0xff]  ;;  %v87_v3 = vld [vmem:[%s7807_s1 + $0x150] sm:$0xff] }
  0x10   :  { %3611 = vmatprep.subr.bf16.mxu1 %v3610_v43  ;;  %v92_v61 = vld [vmem:[%s7807_s1 + $0x178] sm:$0xff]  ;;  %v89_v2 = vld [vmem:[%s7807_s1 + $0x160] sm:$0xff]  ;;  %v91_v5 = vld [vmem:[%s7807_s1 + $0x170] sm:$0xff] }
  0x11   :  { %v3618_v4 = vpack.c.bf16 %v92_v61, %v88_v60  ;;  %v94_v6 = vld [vmem:[%s7807_s1 + $0x188] sm:$0xff]  ;;  %v96_v8 = vld [vmem:[%s7807_s1 + $0x198] sm:$0xff]  ;;  %v3556_v10 = vpack.c.bf16 %v89_v2, %v85_v1  ;;  %v3620_v11 = vpack.c.bf16 %v91_v5, %v87_v3  ;;  %v93_v13 = vld [vmem:[%s7807_s1 + $0x180] sm:$0xff] }
  0x12   :  { %3549 = vmatpush1.bf16.msra.mxu0 %v3548_v50  ;;  %v98_v7 = vld [vmem:[%s7807_s1 + $0x1a8] sm:$0xff]  ;;  %v100_v9 = vld [vmem:[%s7807_s1 + $0x1b8] sm:$0xff]  ;;  %v97_v14 = vld [vmem:[%s7807_s1 + $0x1a0] sm:$0xff] }
  0x13   :  { %3613 = vmatpush1.bf16.msra.mxu1 %v3612_v51  ;;  %3551 = vmatprep.subr.bf16.mxu0 %v3550_v52  ;;  %v3558_v12 = vpack.c.bf16 %v98_v7, %v94_v6  ;;  %v95_v15 = vld [vmem:[%s7807_s1 + $0x190] sm:$0xff]  ;;  %v3622_v16 = vpack.c.bf16 %v100_v9, %v96_v8  ;;  %v102_v18 = vld [vmem:[%s7807_s1 + $0x1c8] sm:$0xff]  ;;  %v104_v20 = vld [vmem:[%s7807_s1 + $0x1d8] sm:$0xff]  ;;  %v3560_v22 = vpack.c.bf16 %v97_v14, %v93_v13 }
  0x14   :  { %3615 = vmatprep.subr.bf16.mxu1 %v3614_v56  ;;  %v99_v17 = vld [vmem:[%s7807_s1 + $0x1b0] sm:$0xff]  ;;  %v106_v19 = vld [vmem:[%s7807_s1 + $0x1e8] sm:$0xff]  ;;  %v108_v21 = vld [vmem:[%s7807_s1 + $0x1f8] sm:$0xff] }
  0x15   :  { %v3624_v23 = vpack.c.bf16 %v99_v17, %v95_v15  ;;  %v3562_v24 = vpack.c.bf16 %v106_v19, %v102_v18  ;;  %v101_v25 = vld [vmem:[%s7807_s1 + $0x1c0] sm:$0xff]  ;;  %v103_v27 = vld [vmem:[%s7807_s1 + $0x1d0] sm:$0xff]  ;;  %v3626_v28 = vpack.c.bf16 %v108_v21, %v104_v20  ;;  %v110_v30 = vld [vmem:[%s7807_s1 + $0x208] sm:$0xff] }
  0x16   :  { %3553 = vmatpush1.bf16.msra.mxu0 %v3552_v62  ;;  %v105_v26 = vld [vmem:[%s7807_s1 + $0x1e0] sm:$0xff]  ;;  %v107_v29 = vld [vmem:[%s7807_s1 + $0x1f0] sm:$0xff]  ;;  %v114_v31 = vld [vmem:[%s7807_s1 + $0x228] sm:$0xff] }
  0x17   :  { %3617 = vmatpush1.bf16.msra.mxu1 %v3616_v63  ;;  %3555 = vmatprep.subr.bf16.mxu0 %v3554_v0  ;;  %v112_v32 = vld [vmem:[%s7807_s1 + $0x218] sm:$0xff]  ;;  %v3564_v34 = vpack.c.bf16 %v105_v26, %v101_v25  ;;  %v3628_v35 = vpack.c.bf16 %v107_v29, %v103_v27  ;;  %v3566_v36 = vpack.c.bf16 %v114_v31, %v110_v30  ;;  %v109_v37 = vld [vmem:[%s7807_s1 + $0x200] sm:$0xff]  ;;  %v111_v39 = vld [vmem:[%s7807_s1 + $0x210] sm:$0xff] }
  0x18   :  { %3619 = vmatprep.subr.bf16.mxu1 %v3618_v4  ;;  %v116_v33 = vld [vmem:[%s7807_s1 + $0x238] sm:$0xff]  ;;  %v113_v38 = vld [vmem:[%s7807_s1 + $0x220] sm:$0xff]  ;;  %v115_v41 = vld [vmem:[%s7807_s1 + $0x230] sm:$0xff] }
  0x19   :  { %v3630_v40 = vpack.c.bf16 %v116_v33, %v112_v32  ;;  %v118_v42 = vld [vmem:[%s7807_s1 + $0x248] sm:$0xff]  ;;  %v120_v44 = vld [vmem:[%s7807_s1 + $0x258] sm:$0xff]  ;;  %v3568_v46 = vpack.c.bf16 %v113_v38, %v109_v37  ;;  %v3632_v47 = vpack.c.bf16 %v115_v41, %v111_v39  ;;  %v117_v49 = vld [vmem:[%s7807_s1 + $0x240] sm:$0xff] }
  0x1a   :  { %3557 = vmatpush1.bf16.msra.mxu0 %v3556_v10  ;;  %v122_v43 = vld [vmem:[%s7807_s1 + $0x268] sm:$0xff]  ;;  %v124_v45 = vld [vmem:[%s7807_s1 + $0x278] sm:$0xff]  ;;  %v121_v50 = vld [vmem:[%s7807_s1 + $0x260] sm:$0xff] }
  0x1b   :  { %3621 = vmatpush1.bf16.msra.mxu1 %v3620_v11  ;;  %3559 = vmatprep.subr.bf16.mxu0 %v3558_v12  ;;  %v3570_v48 = vpack.c.bf16 %v122_v43, %v118_v42  ;;  %v119_v51 = vld [vmem:[%s7807_s1 + $0x250] sm:$0xff]  ;;  %v3634_v52 = vpack.c.bf16 %v124_v45, %v120_v44  ;;  %v126_v54 = vld [vmem:[%s7807_s1 + $0x288] sm:$0xff]  ;;  %v128_v56 = vld [vmem:[%s7807_s1 + $0x298] sm:$0xff]  ;;  %v3572_v58 = vpack.c.bf16 %v121_v50, %v117_v49 }
  0x1c   :  { %3623 = vmatprep.subr.bf16.mxu1 %v3622_v16  ;;  %v123_v53 = vld [vmem:[%s7807_s1 + $0x270] sm:$0xff]  ;;  %v130_v55 = vld [vmem:[%s7807_s1 + $0x2a8] sm:$0xff]  ;;  %v132_v57 = vld [vmem:[%s7807_s1 + $0x2b8] sm:$0xff] }
  0x1d   :  { %v3636_v59 = vpack.c.bf16 %v123_v53, %v119_v51  ;;  %v3574_v60 = vpack.c.bf16 %v130_v55, %v126_v54  ;;  %v125_v61 = vld [vmem:[%s7807_s1 + $0x280] sm:$0xff]  ;;  %v127_v63 = vld [vmem:[%s7807_s1 + $0x290] sm:$0xff]  ;;  %v3638_v0 = vpack.c.bf16 %v132_v57, %v128_v56  ;;  %v134_v2 = vld [vmem:[%s7807_s1 + $0x2c8] sm:$0xff] }
  0x1e   :  { %3561 = vmatpush1.bf16.msra.mxu0 %v3560_v22  ;;  %v129_v62 = vld [vmem:[%s7807_s1 + $0x2a0] sm:$0xff]  ;;  %v131_v1 = vld [vmem:[%s7807_s1 + $0x2b0] sm:$0xff]  ;;  %v138_v3 = vld [vmem:[%s7807_s1 + $0x2e8] sm:$0xff] }
  0x1f   :  { %3625 = vmatpush1.bf16.msra.mxu1 %v3624_v23  ;;  %3563 = vmatprep.subr.bf16.mxu0 %v3562_v24  ;;  %v136_v4 = vld [vmem:[%s7807_s1 + $0x2d8] sm:$0xff]  ;;  %v3576_v6 = vpack.c.bf16 %v129_v62, %v125_v61  ;;  %v133_v7 = vld [vmem:[%s7807_s1 + $0x2c0] sm:$0xff]  ;;  %v3640_v8 = vpack.c.bf16 %v131_v1, %v127_v63  ;;  %v3578_v9 = vpack.c.bf16 %v138_v3, %v134_v2  ;;  %v135_v11 = vld [vmem:[%s7807_s1 + $0x2d0] sm:$0xff] }
  0x20   :  { %3627 = vmatprep.subr.bf16.mxu1 %v3626_v28  ;;  %v140_v5 = vld [vmem:[%s7807_s1 + $0x2f8] sm:$0xff]  ;;  %v137_v10 = vld [vmem:[%s7807_s1 + $0x2e0] sm:$0xff]  ;;  %v139_v12 = vld [vmem:[%s7807_s1 + $0x2f0] sm:$0xff] }
  0x21   :  { %v3642_v13 = vpack.c.bf16 %v140_v5, %v136_v4  ;;  %v142_v14 = vld [vmem:[%s7807_s1 + $0x308] sm:$0xff]  ;;  %v144_v17 = vld [vmem:[%s7807_s1 + $0x318] sm:$0xff]  ;;  %v3580_v19 = vpack.c.bf16 %v137_v10, %v133_v7  ;;  %v3644_v20 = vpack.c.bf16 %v139_v12, %v135_v11  ;;  %v141_v22 = vld [vmem:[%s7807_s1 + $0x300] sm:$0xff] }
  0x22   :  { %3565 = vmatpush1.bf16.msra.mxu0 %v3564_v34  ;;  %v146_v15 = vld [vmem:[%s7807_s1 + $0x328] sm:$0xff]  ;;  %v148_v18 = vld [vmem:[%s7807_s1 + $0x338] sm:$0xff]  ;;  %v145_v23 = vld [vmem:[%s7807_s1 + $0x320] sm:$0xff] }
  0x23   :  { %3629 = vmatpush1.bf16.msra.mxu1 %v3628_v35  ;;  %3567 = vmatprep.subr.bf16.mxu0 %v3566_v36  ;;  %v30_v16 = vld [vmem:[%s7808_s0 + $0x8] sm:$0xff]  ;;  %v3582_v21 = vpack.c.bf16 %v146_v15, %v142_v14  ;;  %v143_v24 = vld [vmem:[%s7807_s1 + $0x310] sm:$0xff]  ;;  %v3646_v25 = vpack.c.bf16 %v148_v18, %v144_v17  ;;  %v152_v29 = vld [vmem:[%s7807_s1 + $0x358] sm:$0xff]  ;;  %v3584_v31 = vpack.c.bf16 %v145_v23, %v141_v22 }
  0x24   :  { %3631 = vmatprep.subr.bf16.mxu1 %v3630_v40  ;;  %259 = vmatprep.mubr.f32.mxu0 %v30_v16  ;;  %v147_v26 = vld [vmem:[%s7807_s1 + $0x330] sm:$0xff]  ;;  %v150_v27 = vld [vmem:[%s7807_s1 + $0x348] sm:$0xff]  ;;  %v156_v30 = vld [vmem:[%s7807_s1 + $0x378] sm:$0xff] }
  0x25   :  { %372 = vmatprep.mubr.f32.mxu1 %v30_v16  ;;  %v154_v28 = vld [vmem:[%s7807_s1 + $0x368] sm:$0xff]  ;;  %v3648_v32 = vpack.c.bf16 %v147_v26, %v143_v24  ;;  %v149_v34 = vld [vmem:[%s7807_s1 + $0x340] sm:$0xff]  ;;  %v151_v36 = vld [vmem:[%s7807_s1 + $0x350] sm:$0xff]  ;;  %v3650_v37 = vpack.c.bf16 %v156_v30, %v152_v29 }
  0x26   :  { %3569 = vmatpush1.bf16.msra.mxu0 %v3568_v46  ;;  %v3586_v33 = vpack.c.bf16 %v154_v28, %v150_v27  ;;  %v153_v35 = vld [vmem:[%s7807_s1 + $0x360] sm:$0xff]  ;;  %v155_v38 = vld [vmem:[%s7807_s1 + $0x370] sm:$0xff]  ;;  %v158_v39 = vld [vmem:[%s7807_s1 + $0x388] sm:$0xff] }
  0x27   :  { %3633 = vmatpush1.bf16.msra.mxu1 %v3632_v47  ;;  %3571 = vmatprep.subr.bf16.mxu0 %v3570_v48  ;;  %v162_v40 = vld [vmem:[%s7807_s1 + $0x3a8] sm:$0xff]  ;;  %v160_v41 = vld [vmem:[%s7807_s1 + $0x398] sm:$0xff]  ;;  %v3588_v43 = vpack.c.bf16 %v153_v35, %v149_v34  ;;  %v3652_v44 = vpack.c.bf16 %v155_v38, %v151_v36  ;;  %v157_v46 = vld [vmem:[%s7807_s1 + $0x380] sm:$0xff] }
  0x28   :  { %3635 = vmatprep.subr.bf16.mxu1 %v3634_v52  ;;  %v164_v42 = vld [vmem:[%s7807_s1 + $0x3b8] sm:$0xff]  ;;  %v3590_v45 = vpack.c.bf16 %v162_v40, %v158_v39  ;;  %v161_v47 = vld [vmem:[%s7807_s1 + $0x3a0] sm:$0xff]  ;;  %v159_v48 = vld [vmem:[%s7807_s1 + $0x390] sm:$0xff] }
  0x29   :  { %v3654_v49 = vpack.c.bf16 %v164_v42, %v160_v41  ;;  %v163_v50 = vld [vmem:[%s7807_s1 + $0x3b0] sm:$0xff]  ;;  %v166_v51 = vld [vmem:[%s7807_s1 + $0x3c8] sm:$0xff]  ;;  %v168_v53 = vld [vmem:[%s7807_s1 + $0x3d8] sm:$0xff]  ;;  %v3592_v55 = vpack.c.bf16 %v161_v47, %v157_v46 }
  0x2a   :  { %3573 = vmatpush1.bf16.msra.mxu0 %v3572_v58  ;;  %v170_v52 = vld [vmem:[%s7807_s1 + $0x3e8] sm:$0xff]  ;;  %v172_v54 = vld [vmem:[%s7807_s1 + $0x3f8] sm:$0xff]  ;;  %v3656_v56 = vpack.c.bf16 %v163_v50, %v159_v48  ;;  %v165_v58 = vld [vmem:[%s7807_s1 + $0x3c0] sm:$0xff] }
  0x2b   :  { %3637 = vmatpush1.bf16.msra.mxu1 %v3636_v59  ;;  %3575 = vmatprep.subr.bf16.mxu0 %v3574_v60  ;;  %v3594_v57 = vpack.c.bf16 %v170_v52, %v166_v51  ;;  %v169_v59 = vld [vmem:[%s7807_s1 + $0x3e0] sm:$0xff]  ;;  %v167_v60 = vld [vmem:[%s7807_s1 + $0x3d0] sm:$0xff]  ;;  %v3658_v61 = vpack.c.bf16 %v172_v54, %v168_v53  ;;  %v422_v63 = vld [vmem:[%s7809_s2 + $0x8] sm:$0xff] }
  0x2c   :  { %3639 = vmatprep.subr.bf16.mxu1 %v3638_v0  ;;  %v171_v62 = vld [vmem:[%s7807_s1 + $0x3f0] sm:$0xff]  ;;  %v426_v0 = vld [vmem:[%s7809_s2 + $0x28] sm:$0xff]  ;;  %v424_v1 = vld [vmem:[%s7809_s2 + $0x18] sm:$0xff]  ;;  %v3596_v3 = vpack.c.bf16 %v169_v59, %v165_v58 }
  0x2d   :  { %v428_v2 = vld [vmem:[%s7809_s2 + $0x38] sm:$0xff]  ;;  %v3660_v4 = vpack.c.bf16 %v171_v62, %v167_v60  ;;  %v5996_v5 = vpack.c.bf16 %v426_v0, %v422_v63  ;;  %v425_v7 = vld [vmem:[%s7809_s2 + $0x20] sm:$0xff]  ;;  %v427_v10 = vld [vmem:[%s7809_s2 + $0x30] sm:$0xff] }
  0x2e   :  { %3577 = vmatpush1.bf16.msra.mxu0 %v3576_v6  ;;  %v421_v6 = vld [vmem:[%s7809_s2] sm:$0xff]  ;;  %v430_v11 = vld [vmem:[%s7809_s2 + $0x48] sm:$0xff]  ;;  %v432_v15 = vld [vmem:[%s7809_s2 + $0x58] sm:$0xff] }
  0x2f   :  { %3641 = vmatpush1.bf16.msra.mxu1 %v3640_v8  ;;  %3579 = vmatprep.subr.bf16.mxu0 %v3578_v9  ;;  %7950 = vst [vmem:[#allocation2_spill] sm:$0xff] %v5996_v5  ;;  %v6004_v8 = vpack.c.bf16 %v428_v2, %v424_v1  ;;  %v423_v9 = vld [vmem:[%s7809_s2 + $0x10] sm:$0xff]  ;;  %v434_v12 = vld [vmem:[%s7809_s2 + $0x68] sm:$0xff]  ;;  %v6021_v14 = vpack.c.bf16 %v425_v7, %v421_v6  ;;  %v436_v16 = vld [vmem:[%s7809_s2 + $0x78] sm:$0xff] }
  0x30   :  { %3643 = vmatprep.subr.bf16.mxu1 %v3642_v13  ;;  %v29_v13 = vld [vmem:[%s7808_s0] sm:$0xff]  ;;  %v6030_v17 = vpack.c.bf16 %v427_v10, %v423_v9  ;;  %v431_v22 = vld [vmem:[%s7809_s2 + $0x50] sm:$0xff]  ;;  %v6050_v24 = vpack.c.bf16 %v436_v16, %v432_v15  ;;  %v442_v26 = vld [vmem:[%s7809_s2 + $0xa8] sm:$0xff] }
  0x31   :  { %7951 = vst [vmem:[#allocation3_spill] sm:$0xff] %v6004_v8  ;;  %v429_v18 = vld [vmem:[%s7809_s2 + $0x40] sm:$0xff]  ;;  %v435_v23 = vld [vmem:[%s7809_s2 + $0x70] sm:$0xff]  ;;  %v440_v29 = vld [vmem:[%s7809_s2 + $0x98] sm:$0xff] }
  0x32   :  { %3581 = vmatpush1.bf16.msra.mxu0 %v3580_v19  ;;  %v433_v19 = vld [vmem:[%s7809_s2 + $0x60] sm:$0xff]  ;;  %v31_v27 = vld [vmem:[%s7808_s0 + $0x10] sm:$0xff]  ;;  %v444_v30 = vld [vmem:[%s7809_s2 + $0xb8] sm:$0xff] }
  0x33   :  { %3645 = vmatpush1.bf16.msra.mxu1 %v3644_v20  ;;  %3583 = vmatprep.subr.bf16.mxu0 %v3582_v21  ;;  %v32_v20 = vld [vmem:[%s7808_s0 + $0x18] sm:$0xff]  ;;  %v6042_v21 = vpack.c.bf16 %v434_v12, %v430_v11  ;;  %v6062_v28 = vpack.c.bf16 %v433_v19, %v429_v18  ;;  %v34_v34 = vld [vmem:[%s7808_s0 + $0x28] sm:$0xff]  ;;  %v439_v36 = vld [vmem:[%s7809_s2 + $0x90] sm:$0xff]  ;;  %v6092_v38 = vpack.c.bf16 %v444_v30, %v440_v29 }
  0x34   :  { %3647 = vmatprep.subr.bf16.mxu1 %v3646_v25  ;;  %v438_v25 = vld [vmem:[%s7809_s2 + $0x88] sm:$0xff]  ;;  %v33_v41 = vld [vmem:[%s7808_s0 + $0x20] sm:$0xff]  ;;  %v36_v48 = vld [vmem:[%s7808_s0 + $0x38] sm:$0xff] }
  0x35   :  { %v6083_v35 = vpack.c.bf16 %v442_v26, %v438_v25  ;;  %v446_v39 = vld [vmem:[%s7809_s2 + $0xc8] sm:$0xff]  ;;  %v445_v46 = vld [vmem:[%s7809_s2 + $0xc0] sm:$0xff]  ;;  %v447_v50 = vld [vmem:[%s7809_s2 + $0xd0] sm:$0xff] }
  0x36   :  { %3585 = vmatpush1.bf16.msra.mxu0 %v3584_v31  ;;  %v6071_v31 = vpack.c.bf16 %v435_v23, %v431_v22  ;;  %v450_v40 = vld [vmem:[%s7809_s2 + $0xe8] sm:$0xff]  ;;  %v449_v47 = vld [vmem:[%s7809_s2 + $0xe0] sm:$0xff]  ;;  %v451_v51 = vld [vmem:[%s7809_s2 + $0xf0] sm:$0xff] }
  0x37   :  { %3649 = vmatpush1.bf16.msra.mxu1 %v3648_v32  ;;  %3587 = vmatprep.subr.bf16.mxu0 %v3586_v33  ;;  %v437_v32 = vld [vmem:[%s7809_s2 + $0x80] sm:$0xff]  ;;  %v454_v53 = vld [vmem:[%s7809_s2 + $0x108] sm:$0xff]  ;;  %v460_v58 = vld [vmem:[%s7809_s2 + $0x138] sm:$0xff]  ;;  %v6155_v59 = vpack.c.bf16 %v451_v51, %v447_v50 }
  0x38   :  { %3651 = vmatprep.subr.bf16.mxu1 %v3650_v37  ;;  %v441_v33 = vld [vmem:[%s7809_s2 + $0xa0] sm:$0xff]  ;;  %v443_v37 = vld [vmem:[%s7809_s2 + $0xb0] sm:$0xff]  ;;  %v458_v54 = vld [vmem:[%s7809_s2 + $0x128] sm:$0xff] }
  0x39   :  { %v6104_v42 = vpack.c.bf16 %v441_v33, %v437_v32  ;;  %v453_v60 = vld [vmem:[%s7809_s2 + $0x100] sm:$0xff]  ;;  %v38_v62 = vld [vmem:[%s7808_s0 + $0x48] sm:$0xff]  ;;  %v6167_v63 = vpack.c.bf16 %v458_v54, %v454_v53  ;;  %v455_v0 = vld [vmem:[%s7809_s2 + $0x110] sm:$0xff] }
  0x3a   :  { %3589 = vmatpush1.bf16.msra.mxu0 %v3588_v43  ;;  %v448_v43 = vld [vmem:[%s7809_s2 + $0xd8] sm:$0xff]  ;;  %v459_v1 = vld [vmem:[%s7809_s2 + $0x130] sm:$0xff]  ;;  %v37_v6 = vld [vmem:[%s7808_s0 + $0x40] sm:$0xff] }
  0x3b   :  { %3653 = vmatpush1.bf16.msra.mxu1 %v3652_v44  ;;  %3591 = vmatprep.subr.bf16.mxu0 %v3590_v45  ;;  %v452_v44 = vld [vmem:[%s7809_s2 + $0xf8] sm:$0xff]  ;;  %v6113_v45 = vpack.c.bf16 %v443_v37, %v439_v36  ;;  %v6197_v11 = vpack.c.bf16 %v459_v1, %v455_v0  ;;  %v461_v12 = vld [vmem:[%s7809_s2 + $0x140] sm:$0xff]  ;;  %v463_v18 = vld [vmem:[%s7809_s2 + $0x150] sm:$0xff] }
  0x3c   :  { %3655 = vmatprep.subr.bf16.mxu1 %v3654_v49  ;;  %v6125_v49 = vpack.c.bf16 %v450_v40, %v446_v39  ;;  %v6134_v52 = vpack.c.bf16 %v452_v44, %v448_v43  ;;  %v464_v9 = vld [vmem:[%s7809_s2 + $0x158] sm:$0xff]  ;;  %v467_v19 = vld [vmem:[%s7809_s2 + $0x170] sm:$0xff]  ;;  %v470_v22 = vld [vmem:[%s7809_s2 + $0x188] sm:$0xff] }
  0x3d   :  { %v468_v10 = vld [vmem:[%s7809_s2 + $0x178] sm:$0xff]  ;;  %v474_v23 = vld [vmem:[%s7809_s2 + $0x1a8] sm:$0xff]  ;;  %v39_v25 = vld [vmem:[%s7808_s0 + $0x50] sm:$0xff]  ;;  %v6239_v30 = vpack.c.bf16 %v467_v19, %v463_v18 }
  0x3e   :  { %3593 = vmatpush1.bf16.msra.mxu0 %v3592_v55  ;;  %v35_v55 = vld [vmem:[%s7808_s0 + $0x30] sm:$0xff]  ;;  %v40_v15 = vld [vmem:[%s7808_s0 + $0x58] sm:$0xff]  ;;  %v469_v32 = vld [vmem:[%s7809_s2 + $0x180] sm:$0xff]  ;;  %v6251_v36 = vpack.c.bf16 %v474_v23, %v470_v22 }
  0x3f   :  { %3657 = vmatpush1.bf16.msra.mxu1 %v3656_v56  ;;  %3595 = vmatprep.subr.bf16.mxu0 %v3594_v57  ;;  %v6146_v56 = vpack.c.bf16 %v449_v47, %v445_v46  ;;  %v456_v57 = vld [vmem:[%s7809_s2 + $0x118] sm:$0xff]  ;;  %v473_v33 = vld [vmem:[%s7809_s2 + $0x1a0] sm:$0xff]  ;;  %v471_v37 = vld [vmem:[%s7809_s2 + $0x190] sm:$0xff] }
  0x40   :  { %3659 = vmatprep.subr.bf16.mxu1 %v3658_v61  ;;  %v457_v61 = vld [vmem:[%s7809_s2 + $0x120] sm:$0xff]  ;;  %v6176_v2 = vpack.c.bf16 %v460_v58, %v456_v57  ;;  %v476_v29 = vld [vmem:[%s7809_s2 + $0x1b8] sm:$0xff]  ;;  %v475_v39 = vld [vmem:[%s7809_s2 + $0x1b0] sm:$0xff]  ;;  %v6272_v46 = vpack.c.bf16 %v473_v33, %v469_v32 }
  0x41   :  { %v6188_v7 = vpack.c.bf16 %v457_v61, %v453_v60  ;;  %v482_v43 = vld [vmem:[%s7809_s2 + $0x1e8] sm:$0xff]  ;;  %v41_v44 = vld [vmem:[%s7808_s0 + $0x60] sm:$0xff]  ;;  %v480_v47 = vld [vmem:[%s7809_s2 + $0x1d8] sm:$0xff]  ;;  %v6281_v50 = vpack.c.bf16 %v475_v39, %v471_v37 }
  0x42   :  { %3597 = vmatpush1.bf16.msra.mxu0 %v3596_v3  ;;  %v462_v3 = vld [vmem:[%s7809_s2 + $0x148] sm:$0xff]  ;;  %v477_v51 = vld [vmem:[%s7809_s2 + $0x1c0] sm:$0xff]  ;;  %v44_v54 = vld [vmem:[%s7808_s0 + $0x78] sm:$0xff] }
  0x43   :  { %3661 = vmatpush1.bf16.msra.mxu1 %v3660_v4  ;;  %3663 = vmatprep.subr.bf16.mxu0 %v5996_v5  ;;  %v466_v4 = vld [vmem:[%s7809_s2 + $0x168] sm:$0xff]  ;;  %v481_v53 = vld [vmem:[%s7809_s2 + $0x1e0] sm:$0xff]  ;;  %v479_v57 = vld [vmem:[%s7809_s2 + $0x1d0] sm:$0xff] }
  0x44   :  { %3695 = vmatprep.subr.bf16.mxu1 %v6004_v8  ;;  %v6209_v16 = vpack.c.bf16 %v466_v4, %v462_v3  ;;  %v483_v58 = vld [vmem:[%s7809_s2 + $0x1f0] sm:$0xff]  ;;  %v486_v61 = vld [vmem:[%s7810_s4 + $0x8] sm:$0xff]  ;;  %v6314_v1 = vpack.c.bf16 %v481_v53, %v477_v51  ;;  %v488_v3 = vld [vmem:[%s7810_s4 + $0x18] sm:$0xff] }
  0x45   :  { %260 = vmatmul.mubr.f32.vlgmr.msra.gmra.mrb[0].mxu0 %v29_v13  ;;  %v43_v0 = vld [vmem:[%s7808_s0 + $0x70] sm:$0xff]  ;;  %v492_v4 = vld [vmem:[%s7810_s4 + $0x38] sm:$0xff]  ;;  %v494_v18 = vld [vmem:[%s7810_s4 + $0x48] sm:$0xff] }
  0x46   :  { %373 = vmatmul.mubr.f32.vlgmr.msra.gmra.mrb[0].mxu1 %v29_v13  ;;  %3665 = vmatpush1.bf16.msra.mxu0 %v6021_v14  ;;  %v465_v13 = vld [vmem:[%s7809_s2 + $0x160] sm:$0xff]  ;;  %v498_v19 = vld [vmem:[%s7810_s4 + $0x68] sm:$0xff]  ;;  %v6347_v22 = vpack.c.bf16 %v492_v4, %v488_v3  ;;  %v496_v23 = vld [vmem:[%s7810_s4 + $0x58] sm:$0xff] }
  0x47   :  { %3697 = vmatpush1.bf16.msra.mxu1 %v6030_v17  ;;  %265 = vmatprep.mubr.f32.mxu0 %v32_v20  ;;  %v6230_v26 = vpack.c.bf16 %v465_v13, %v461_v12  ;;  %v487_v12 = vld [vmem:[%s7810_s4 + $0x10] sm:$0xff]  ;;  %v6362_v33 = vpack.c.bf16 %v498_v19, %v494_v18  ;;  %v497_v37 = vld [vmem:[%s7810_s4 + $0x60] sm:$0xff]  ;;  %v508_v51 = vld [vmem:[%s7810_s4 + $0xb8] sm:$0xff] }
  0x48   :  { %378 = vmatprep.mubr.f32.mxu1 %v32_v20  ;;  %3667 = vmatprep.subr.bf16.mxu0 %v6042_v21  ;;  %v6218_v20 = vpack.c.bf16 %v468_v10, %v464_v9  ;;  %v485_v9 = vld [vmem:[%s7810_s4] sm:$0xff]  ;;  %v495_v39 = vld [vmem:[%s7810_s4 + $0x50] sm:$0xff]  ;;  %v510_v4 = vld [vmem:[%s7810_s4 + $0xc8] sm:$0xff] }
  0x49   :  { %266 = vmatmul.mubr.f32.gmra.mrb[2].mxu0 %v31_v27  ;;  %3699 = vmatprep.subr.bf16.mxu1 %v6050_v24  ;;  %v489_v10 = vld [vmem:[%s7810_s4 + $0x20] sm:$0xff]  ;;  %v507_v3 = vld [vmem:[%s7810_s4 + $0xb0] sm:$0xff] }
  0x4a   :  { %379 = vmatmul.mubr.f32.gmra.mrb[2].mxu1 %v31_v27  ;;  %3669 = vmatpush1.bf16.msra.mxu0 %v6062_v28  ;;  %v472_v27 = vld [vmem:[%s7809_s2 + $0x198] sm:$0xff] }
  0x4b   :  { %3701 = vmatpush1.bf16.msra.mxu1 %v6071_v31  ;;  %271 = vmatprep.mubr.f32.mxu0 %v34_v34  ;;  %v6260_v40 = vpack.c.bf16 %v476_v29, %v472_v27  ;;  %v6356_v27 = vpack.c.bf16 %v489_v10, %v485_v9  ;;  %v7816_v29 = vmov 0.0   ;;  %v514_v9 = vld [vmem:[%s7810_s4 + $0xe8] sm:$0xff]  ;;  %v512_v10 = vld [vmem:[%s7810_s4 + $0xd8] sm:$0xff] }
  0x4c   :  { %384 = vmatprep.mubr.f32.mxu1 %v34_v34  ;;  %3671 = vmatprep.subr.bf16.mxu0 %v6083_v35  ;;  %v42_v34 = vld [vmem:[%s7808_s0 + $0x68] sm:$0xff]  ;;  %v6440_v19 = vpack.c.bf16 %v514_v9, %v510_v4  ;;  %v519_v9 = vld [vmem:[%s7810_s4 + $0x110] sm:$0xff] }
  0x4d   :  { %272 = vmatmul.mubr.f32.gmra.mrb[4].mxu0 %v33_v41  ;;  %3703 = vmatprep.subr.bf16.mxu1 %v6092_v38 }
  0x4e   :  { %385 = vmatmul.mubr.f32.gmra.mrb[4].mxu1 %v33_v41  ;;  %3673 = vmatpush1.bf16.msra.mxu0 %v6104_v42  ;;  %v478_v41 = vld [vmem:[%s7809_s2 + $0x1c8] sm:$0xff]  ;;  %7954 = vst [vmem:[#allocation6_spill] sm:$0xff] %v6440_v19 }
  0x4f   :  { %3705 = vmatpush1.bf16.msra.mxu1 %v6113_v45  ;;  %277 = vmatprep.mubr.f32.mxu0 %v36_v48 }
  0x50   :  { %390 = vmatprep.mubr.f32.mxu1 %v36_v48  ;;  %3675 = vmatprep.subr.bf16.mxu0 %v6125_v49  ;;  %v484_v48 = vld [vmem:[%s7809_s2 + $0x1f8] sm:$0xff] }
  0x51   :  { %278 = vmatmul.mubr.f32.gmra.mrb[6].mxu0 %v35_v55  ;;  %3707 = vmatprep.subr.bf16.mxu1 %v6134_v52  ;;  %v6302_v60 = vpack.c.bf16 %v484_v48, %v480_v47  ;;  %v506_v47 = vld [vmem:[%s7810_s4 + $0xa8] sm:$0xff]  ;;  %v504_v48 = vld [vmem:[%s7810_s4 + $0x98] sm:$0xff] }
  0x52   :  { %391 = vmatmul.mubr.f32.gmra.mrb[6].mxu1 %v35_v55  ;;  %3677 = vmatpush1.bf16.msra.mxu0 %v6146_v56  ;;  %v6293_v55 = vpack.c.bf16 %v482_v43, %v478_v41  ;;  %v499_v43 = vld [vmem:[%s7810_s4 + $0x70] sm:$0xff] }
  0x53   :  { %3709 = vmatpush1.bf16.msra.mxu1 %v6155_v59  ;;  %283 = vmatprep.mubr.f32.mxu0 %v38_v62 }
  0x54   :  { %396 = vmatprep.mubr.f32.mxu1 %v38_v62  ;;  %3679 = vmatprep.subr.bf16.mxu0 %v6167_v63  ;;  %v490_v62 = vld [vmem:[%s7810_s4 + $0x28] sm:$0xff] }
  0x55   :  { %284 = vmatmul.mubr.f32.gmra.mrb[8].mxu0 %v37_v6  ;;  %3711 = vmatprep.subr.bf16.mxu1 %v6176_v2  ;;  %v6335_v13 = vpack.c.bf16 %v490_v62, %v486_v61  ;;  %v505_v61 = vld [vmem:[%s7810_s4 + $0xa0] sm:$0xff]  ;;  %v503_v62 = vld [vmem:[%s7810_s4 + $0x90] sm:$0xff] }
  0x56   :  { %397 = vmatmul.mubr.f32.gmra.mrb[8].mxu1 %v37_v6  ;;  %3681 = vmatpush1.bf16.msra.mxu0 %v6188_v7  ;;  %v6323_v6 = vpack.c.bf16 %v483_v58, %v479_v57  ;;  %v501_v58 = vld [vmem:[%s7810_s4 + $0x80] sm:$0xff]  ;;  %v6438_v18 = vpack.c.bf16 %v507_v3, %v503_v62 }
  0x57   :  { %3713 = vmatpush1.bf16.msra.mxu1 %v6197_v11  ;;  %289 = vmatprep.mubr.f32.mxu0 %v40_v15  ;;  %v517_v62 = vld [vmem:[%s7810_s4 + $0x100] sm:$0xff] }
  0x58   :  { %402 = vmatprep.mubr.f32.mxu1 %v40_v15  ;;  %3683 = vmatprep.subr.bf16.mxu0 %v6209_v16  ;;  %v491_v15 = vld [vmem:[%s7810_s4 + $0x30] sm:$0xff]  ;;  %7953 = vst [vmem:[#allocation5_spill] sm:$0xff] %v6438_v18  ;;  %v521_v3 = vld [vmem:[%s7810_s4 + $0x120] sm:$0xff] }
  0x59   :  { %290 = vmatmul.mubr.f32.gmra.mrb[10].mxu0 %v39_v25  ;;  %3715 = vmatprep.subr.bf16.mxu1 %v6218_v20  ;;  %v6360_v32 = vpack.c.bf16 %v491_v15, %v487_v12  ;;  %v516_v12 = vld [vmem:[%s7810_s4 + $0xf8] sm:$0xff]  ;;  %v6434_v15 = vpack.c.bf16 %v505_v61, %v501_v58 }
  0x5a   :  { %403 = vmatmul.mubr.f32.gmra.mrb[10].mxu1 %v39_v25  ;;  %3685 = vmatpush1.bf16.msra.mxu0 %v6230_v26  ;;  %v500_v25 = vld [vmem:[%s7810_s4 + $0x78] sm:$0xff] }
  0x5b   :  { %3717 = vmatpush1.bf16.msra.mxu1 %v6239_v30  ;;  %295 = vmatprep.mubr.f32.mxu0 %v42_v34  ;;  %v6375_v41 = vpack.c.bf16 %v500_v25, %v496_v23  ;;  %7952 = vst [vmem:[#allocation4_spill] sm:$0xff] %v6434_v15  ;;  %v509_v23 = vld [vmem:[%s7810_s4 + $0xc0] sm:$0xff] }
  0x5c   :  { %408 = vmatprep.mubr.f32.mxu1 %v42_v34  ;;  %3687 = vmatprep.subr.bf16.mxu0 %v6251_v36  ;;  %v493_v34 = vld [vmem:[%s7810_s4 + $0x40] sm:$0xff] }
  0x5d   :  { %296 = vmatmul.mubr.f32.gmra.mrb[12].mxu0 %v41_v44  ;;  %3719 = vmatprep.subr.bf16.mxu1 %v6260_v40  ;;  %v6396_v53 = vpack.c.bf16 %v497_v37, %v493_v34  ;;  %v513_v25 = vld [vmem:[%s7810_s4 + $0xe0] sm:$0xff]  ;;  %v511_v34 = vld [vmem:[%s7810_s4 + $0xd0] sm:$0xff]  ;;  %v6452_v37 = vpack.c.bf16 %v516_v12, %v512_v10  ;;  %v6494_v12 = vpack.c.bf16 %v521_v3, %v517_v62 }
  0x5e   :  { %409 = vmatmul.mubr.f32.gmra.mrb[12].mxu1 %v41_v44  ;;  %3689 = vmatpush1.bf16.msra.mxu0 %v6272_v46  ;;  %v502_v44 = vld [vmem:[%s7810_s4 + $0x88] sm:$0xff]  ;;  %v523_v10 = vld [vmem:[%s7810_s4 + $0x130] sm:$0xff] }
  0x5f   :  { %3721 = vmatpush1.bf16.msra.mxu1 %v6281_v50  ;;  %301 = vmatprep.mubr.f32.mxu0 %v44_v54  ;;  %v6402_v57 = vpack.c.bf16 %v506_v47, %v502_v44  ;;  %7955 = vst [vmem:[#allocation7_spill] sm:$0xff] %v6452_v37  ;;  %v522_v44 = vld [vmem:[%s7810_s4 + $0x128] sm:$0xff]  ;;  %v520_v47 = vld [vmem:[%s7810_s4 + $0x118] sm:$0xff]  ;;  %7960 = vst [vmem:[#allocation12_spill] sm:$0xff] %v6494_v12 }
  0x60   :  { %414 = vmatprep.mubr.f32.mxu1 %v44_v54  ;;  %3691 = vmatprep.subr.bf16.mxu0 %v6293_v55  ;;  %v6400_v54 = vpack.c.bf16 %v499_v43, %v495_v39  ;;  %v515_v39 = vld [vmem:[%s7810_s4 + $0xf0] sm:$0xff]  ;;  %v518_v43 = vld [vmem:[%s7810_s4 + $0x108] sm:$0xff] }
  0x61   :  { %302 = vmatmul.mubr.f32.gmra.mrb[14].mxu0 %v43_v0  ;;  %3723 = vmatprep.subr.bf16.mxu1 %v6302_v60  ;;  %v6474_v58 = vpack.c.bf16 %v515_v39, %v511_v34  ;;  %v6476_v61 = vpack.c.bf16 %v522_v44, %v518_v43  ;;  %v530_v34 = vld [vmem:[%s7810_s4 + $0x168] sm:$0xff]  ;;  %v528_v39 = vld [vmem:[%s7810_s4 + $0x158] sm:$0xff] }
  0x62   :  { %415 = vmatmul.mubr.f32.gmra.mrb[14].mxu1 %v43_v0  ;;  %3693 = vmatpush1.bf16.msra.mxu0 %v6314_v1  ;;  %v6414_v0 = vpack.c.bf16 %v508_v51, %v504_v48  ;;  %v524_v48 = vld [vmem:[%s7810_s4 + $0x138] sm:$0xff]  ;;  %v6470_v51 = vpack.c.bf16 %v513_v25, %v509_v23  ;;  %v6498_v23 = vpack.c.bf16 %v523_v10, %v519_v9  ;;  %v526_v25 = vld [vmem:[%s7810_s4 + $0x148] sm:$0xff]  ;;  %v527_v9 = vld [vmem:[%s7810_s4 + $0x150] sm:$0xff] }
  0x63   :  { %3725 = vmatpush1.bf16.msra.mxu1 %v6323_v6  ;;  %678 = vmatprep.mubr.f32.mxu0 %v7816_v29  ;;  %7957 = vst [vmem:[#allocation9_spill] sm:$0xff] %v6474_v58  ;;  %7958 = vst [vmem:[#allocation10_spill] sm:$0xff] %v6476_v61  ;;  %v6485_v4 = vpack.c.bf16 %v524_v48, %v520_v47  ;;  %v6512_v43 = vpack.c.bf16 %v530_v34, %v526_v25  ;;  %v532_v44 = vld [vmem:[%s7810_s4 + $0x178] sm:$0xff]  ;;  %v525_v47 = vld [vmem:[%s7810_s4 + $0x140] sm:$0xff] }
  0x64   :  { %749 = vmatprep.mubr.f32.mxu1 %v7816_v29  ;;  %3727 = vmatprep.subr.bf16.mxu0 %v6335_v13  ;;  %7956 = vst [vmem:[#allocation8_spill] sm:$0xff] %v6470_v51  ;;  %7961 = vst [vmem:[#allocation13_spill] sm:$0xff] %v6498_v23  ;;  %v529_v48 = vld [vmem:[%s7810_s4 + $0x160] sm:$0xff]  ;;  %v6523_v62 = vpack.c.bf16 %v532_v44, %v528_v39  ;;  %v531_v10 = vld [vmem:[%s7810_s4 + $0x170] sm:$0xff] }
  0x65   :  { %679 = vmatmul.mubr.f32.vlgmr.msra.gmra.mrb[0].mxu0 %v7816_v29  ;;  %3791 = vmatprep.subr.bf16.mxu1 %v6347_v22  ;;  %7959 = vst [vmem:[#allocation11_spill] sm:$0xff] %v6485_v4  ;;  %7962 = vst [vmem:[#allocation14_spill] sm:$0xff] %v6512_v43  ;;  %v6525_v3 = vpack.c.bf16 %v529_v48, %v525_v47  ;;  %v6534_v25 = vpack.c.bf16 %v531_v10, %v527_v9  ;;  %v534_v34 = vld [vmem:[%s7810_s4 + $0x188] sm:$0xff]  ;;  %v536_v44 = vld [vmem:[%s7810_s4 + $0x198] sm:$0xff] }
  0x66   :  { %750 = vmatmul.mubr.f32.vlgmr.msra.gmra.mrb[0].mxu1 %v7816_v29  ;;  %3729 = vmatpush1.bf16.msra.mxu0 %v6356_v27  ;;  %7963 = vst [vmem:[#allocation15_spill] sm:$0xff] %v6523_v62  ;;  %v538_v39 = vld [vmem:[%s7810_s4 + $0x1a8] sm:$0xff]  ;;  %v540_v48 = vld [vmem:[%s7810_s4 + $0x1b8] sm:$0xff]  ;;  %v533_v9 = vld [vmem:[%s7810_s4 + $0x180] sm:$0xff] }
  0x67   :  { %3793 = vmatpush1.bf16.msra.mxu1 %v6360_v32  ;;  %3731 = vmatprep.subr.bf16.mxu0 %v6362_v33  ;;  %7964 = vst [vmem:[#allocation16_spill] sm:$0xff] %v6525_v3  ;;  %7965 = vst [vmem:[#allocation17_spill] sm:$0xff] %v6534_v25  ;;  %v6548_v47 = vpack.c.bf16 %v538_v39, %v534_v34  ;;  %v537_v10 = vld [vmem:[%s7810_s4 + $0x1a0] sm:$0xff]  ;;  %v535_v34 = vld [vmem:[%s7810_s4 + $0x190] sm:$0xff] }
  0x68   :  { %3795 = vmatprep.subr.bf16.mxu1 %v6375_v41  ;;  %869 = vmatprep.mubr.f32.mxu0 %v7816_v29  ;;  %v539_v39 = vld [vmem:[%s7810_s4 + $0x1b0] sm:$0xff] }
  0x69   :  { %940 = vmatprep.mubr.f32.mxu1 %v7816_v29  ;;  %7966 = vst [vmem:[#allocation18_spill] sm:$0xff] %v6548_v47  ;;  %v6559_v29 = vpack.c.bf16 %v540_v48, %v536_v44  ;;  %v542_v44 = vld [vmem:[%s7810_s4 + $0x1c8] sm:$0xff] }
  0x6a   :  { %3733 = vmatpush1.bf16.msra.mxu0 %v6396_v53  ;;  %v546_v48 = vld [vmem:[%s7810_s4 + $0x1e8] sm:$0xff] }
  0x6b   :  { %3797 = vmatpush1.bf16.msra.mxu1 %v6400_v54  ;;  %3735 = vmatprep.subr.bf16.mxu0 %v6402_v57  ;;  %7967 = vst [vmem:[#allocation19_spill] sm:$0xff] %v6559_v29 }
  0x6c   :  { %3799 = vmatprep.subr.bf16.mxu1 %v6414_v0 }
  0x6e   :  { %3737 = vmatpush1.bf16.msra.mxu0 %v6434_v15 }
  0x6f   :  { %3801 = vmatpush1.bf16.msra.mxu1 %v6438_v18  ;;  %3739 = vmatprep.subr.bf16.mxu0 %v6440_v19 }
  0x70   :  { %3803 = vmatprep.subr.bf16.mxu1 %v6452_v37 }
  0x72   :  { %3741 = vmatpush1.bf16.msra.mxu0 %v6470_v51 }
  0x73   :  { %3805 = vmatpush1.bf16.msra.mxu1 %v6474_v58  ;;  %3743 = vmatprep.subr.bf16.mxu0 %v6476_v61 }
  0x74   :  { %3807 = vmatprep.subr.bf16.mxu1 %v6485_v4 }
  0x76   :  { %3745 = vmatpush1.bf16.msra.mxu0 %v6494_v12 }
  0x77   :  { %3809 = vmatpush1.bf16.msra.mxu1 %v6498_v23  ;;  %3747 = vmatprep.subr.bf16.mxu0 %v6512_v43  ;;  %v599_v43 = vld [vmem:[%s7810_s4 + $0x390] sm:$0xff] }
  0x78   :  { %3811 = vmatprep.subr.bf16.mxu1 %v6523_v62 }
  0x7a   :  { %3749 = vmatpush1.bf16.msra.mxu0 %v6525_v3  ;;  %v6561_v3 = vpack.c.bf16 %v537_v10, %v533_v9  ;;  %v544_v9 = vld [vmem:[%s7810_s4 + $0x1d8] sm:$0xff]  ;;  %v6584_v10 = vpack.c.bf16 %v546_v48, %v542_v44  ;;  %v543_v44 = vld [vmem:[%s7810_s4 + $0x1d0] sm:$0xff] }
  0x7b   :  { %3813 = vmatpush1.bf16.msra.mxu1 %v6534_v25  ;;  %3751 = vmatprep.subr.bf16.mxu0 %v6548_v47  ;;  %v6570_v25 = vpack.c.bf16 %v539_v39, %v535_v34  ;;  %v548_v34 = vld [vmem:[%s7810_s4 + $0x1f8] sm:$0xff]  ;;  %v541_v39 = vld [vmem:[%s7810_s4 + $0x1c0] sm:$0xff]  ;;  %v547_v48 = vld [vmem:[%s7810_s4 + $0x1f0] sm:$0xff] }
  0x7c   :  { %7968 = vst [vmem:[#allocation20_spill] sm:$0xff] %v6561_v3  ;;  %3815 = vmatprep.subr.bf16.mxu1 %v6559_v29  ;;  %7970 = vst [vmem:[#allocation22_spill] sm:$0xff] %v6584_v10  ;;  %v6595_v29 = vpack.c.bf16 %v548_v34, %v544_v9  ;;  %v554_v9 = vld [vmem:[%s7810_s4 + $0x228] sm:$0xff]  ;;  %v552_v34 = vld [vmem:[%s7810_s4 + $0x218] sm:$0xff] }
  0x7d   :  { %7969 = vst [vmem:[#allocation21_spill] sm:$0xff] %v6570_v25 }
  0x7e   :  { %3753 = vmatpush1.bf16.msra.mxu0 %v6561_v3  ;;  %v545_v3 = vld [vmem:[%s7810_s4 + $0x1e0] sm:$0xff]  ;;  %7971 = vst [vmem:[#allocation23_spill] sm:$0xff] %v6595_v29 }
  0x7f   :  { %3817 = vmatpush1.bf16.msra.mxu1 %v6570_v25  ;;  %v6597_v47 = vpack.c.bf16 %v545_v3, %v541_v39  ;;  %3755 = vmatprep.subr.bf16.mxu0 %v6584_v10  ;;  %v6606_v25 = vpack.c.bf16 %v547_v48, %v543_v44  ;;  %v550_v3 = vld [vmem:[%s7810_s4 + $0x208] sm:$0xff]  ;;  %v556_v44 = vld [vmem:[%s7810_s4 + $0x238] sm:$0xff]  ;;  %v549_v48 = vld [vmem:[%s7810_s4 + $0x200] sm:$0xff] }
  0x80   :  { %3819 = vmatprep.subr.bf16.mxu1 %v6595_v29  ;;  %v6620_v39 = vpack.c.bf16 %v554_v9, %v550_v3  ;;  %v6631_v29 = vpack.c.bf16 %v556_v44, %v552_v34  ;;  %v551_v3 = vld [vmem:[%s7810_s4 + $0x210] sm:$0xff]  ;;  %v562_v34 = vld [vmem:[%s7810_s4 + $0x268] sm:$0xff]  ;;  %v560_v44 = vld [vmem:[%s7810_s4 + $0x258] sm:$0xff] }
  0x81   :  { %7972 = vst [vmem:[#allocation24_spill] sm:$0xff] %v6597_v47  ;;  %7973 = vst [vmem:[#allocation25_spill] sm:$0xff] %v6606_v25  ;;  %v555_v9 = vld [vmem:[%s7810_s4 + $0x230] sm:$0xff] }
  0x82   :  { %3757 = vmatpush1.bf16.msra.mxu0 %v6597_v47  ;;  %7974 = vst [vmem:[#allocation26_spill] sm:$0xff] %v6620_v39  ;;  %v553_v47 = vld [vmem:[%s7810_s4 + $0x220] sm:$0xff]  ;;  %7975 = vst [vmem:[#allocation27_spill] sm:$0xff] %v6631_v29 }
  0x83   :  { %3821 = vmatpush1.bf16.msra.mxu1 %v6606_v25  ;;  %v6633_v10 = vpack.c.bf16 %v553_v47, %v549_v48  ;;  %3759 = vmatprep.subr.bf16.mxu0 %v6620_v39  ;;  %v6642_v25 = vpack.c.bf16 %v555_v9, %v551_v3  ;;  %v558_v47 = vld [vmem:[%s7810_s4 + $0x248] sm:$0xff]  ;;  %v564_v3 = vld [vmem:[%s7810_s4 + $0x278] sm:$0xff]  ;;  %v557_v9 = vld [vmem:[%s7810_s4 + $0x240] sm:$0xff] }
  0x84   :  { %3823 = vmatprep.subr.bf16.mxu1 %v6631_v29  ;;  %v6656_v48 = vpack.c.bf16 %v562_v34, %v558_v47  ;;  %v6667_v29 = vpack.c.bf16 %v564_v3, %v560_v44  ;;  %v559_v47 = vld [vmem:[%s7810_s4 + $0x250] sm:$0xff]  ;;  %v570_v44 = vld [vmem:[%s7810_s4 + $0x2a8] sm:$0xff]  ;;  %v568_v3 = vld [vmem:[%s7810_s4 + $0x298] sm:$0xff] }
  0x85   :  { %7976 = vst [vmem:[#allocation28_spill] sm:$0xff] %v6633_v10  ;;  %7977 = vst [vmem:[#allocation29_spill] sm:$0xff] %v6642_v25  ;;  %v563_v34 = vld [vmem:[%s7810_s4 + $0x270] sm:$0xff] }
  0x86   :  { %3761 = vmatpush1.bf16.msra.mxu0 %v6633_v10  ;;  %7978 = vst [vmem:[#allocation30_spill] sm:$0xff] %v6656_v48  ;;  %v561_v10 = vld [vmem:[%s7810_s4 + $0x260] sm:$0xff]  ;;  %7979 = vst [vmem:[#allocation31_spill] sm:$0xff] %v6667_v29 }
  0x87   :  { %3825 = vmatpush1.bf16.msra.mxu1 %v6642_v25  ;;  %v6669_v39 = vpack.c.bf16 %v561_v10, %v557_v9  ;;  %3763 = vmatprep.subr.bf16.mxu0 %v6656_v48  ;;  %v6678_v25 = vpack.c.bf16 %v563_v34, %v559_v47  ;;  %v566_v10 = vld [vmem:[%s7810_s4 + $0x288] sm:$0xff]  ;;  %v572_v47 = vld [vmem:[%s7810_s4 + $0x2b8] sm:$0xff]  ;;  %v565_v34 = vld [vmem:[%s7810_s4 + $0x280] sm:$0xff] }
  0x88   :  { %3827 = vmatprep.subr.bf16.mxu1 %v6667_v29  ;;  %v6692_v9 = vpack.c.bf16 %v570_v44, %v566_v10  ;;  %v6703_v29 = vpack.c.bf16 %v572_v47, %v568_v3  ;;  %v567_v10 = vld [vmem:[%s7810_s4 + $0x290] sm:$0xff]  ;;  %v578_v3 = vld [vmem:[%s7810_s4 + $0x2e8] sm:$0xff]  ;;  %v576_v47 = vld [vmem:[%s7810_s4 + $0x2d8] sm:$0xff] }
  0x89   :  { %7980 = vst [vmem:[#allocation32_spill] sm:$0xff] %v6669_v39  ;;  %7981 = vst [vmem:[#allocation33_spill] sm:$0xff] %v6678_v25  ;;  %v571_v44 = vld [vmem:[%s7810_s4 + $0x2b0] sm:$0xff] }
  0x8a   :  { %3765 = vmatpush1.bf16.msra.mxu0 %v6669_v39  ;;  %7982 = vst [vmem:[#allocation34_spill] sm:$0xff] %v6692_v9  ;;  %v569_v39 = vld [vmem:[%s7810_s4 + $0x2a0] sm:$0xff]  ;;  %7983 = vst [vmem:[#allocation35_spill] sm:$0xff] %v6703_v29 }
  0x8b   :  { %3829 = vmatpush1.bf16.msra.mxu1 %v6678_v25  ;;  %v6705_v48 = vpack.c.bf16 %v569_v39, %v565_v34  ;;  %3767 = vmatprep.subr.bf16.mxu0 %v6692_v9  ;;  %v6714_v25 = vpack.c.bf16 %v571_v44, %v567_v10  ;;  %v574_v39 = vld [vmem:[%s7810_s4 + $0x2c8] sm:$0xff]  ;;  %v580_v10 = vld [vmem:[%s7810_s4 + $0x2f8] sm:$0xff]  ;;  %v573_v44 = vld [vmem:[%s7810_s4 + $0x2c0] sm:$0xff] }
  0x8c   :  { %3831 = vmatprep.subr.bf16.mxu1 %v6703_v29  ;;  %v6728_v34 = vpack.c.bf16 %v578_v3, %v574_v39  ;;  %v6739_v29 = vpack.c.bf16 %v580_v10, %v576_v47  ;;  %v575_v39 = vld [vmem:[%s7810_s4 + $0x2d0] sm:$0xff]  ;;  %v586_v47 = vld [vmem:[%s7810_s4 + $0x328] sm:$0xff]  ;;  %v584_v10 = vld [vmem:[%s7810_s4 + $0x318] sm:$0xff] }
  0x8d   :  { %7984 = vst [vmem:[#allocation36_spill] sm:$0xff] %v6705_v48  ;;  %7985 = vst [vmem:[#allocation37_spill] sm:$0xff] %v6714_v25  ;;  %v579_v3 = vld [vmem:[%s7810_s4 + $0x2f0] sm:$0xff] }
  0x8e   :  { %3769 = vmatpush1.bf16.msra.mxu0 %v6705_v48  ;;  %7986 = vst [vmem:[#allocation38_spill] sm:$0xff] %v6728_v34  ;;  %v577_v48 = vld [vmem:[%s7810_s4 + $0x2e0] sm:$0xff]  ;;  %7987 = vst [vmem:[#allocation39_spill] sm:$0xff] %v6739_v29 }
  0x8f   :  { %3833 = vmatpush1.bf16.msra.mxu1 %v6714_v25  ;;  %v6741_v9 = vpack.c.bf16 %v577_v48, %v573_v44  ;;  %3771 = vmatprep.subr.bf16.mxu0 %v6728_v34  ;;  %v6750_v25 = vpack.c.bf16 %v579_v3, %v575_v39  ;;  %v582_v48 = vld [vmem:[%s7810_s4 + $0x308] sm:$0xff]  ;;  %v588_v39 = vld [vmem:[%s7810_s4 + $0x338] sm:$0xff]  ;;  %v581_v3 = vld [vmem:[%s7810_s4 + $0x300] sm:$0xff] }
  0x90   :  { %3835 = vmatprep.subr.bf16.mxu1 %v6739_v29  ;;  %v6764_v44 = vpack.c.bf16 %v586_v47, %v582_v48  ;;  %v6775_v29 = vpack.c.bf16 %v588_v39, %v584_v10  ;;  %v583_v48 = vld [vmem:[%s7810_s4 + $0x310] sm:$0xff]  ;;  %v594_v10 = vld [vmem:[%s7810_s4 + $0x368] sm:$0xff]  ;;  %v592_v39 = vld [vmem:[%s7810_s4 + $0x358] sm:$0xff] }
  0x91   :  { %7988 = vst [vmem:[#allocation40_spill] sm:$0xff] %v6741_v9  ;;  %7989 = vst [vmem:[#allocation41_spill] sm:$0xff] %v6750_v25  ;;  %v587_v47 = vld [vmem:[%s7810_s4 + $0x330] sm:$0xff] }
  0x92   :  { %3773 = vmatpush1.bf16.msra.mxu0 %v6741_v9  ;;  %7990 = vst [vmem:[#allocation42_spill] sm:$0xff] %v6764_v44  ;;  %v585_v9 = vld [vmem:[%s7810_s4 + $0x320] sm:$0xff]  ;;  %7991 = vst [vmem:[#allocation43_spill] sm:$0xff] %v6775_v29 }
  0x93   :  { %3837 = vmatpush1.bf16.msra.mxu1 %v6750_v25  ;;  %v6777_v34 = vpack.c.bf16 %v585_v9, %v581_v3  ;;  %3775 = vmatprep.subr.bf16.mxu0 %v6764_v44  ;;  %v6786_v25 = vpack.c.bf16 %v587_v47, %v583_v48  ;;  %v590_v9 = vld [vmem:[%s7810_s4 + $0x348] sm:$0xff]  ;;  %v596_v48 = vld [vmem:[%s7810_s4 + $0x378] sm:$0xff]  ;;  %v589_v47 = vld [vmem:[%s7810_s4 + $0x340] sm:$0xff] }
  0x94   :  { %3839 = vmatprep.subr.bf16.mxu1 %v6775_v29  ;;  %v6800_v3 = vpack.c.bf16 %v594_v10, %v590_v9  ;;  %v6811_v29 = vpack.c.bf16 %v596_v48, %v592_v39  ;;  %v591_v9 = vld [vmem:[%s7810_s4 + $0x350] sm:$0xff]  ;;  %v600_v39 = vld [vmem:[%s7810_s4 + $0x398] sm:$0xff] }
  0x95   :  { %7992 = vst [vmem:[#allocation44_spill] sm:$0xff] %v6777_v34  ;;  %7993 = vst [vmem:[#allocation45_spill] sm:$0xff] %v6786_v25  ;;  %v595_v10 = vld [vmem:[%s7810_s4 + $0x370] sm:$0xff]  ;;  %v604_v48 = vld [vmem:[%s7810_s4 + $0x3b8] sm:$0xff] }
  0x96   :  { %3777 = vmatpush1.bf16.msra.mxu0 %v6777_v34  ;;  %7994 = vst [vmem:[#allocation46_spill] sm:$0xff] %v6800_v3  ;;  %v593_v34 = vld [vmem:[%s7810_s4 + $0x360] sm:$0xff]  ;;  %7995 = vst [vmem:[#allocation47_spill] sm:$0xff] %v6811_v29  ;;  %v6825_v62 = vpack.c.bf16 %v595_v10, %v591_v9  ;;  %v6840_v9 = vpack.c.bf16 %v604_v48, %v600_v39  ;;  %v610_v39 = vld [vmem:[%s7810_s4 + $0x3e8] sm:$0xff] }
  0x97   :  { %3841 = vmatpush1.bf16.msra.mxu1 %v6786_v25  ;;  %v6813_v44 = vpack.c.bf16 %v593_v34, %v589_v47  ;;  %v598_v25 = vld [vmem:[%s7810_s4 + $0x388] sm:$0xff]  ;;  %3779 = vmatprep.subr.bf16.mxu0 %v6800_v3  ;;  %v597_v10 = vld [vmem:[%s7810_s4 + $0x380] sm:$0xff] }
  0x98   :  { %7997 = vst [vmem:[#allocation49_spill] sm:$0xff] %v6825_v62  ;;  %v602_v34 = vld [vmem:[%s7810_s4 + $0x3a8] sm:$0xff]  ;;  %3843 = vmatprep.subr.bf16.mxu1 %v6811_v29  ;;  %7999 = vst [vmem:[#allocation51_spill] sm:$0xff] %v6840_v9  ;;  %v601_v3 = vld [vmem:[%s7810_s4 + $0x3a0] sm:$0xff] }
  0x99   :  { %7996 = vst [vmem:[#allocation48_spill] sm:$0xff] %v6813_v44  ;;  %v6838_v47 = vpack.c.bf16 %v602_v34, %v598_v25  ;;  %v6852_v29 = vpack.c.bf16 %v601_v3, %v597_v10  ;;  %v603_v25 = vld [vmem:[%s7810_s4 + $0x3b0] sm:$0xff]  ;;  %v606_v34 = vld [vmem:[%s7810_s4 + $0x3c8] sm:$0xff]  ;;  %v608_v10 = vld [vmem:[%s7810_s4 + $0x3d8] sm:$0xff] }
  0x9a   :  { %3781 = vmatpush1.bf16.msra.mxu0 %v6813_v44  ;;  %v6865_v48 = vpack.c.bf16 %v603_v25, %v599_v43  ;;  %v6867_v3 = vpack.c.bf16 %v610_v39, %v606_v34  ;;  %v605_v44 = vld [vmem:[%s7810_s4 + $0x3c0] sm:$0xff]  ;;  %v607_v25 = vld [vmem:[%s7810_s4 + $0x3d0] sm:$0xff] }
  0x9b   :  { %7998 = vst [vmem:[#allocation50_spill] sm:$0xff] %v6838_v47  ;;  %3845 = vmatpush1.bf16.msra.mxu1 %v6825_v62  ;;  %8000 = vst [vmem:[#allocation52_spill] sm:$0xff] %v6852_v29  ;;  %3783 = vmatprep.subr.bf16.mxu0 %v6838_v47  ;;  %v612_v62 = vld [vmem:[%s7810_s4 + $0x3f8] sm:$0xff]  ;;  %v609_v43 = vld [vmem:[%s7810_s4 + $0x3e0] sm:$0xff] }
  0x9c   :  { %3847 = vmatprep.subr.bf16.mxu1 %v6840_v9  ;;  %8001 = vst [vmem:[#allocation53_spill] sm:$0xff] %v6865_v48  ;;  %8002 = vst [vmem:[#allocation54_spill] sm:$0xff] %v6867_v3  ;;  %v6878_v23 = vpack.c.bf16 %v612_v62, %v608_v10  ;;  %v611_v34 = vld [vmem:[%s7810_s4 + $0x3f0] sm:$0xff]  ;;  %v6890_v39 = vpack.c.bf16 %v609_v43, %v605_v44  ;;  %v175_v10 = vlaneseq  ;;  %v173_v43 = vld [vmem:[%s7811_s3] sm:$0xf] }
  0x9d   :  { %v6894_v62 = vpack.c.bf16 %v611_v34, %v607_v25 }
  0x9e   :  { %8003 = vst [vmem:[#allocation55_spill] sm:$0xff] %v6878_v23  ;;  %3785 = vmatpush1.bf16.msra.mxu0 %v6852_v29  ;;  %8004 = vst [vmem:[#allocation56_spill] sm:$0xff] %v6890_v39  ;;  %v6901_v29 = vshrl.u32 %v175_v10, 7 }
  0x9f   :  { %3849 = vmatpush1.bf16.msra.mxu1 %v6865_v48  ;;  %3787 = vmatprep.subr.bf16.mxu0 %v6867_v3  ;;  %8005 = vst [vmem:[#allocation57_spill] sm:$0xff] %v6894_v62 }
  0xa0   :  { %3851 = vmatprep.subr.bf16.mxu1 %v6878_v23  ;;  %8006 = vst [vmem:[#allocation58_spill] sm:$0xff] %v6901_v29  ;;  %v7912_v44 = vsub.s32 0, %v6901_v29  ;;  %v7913_v25 = vsub.s32 1, %v6901_v29  ;;  %v7920_v10 = vsub.s32 3, %v6901_v29 }
  0xa2   :  { %3789 = vmatpush1.bf16.msra.mxu0 %v6890_v39  ;;  %v6910_v34 = vrot.slane %v173_v43, %v7912_v44  ;;  %v6921_v44 = vrot.slane %v173_v43, %v7920_v10 }
  0xa3   :  { %3853 = vmatpush1.bf16.msra.mxu1 %v6894_v62  ;;  %3855 = vmatprep.subr.bf16.mxu0 %v5996_v5  ;;  %v6914_v5 = vrot.slane %v173_v43, %v7913_v25  ;;  %v7929_v25 = vsub.s32 2, %v6901_v29 }
  0xa4   :  { %3887 = vmatprep.subr.bf16.mxu1 %v6004_v8  ;;  %8007 = vst [vmem:[#allocation59_spill] sm:$0xff] %v6910_v34  ;;  %8009 = vst [vmem:[#allocation61_spill] sm:$0xff] %v6921_v44 }
  0xa5   :  { %8008 = vst [vmem:[#allocation60_spill] sm:$0xff] %v6914_v5 }
 0x138   :  { %v680_v8 = vpop.f32.mrb[0].mxu0 }
 0x139   :  { %v5222_v62 = vadd.f32 %v680_v8, %v6910_v34  ;;  %v751_v39 = vpop.f32.mrb[0].mxu1  ;;  %v682_v23 = vpop.f32.mrb[1].mxu0  ;;  %v6927_v8 = vrot.slane %v173_v43, %v7929_v25  ;;  %v8025_v25 = vld [vmem:[#allocation24_spill] sm:$0xff] }
 0x13a   :  { %v5223_v3 = vadd.f32 %v682_v23, %v6914_v5  ;;  %v753_v48 = vpop.f32.mrb[1].mxu1 }
 0x13b   :  { %v3433_v9 = vmul.f32 -1.442695, %v5222_v62  ;;  %v5239_v12 = vadd.f32 %v753_v48, %v6921_v44  ;;  %v5238_v23 = vadd.f32 %v751_v39, %v6927_v8 }
 0x13c   :  { %v3434_v47 = vmul.f32 -1.442695, %v5223_v3 }
 0x13d   :  { %5289 = vpow2.f32 %v3433_v9  ;;  %v3435_v34 = vmul.f32 -1.442695, %v5239_v12 }
 0x13e   :  { %5291 = vpow2.f32 %v3434_v47 }
 0x13f   :  { %5293 = vpow2.f32 %v3435_v34  ;;  %v8014_v34 = vld [vmem:[#allocation13_spill] sm:$0xff] }
 0x140   :  { %5295 = vtanh.f32 %v5238_v23  ;;  %v8016_v23 = vld [vmem:[#allocation15_spill] sm:$0xff] }
 0x147   :  { %v5290_v5 = vpop.eup %5289 }
 0x148   :  { %v5292_v62 = vpop.eup %5291  ;;  %v763_v3 = vadd.f32 1.0, %v5290_v5 }
 0x149   :  { %v769_v10 = vadd.f32 1.0, %v5292_v62  ;;  %v5294_v9 = vpop.eup %5293  ;;  %v8017_v62 = vld [vmem:[#allocation16_spill] sm:$0xff] }
 0x14a   :  { %5297 = vrcp.f32 %v763_v3  ;;  %v5296_v4 = vpop.eup %5295  ;;  %v776_v44 = vadd.f32 1.0, %v5294_v9  ;;  %v8018_v3 = vld [vmem:[#allocation17_spill] sm:$0xff]  ;;  %v8019_v9 = vld [vmem:[#allocation18_spill] sm:$0xff] }
 0x14b   :  { %5299 = vrcp.f32 %v769_v10  ;;  %v8015_v10 = vld [vmem:[#allocation14_spill] sm:$0xff] }
 0x14c   :  { %5301 = vrcp.f32 %v776_v44  ;;  %v8013_v44 = vld [vmem:[#allocation12_spill] sm:$0xff] }
 0x154   :  { %v5298_v47 = vpop.eup %5297 }
 0x155   :  { %v5300_v61 = vpop.eup %5299  ;;  %v780_v48 = vmul.f32 %v5298_v47, %v5296_v4  ;;  %v8010_v4 = vmov 0.0   ;;  %v8020_v47 = vld [vmem:[#allocation19_spill] sm:$0xff] }
 0x156   :  { %v779_v29 = vmul.f32 0.0, %v5300_v61  ;;  %v5302_v12 = vpop.eup %5301  ;;  %v8012_v61 = vld [vmem:[#allocation11_spill] sm:$0xff] }
 0x158   :  { %v6930_v43 = vadd.f32 %v780_v48, %v779_v29  ;;  %v8011_v29 = vld [vmem:[#allocation10_spill] sm:$0xff]  ;;  %v8021_v48 = vld [vmem:[#allocation20_spill] sm:$0xff] }
 0x15a   :  { %5303 = vtanh.f32 %v6930_v43 }
 0x164   :  { %v5304_v39 = vpop.eup %5303 }
 0x165   :  { %v783_v5 = vmul.f32 %v5304_v39, %v5302_v12  ;;  %v8022_v12 = vld [vmem:[#allocation21_spill] sm:$0xff]  ;;  %v8023_v39 = vld [vmem:[#allocation22_spill] sm:$0xff] }
 0x167   :  { %870 = vmatmul.mubr.f32.vlgmr.msra.gmra.mrb[16].mxu0 %v783_v5  ;;  %941 = vmatmul.mubr.f32.vlgmr.msra.gmra.mrb[16].mxu1 %v783_v5 }
 0x168   :  { %3857 = vmatpush1.bf16.msra.mxu0 %v6021_v14  ;;  %3889 = vmatpush1.bf16.msra.mxu1 %v6030_v17 }
 0x169   :  { %3859 = vmatprep.subr.bf16.mxu0 %v6042_v21  ;;  %3891 = vmatprep.subr.bf16.mxu1 %v6050_v24 }
 0x16a   :  { %1035 = vmatprep.mubr.f32.mxu0 %v8010_v4  ;;  %1106 = vmatprep.mubr.f32.mxu1 %v8010_v4 }
 0x16c   :  { %3861 = vmatpush1.bf16.msra.mxu0 %v6062_v28  ;;  %3893 = vmatpush1.bf16.msra.mxu1 %v6071_v31 }
 0x16d   :  { %3863 = vmatprep.subr.bf16.mxu0 %v6083_v35  ;;  %3895 = vmatprep.subr.bf16.mxu1 %v6092_v38 }
 0x170   :  { %3865 = vmatpush1.bf16.msra.mxu0 %v6104_v42  ;;  %3897 = vmatpush1.bf16.msra.mxu1 %v6113_v45 }
 0x171   :  { %3867 = vmatprep.subr.bf16.mxu0 %v6125_v49  ;;  %3899 = vmatprep.subr.bf16.mxu1 %v6134_v52 }
 0x174   :  { %3869 = vmatpush1.bf16.msra.mxu0 %v6146_v56  ;;  %3901 = vmatpush1.bf16.msra.mxu1 %v6155_v59 }
 0x175   :  { %3871 = vmatprep.subr.bf16.mxu0 %v6167_v63  ;;  %3903 = vmatprep.subr.bf16.mxu1 %v6176_v2 }
 0x178   :  { %3873 = vmatpush1.bf16.msra.mxu0 %v6188_v7  ;;  %3905 = vmatpush1.bf16.msra.mxu1 %v6197_v11 }
 0x179   :  { %3875 = vmatprep.subr.bf16.mxu0 %v6209_v16  ;;  %3907 = vmatprep.subr.bf16.mxu1 %v6218_v20 }
 0x17c   :  { %3877 = vmatpush1.bf16.msra.mxu0 %v6230_v26  ;;  %3909 = vmatpush1.bf16.msra.mxu1 %v6239_v30 }
 0x17d   :  { %3879 = vmatprep.subr.bf16.mxu0 %v6251_v36  ;;  %3911 = vmatprep.subr.bf16.mxu1 %v6260_v40 }
 0x180   :  { %3881 = vmatpush1.bf16.msra.mxu0 %v6272_v46  ;;  %3913 = vmatpush1.bf16.msra.mxu1 %v6281_v50 }
 0x181   :  { %3883 = vmatprep.subr.bf16.mxu0 %v6293_v55  ;;  %3915 = vmatprep.subr.bf16.mxu1 %v6302_v60 }
 0x184   :  { %3885 = vmatpush1.bf16.msra.mxu0 %v6314_v1  ;;  %3917 = vmatpush1.bf16.msra.mxu1 %v6323_v6 }
 0x185   :  { %3919 = vmatprep.subr.bf16.mxu0 %v6335_v13  ;;  %3983 = vmatprep.subr.bf16.mxu1 %v6347_v22 }
 0x187   :  { %1036 = vmatmul.mubr.f32.vlgmr.msra.gmra.mrb[2].mxu0 %v783_v5  ;;  %1107 = vmatmul.mubr.f32.vlgmr.msra.gmra.mrb[2].mxu1 %v783_v5  ;;  %v8024_v5 = vld [vmem:[#allocation23_spill] sm:$0xff] }
 0x188   :  { %3921 = vmatpush1.bf16.msra.mxu0 %v6356_v27  ;;  %3985 = vmatpush1.bf16.msra.mxu1 %v6360_v32 }
 0x189   :  { %3923 = vmatprep.subr.bf16.mxu0 %v6362_v33  ;;  %3987 = vmatprep.subr.bf16.mxu1 %v6375_v41 }
 0x18c   :  { %3925 = vmatpush1.bf16.msra.mxu0 %v6396_v53  ;;  %3989 = vmatpush1.bf16.msra.mxu1 %v6400_v54 }
 0x18d   :  { %3927 = vmatprep.subr.bf16.mxu0 %v6402_v57  ;;  %3991 = vmatprep.subr.bf16.mxu1 %v6414_v0 }
 0x190   :  { %3929 = vmatpush1.bf16.msra.mxu0 %v6434_v15  ;;  %3993 = vmatpush1.bf16.msra.mxu1 %v6438_v18 }
 0x191   :  { %3931 = vmatprep.subr.bf16.mxu0 %v6440_v19  ;;  %3995 = vmatprep.subr.bf16.mxu1 %v6452_v37 }
 0x194   :  { %3933 = vmatpush1.bf16.msra.mxu0 %v6470_v51  ;;  %3997 = vmatpush1.bf16.msra.mxu1 %v6474_v58 }
 0x195   :  { %3935 = vmatprep.subr.bf16.mxu0 %v8011_v29  ;;  %3999 = vmatprep.subr.bf16.mxu1 %v8012_v61 }
 0x198   :  { %3937 = vmatpush1.bf16.msra.mxu0 %v8013_v44  ;;  %4001 = vmatpush1.bf16.msra.mxu1 %v8014_v34 }
 0x199   :  { %3939 = vmatprep.subr.bf16.mxu0 %v8015_v10  ;;  %4003 = vmatprep.subr.bf16.mxu1 %v8016_v23  ;;  %v8026_v10 = vld [vmem:[#allocation25_spill] sm:$0xff]  ;;  %v8027_v23 = vld [vmem:[#allocation26_spill] sm:$0xff] }
 0x19c   :  { %3941 = vmatpush1.bf16.msra.mxu0 %v8017_v62  ;;  %4005 = vmatpush1.bf16.msra.mxu1 %v8018_v3  ;;  %v8028_v62 = vld [vmem:[#allocation27_spill] sm:$0xff]  ;;  %v8029_v3 = vld [vmem:[#allocation28_spill] sm:$0xff] }
 0x19d   :  { %3943 = vmatprep.subr.bf16.mxu0 %v8019_v9  ;;  %4007 = vmatprep.subr.bf16.mxu1 %v8020_v47  ;;  %v8030_v9 = vld [vmem:[#allocation29_spill] sm:$0xff]  ;;  %v8031_v47 = vld [vmem:[#allocation30_spill] sm:$0xff] }
 0x1a0   :  { %3945 = vmatpush1.bf16.msra.mxu0 %v8021_v48  ;;  %4009 = vmatpush1.bf16.msra.mxu1 %v8022_v12  ;;  %v8032_v48 = vld [vmem:[#allocation31_spill] sm:$0xff]  ;;  %v8033_v12 = vld [vmem:[#allocation32_spill] sm:$0xff] }
 0x1a1   :  { %3947 = vmatprep.subr.bf16.mxu0 %v8023_v39  ;;  %4011 = vmatprep.subr.bf16.mxu1 %v8024_v5  ;;  %v8034_v39 = vld [vmem:[#allocation33_spill] sm:$0xff]  ;;  %v8035_v5 = vld [vmem:[#allocation34_spill] sm:$0xff] }
 0x1a4   :  { %3949 = vmatpush1.bf16.msra.mxu0 %v8025_v25  ;;  %4013 = vmatpush1.bf16.msra.mxu1 %v8026_v10  ;;  %v8036_v25 = vld [vmem:[#allocation35_spill] sm:$0xff]  ;;  %v8037_v10 = vld [vmem:[#allocation36_spill] sm:$0xff] }
 0x1a5   :  { %3951 = vmatprep.subr.bf16.mxu0 %v8027_v23  ;;  %4015 = vmatprep.subr.bf16.mxu1 %v8028_v62  ;;  %v8038_v23 = vld [vmem:[#allocation37_spill] sm:$0xff]  ;;  %v8039_v62 = vld [vmem:[#allocation38_spill] sm:$0xff] }
 0x1a8   :  { %3953 = vmatpush1.bf16.msra.mxu0 %v8029_v3  ;;  %4017 = vmatpush1.bf16.msra.mxu1 %v8030_v9  ;;  %v8040_v3 = vld [vmem:[#allocation39_spill] sm:$0xff]  ;;  %v8041_v9 = vld [vmem:[#allocation40_spill] sm:$0xff] }
 0x1a9   :  { %3955 = vmatprep.subr.bf16.mxu0 %v8031_v47  ;;  %4019 = vmatprep.subr.bf16.mxu1 %v8032_v48  ;;  %v8042_v47 = vld [vmem:[#allocation41_spill] sm:$0xff]  ;;  %v8043_v48 = vld [vmem:[#allocation42_spill] sm:$0xff] }
 0x1ac   :  { %3957 = vmatpush1.bf16.msra.mxu0 %v8033_v12  ;;  %4021 = vmatpush1.bf16.msra.mxu1 %v8034_v39  ;;  %v8044_v12 = vld [vmem:[#allocation43_spill] sm:$0xff]  ;;  %v8045_v39 = vld [vmem:[#allocation44_spill] sm:$0xff] }
 0x1ad   :  { %3959 = vmatprep.subr.bf16.mxu0 %v8035_v5  ;;  %4023 = vmatprep.subr.bf16.mxu1 %v8036_v25  ;;  %v8046_v5 = vld [vmem:[#allocation45_spill] sm:$0xff]  ;;  %v8047_v25 = vld [vmem:[#allocation46_spill] sm:$0xff] }
 0x1b0   :  { %3961 = vmatpush1.bf16.msra.mxu0 %v8037_v10  ;;  %4025 = vmatpush1.bf16.msra.mxu1 %v8038_v23  ;;  %v8048_v10 = vld [vmem:[#allocation47_spill] sm:$0xff]  ;;  %v8049_v23 = vld [vmem:[#allocation48_spill] sm:$0xff] }
 0x1b1   :  { %3963 = vmatprep.subr.bf16.mxu0 %v8039_v62  ;;  %4027 = vmatprep.subr.bf16.mxu1 %v8040_v3  ;;  %v8050_v62 = vld [vmem:[#allocation49_spill] sm:$0xff]  ;;  %v8051_v3 = vld [vmem:[#allocation50_spill] sm:$0xff] }
 0x1b4   :  { %3965 = vmatpush1.bf16.msra.mxu0 %v8041_v9  ;;  %4029 = vmatpush1.bf16.msra.mxu1 %v8042_v47  ;;  %v8052_v9 = vld [vmem:[#allocation51_spill] sm:$0xff]  ;;  %v8053_v47 = vld [vmem:[#allocation52_spill] sm:$0xff] }
 0x1b5   :  { %3967 = vmatprep.subr.bf16.mxu0 %v8043_v48  ;;  %4031 = vmatprep.subr.bf16.mxu1 %v8044_v12  ;;  %v8054_v48 = vld [vmem:[#allocation53_spill] sm:$0xff]  ;;  %v8055_v12 = vld [vmem:[#allocation54_spill] sm:$0xff] }
 0x1b8   :  { %3969 = vmatpush1.bf16.msra.mxu0 %v8045_v39  ;;  %4033 = vmatpush1.bf16.msra.mxu1 %v8046_v5  ;;  %v8056_v39 = vld [vmem:[#allocation55_spill] sm:$0xff]  ;;  %v8057_v5 = vld [vmem:[#allocation56_spill] sm:$0xff] }
 0x1b9   :  { %3971 = vmatprep.subr.bf16.mxu0 %v8047_v25  ;;  %4035 = vmatprep.subr.bf16.mxu1 %v8048_v10  ;;  %v8058_v25 = vld [vmem:[#allocation57_spill] sm:$0xff]  ;;  %v8059_v10 = vld [vmem:[#allocation2_spill] sm:$0xff] }
 0x1bc   :  { %3973 = vmatpush1.bf16.msra.mxu0 %v8049_v23  ;;  %4037 = vmatpush1.bf16.msra.mxu1 %v8050_v62  ;;  %v8060_v23 = vld [vmem:[#allocation3_spill] sm:$0xff] }
 0x1bd   :  { %3975 = vmatprep.subr.bf16.mxu0 %v8051_v3  ;;  %4039 = vmatprep.subr.bf16.mxu1 %v8052_v9  ;;  %v613_v9 = vld [vmem:[%s7812_s5] sm:$0xf] }
 0x1be   :  { %v8061_v3 = vld [vmem:[#allocation58_spill] sm:$0xff] }
 0x1bf   :  { %v8066_v29 = vsub.s32 3, %v8061_v3 }
 0x1c0   :  { %3977 = vmatpush1.bf16.msra.mxu0 %v8053_v47  ;;  %4041 = vmatpush1.bf16.msra.mxu1 %v8054_v48  ;;  %v8062_v47 = vsub.s32 0, %v8061_v3 }
 0x1c1   :  { %3979 = vmatprep.subr.bf16.mxu0 %v8055_v12  ;;  %4043 = vmatprep.subr.bf16.mxu1 %v8056_v39  ;;  %v8064_v12 = vsub.s32 1, %v8061_v3  ;;  %v7046_v58 = vrot.slane %v613_v9, %v8066_v29 }
 0x1c2   :  { %v7036_v62 = vrot.slane %v613_v9, %v8062_v47 }
 0x1c3   :  { %v7040_v48 = vrot.slane %v613_v9, %v8064_v12  ;;  %8067 = vst [vmem:[#allocation63_spill] sm:$0xff] %v7046_v58  ;;  %v8068_v12 = vsub.s32 2, %v8061_v3 }
 0x1c4   :  { %3981 = vmatpush1.bf16.msra.mxu0 %v8057_v5  ;;  %4045 = vmatpush1.bf16.msra.mxu1 %v8058_v25  ;;  %8063 = vst [vmem:[#allocation58_spill] sm:$0xff] %v7036_v62 }
 0x1c5   :  { %4047 = vmatprep.subr.bf16.mxu0 %v8059_v10  ;;  %4079 = vmatprep.subr.bf16.mxu1 %v8060_v23  ;;  %8065 = vst [vmem:[#allocation62_spill] sm:$0xff] %v7040_v48  ;;  %v7051_v51 = vrot.slane %v613_v9, %v8068_v12 }
 0x1c7   :  { %8069 = vst [vmem:[#allocation64_spill] sm:$0xff] %v7051_v51 }
 0x23a   :  { %v871_v39 = vpop.f32.mrb[16].mxu0  ;;  %v942_v5 = vpop.f32.mrb[16].mxu1 }
 0x23b   :  { %v872_v25 = vadd.f32 %v871_v39, %v7036_v62  ;;  %v873_v34 = vpop.f32.mrb[17].mxu0  ;;  %v944_v10 = vpop.f32.mrb[17].mxu1  ;;  %v943_v39 = vadd.f32 %v942_v5, %v7051_v51  ;;  %v8070_v5 = vld [vmem:[#allocation59_spill] sm:$0xff] }
 0x23c   :  { %v874_v23 = vadd.f32 %v873_v34, %v7040_v48  ;;  %v945_v47 = vadd.f32 %v944_v10, %v7046_v58 }
 0x23d   :  { %v3436_v44 = vmul.f32 -1.442695, %v872_v25 }
 0x23e   :  { %v3437_v61 = vmul.f32 -1.442695, %v874_v23  ;;  %v3438_v37 = vmul.f32 -1.442695, %v945_v47 }
 0x23f   :  { %5305 = vpow2.f32 %v3436_v44 }
 0x240   :  { %5307 = vpow2.f32 %v3437_v61 }
 0x241   :  { %5309 = vpow2.f32 %v3438_v37 }
 0x242   :  { %5311 = vtanh.f32 %v943_v39 }
 0x249   :  { %v5306_v62 = vpop.eup %5305 }
 0x24a   :  { %v5308_v19 = vpop.eup %5307  ;;  %v950_v34 = vadd.f32 1.0, %v5306_v62 }
 0x24b   :  { %v956_v25 = vadd.f32 1.0, %v5308_v19  ;;  %v5310_v29 = vpop.eup %5309  ;;  %v8071_v19 = vld [vmem:[#allocation60_spill] sm:$0xff] }
 0x24c   :  { %5313 = vrcp.f32 %v950_v34  ;;  %v5312_v44 = vpop.eup %5311  ;;  %v963_v58 = vadd.f32 1.0, %v5310_v29 }
 0x24d   :  { %5315 = vrcp.f32 %v956_v25 }
 0x24e   :  { %5317 = vrcp.f32 %v963_v58 }
 0x256   :  { %v5314_v61 = vpop.eup %5313 }
 0x257   :  { %v5316_v23 = vpop.eup %5315  ;;  %v967_v10 = vmul.f32 %v5314_v61, %v5312_v44  ;;  %v8072_v44 = vld [vmem:[#allocation61_spill] sm:$0xff] }
 0x258   :  { %v966_v3 = vmul.f32 0.0, %v5316_v23  ;;  %v5318_v61 = vpop.eup %5317 }
 0x25a   :  { %v7054_v9 = vadd.f32 %v967_v10, %v966_v3  ;;  %v1037_v47 = vpop.f32.mrb[2].mxu0  ;;  %v1108_v12 = vpop.f32.mrb[2].mxu1 }
 0x25b   :  { %v5224_v51 = vadd.f32 %v1037_v47, %v8070_v5  ;;  %v1039_v62 = vpop.f32.mrb[3].mxu0  ;;  %v1110_v37 = vpop.f32.mrb[3].mxu1  ;;  %v5240_v3 = vadd.f32 %v1108_v12, %v6927_v8 }
 0x25c   :  { %5319 = vtanh.f32 %v7054_v9  ;;  %v5225_v39 = vadd.f32 %v1039_v62, %v8071_v19  ;;  %v5241_v29 = vadd.f32 %v1110_v37, %v8072_v44 }
 0x25d   :  { %v3439_v34 = vmul.f32 -1.442695, %v5224_v51 }
 0x25e   :  { %v3440_v25 = vmul.f32 -1.442695, %v5225_v39  ;;  %v3441_v10 = vmul.f32 -1.442695, %v5241_v29 }
 0x25f   :  { %5321 = vpow2.f32 %v3439_v34 }
 0x260   :  { %5323 = vpow2.f32 %v3440_v25 }
 0x261   :  { %5325 = vpow2.f32 %v3441_v10  ;;  %v8076_v10 = vld [vmem:[#allocation9_spill] sm:$0xff] }
 0x262   :  { %5327 = vtanh.f32 %v5240_v3  ;;  %v8077_v3 = vld [vmem:[#allocation10_spill] sm:$0xff] }
 0x266   :  { %v5320_v23 = vpop.eup %5319 }
 0x267   :  { %v970_v58 = vmul.f32 %v5320_v23, %v5318_v61 }
 0x269   :  { %v5322_v48 = vpop.eup %5321  ;;  %1205 = vmatprep.mubr.f32.mxu0 %v970_v58  ;;  %1276 = vmatprep.mubr.f32.mxu1 %v970_v58  ;;  %v8078_v58 = vld [vmem:[#allocation11_spill] sm:$0xff] }
 0x26a   :  { %v5324_v47 = vpop.eup %5323  ;;  %v1120_v5 = vadd.f32 1.0, %v5322_v48 }
 0x26b   :  { %v1126_v62 = vadd.f32 1.0, %v5324_v47  ;;  %v5326_v51 = vpop.eup %5325  ;;  %v8079_v47 = vld [vmem:[#allocation12_spill] sm:$0xff] }
 0x26c   :  { %5329 = vrcp.f32 %v1120_v5  ;;  %v5328_v39 = vpop.eup %5327  ;;  %v1133_v44 = vadd.f32 1.0, %v5326_v51  ;;  %v8074_v5 = vld [vmem:[#allocation7_spill] sm:$0xff]  ;;  %v8081_v51 = vld [vmem:[#allocation14_spill] sm:$0xff] }
 0x26d   :  { %5331 = vrcp.f32 %v1126_v62  ;;  %v8080_v62 = vld [vmem:[#allocation13_spill] sm:$0xff] }
 0x26e   :  { %5333 = vrcp.f32 %v1133_v44  ;;  %v8075_v44 = vld [vmem:[#allocation8_spill] sm:$0xff] }
 0x276   :  { %v5330_v34 = vpop.eup %5329 }
 0x277   :  { %v5332_v37 = vpop.eup %5331  ;;  %v1137_v25 = vmul.f32 %v5330_v34, %v5328_v39  ;;  %v8082_v39 = vld [vmem:[#allocation15_spill] sm:$0xff]  ;;  %v8083_v34 = vld [vmem:[#allocation16_spill] sm:$0xff] }
 0x278   :  { %v1136_v29 = vmul.f32 %v5332_v37, %v6930_v43  ;;  %v5334_v61 = vpop.eup %5333  ;;  %v8073_v43 = vld [vmem:[#allocation6_spill] sm:$0xff]  ;;  %v8084_v37 = vld [vmem:[#allocation17_spill] sm:$0xff] }
 0x27a   :  { %v7062_v12 = vadd.f32 %v1137_v25, %v1136_v29  ;;  %v8085_v25 = vld [vmem:[#allocation18_spill] sm:$0xff]  ;;  %v8086_v29 = vld [vmem:[#allocation19_spill] sm:$0xff] }
 0x27c   :  { %5335 = vtanh.f32 %v7062_v12 }
 0x286   :  { %v5336_v48 = vpop.eup %5335 }
 0x287   :  { %v1140_v23 = vmul.f32 %v5336_v48, %v5334_v61  ;;  %v8087_v61 = vld [vmem:[#allocation20_spill] sm:$0xff]  ;;  %v8088_v48 = vld [vmem:[#allocation21_spill] sm:$0xff] }
 0x289   :  { %1206 = vmatmul.mubr.f32.vlgmr.msra.gmra.mrb[18].mxu0 %v1140_v23  ;;  %1277 = vmatmul.mubr.f32.vlgmr.msra.gmra.mrb[18].mxu1 %v1140_v23 }
 0x28a   :  { %4049 = vmatpush1.bf16.msra.mxu0 %v6021_v14  ;;  %4081 = vmatpush1.bf16.msra.mxu1 %v6030_v17 }
 0x28b   :  { %4051 = vmatprep.subr.bf16.mxu0 %v6042_v21  ;;  %4083 = vmatprep.subr.bf16.mxu1 %v6050_v24 }
 0x28c   :  { %1371 = vmatprep.mubr.f32.mxu0 %v8010_v4  ;;  %1442 = vmatprep.mubr.f32.mxu1 %v8010_v4 }
 0x28e   :  { %4053 = vmatpush1.bf16.msra.mxu0 %v6062_v28  ;;  %4085 = vmatpush1.bf16.msra.mxu1 %v6071_v31 }
 0x28f   :  { %4055 = vmatprep.subr.bf16.mxu0 %v6083_v35  ;;  %4087 = vmatprep.subr.bf16.mxu1 %v6092_v38 }
 0x292   :  { %4057 = vmatpush1.bf16.msra.mxu0 %v6104_v42  ;;  %4089 = vmatpush1.bf16.msra.mxu1 %v6113_v45 }
 0x293   :  { %4059 = vmatprep.subr.bf16.mxu0 %v6125_v49  ;;  %4091 = vmatprep.subr.bf16.mxu1 %v6134_v52 }
 0x296   :  { %4061 = vmatpush1.bf16.msra.mxu0 %v6146_v56  ;;  %4093 = vmatpush1.bf16.msra.mxu1 %v6155_v59 }
 0x297   :  { %4063 = vmatprep.subr.bf16.mxu0 %v6167_v63  ;;  %4095 = vmatprep.subr.bf16.mxu1 %v6176_v2 }
 0x29a   :  { %4065 = vmatpush1.bf16.msra.mxu0 %v6188_v7  ;;  %4097 = vmatpush1.bf16.msra.mxu1 %v6197_v11 }
 0x29b   :  { %4067 = vmatprep.subr.bf16.mxu0 %v6209_v16  ;;  %4099 = vmatprep.subr.bf16.mxu1 %v6218_v20 }
 0x29e   :  { %4069 = vmatpush1.bf16.msra.mxu0 %v6230_v26  ;;  %4101 = vmatpush1.bf16.msra.mxu1 %v6239_v30 }
 0x29f   :  { %4071 = vmatprep.subr.bf16.mxu0 %v6251_v36  ;;  %4103 = vmatprep.subr.bf16.mxu1 %v6260_v40 }
 0x2a2   :  { %4073 = vmatpush1.bf16.msra.mxu0 %v6272_v46  ;;  %4105 = vmatpush1.bf16.msra.mxu1 %v6281_v50 }
 0x2a3   :  { %4075 = vmatprep.subr.bf16.mxu0 %v6293_v55  ;;  %4107 = vmatprep.subr.bf16.mxu1 %v6302_v60 }
 0x2a6   :  { %4077 = vmatpush1.bf16.msra.mxu0 %v6314_v1  ;;  %4109 = vmatpush1.bf16.msra.mxu1 %v6323_v6 }
 0x2a7   :  { %4111 = vmatprep.subr.bf16.mxu0 %v6335_v13  ;;  %4175 = vmatprep.subr.bf16.mxu1 %v6347_v22 }
 0x2a9   :  { %1372 = vmatmul.mubr.f32.vlgmr.msra.gmra.mrb[4].mxu0 %v1140_v23  ;;  %1443 = vmatmul.mubr.f32.vlgmr.msra.gmra.mrb[4].mxu1 %v1140_v23  ;;  %v8089_v23 = vld [vmem:[#allocation22_spill] sm:$0xff] }
 0x2aa   :  { %4113 = vmatpush1.bf16.msra.mxu0 %v6356_v27  ;;  %4177 = vmatpush1.bf16.msra.mxu1 %v6360_v32 }
 0x2ab   :  { %4115 = vmatprep.subr.bf16.mxu0 %v6362_v33  ;;  %4179 = vmatprep.subr.bf16.mxu1 %v6375_v41 }
 0x2ae   :  { %4117 = vmatpush1.bf16.msra.mxu0 %v6396_v53  ;;  %4181 = vmatpush1.bf16.msra.mxu1 %v6400_v54 }
 0x2af   :  { %4119 = vmatprep.subr.bf16.mxu0 %v6402_v57  ;;  %4183 = vmatprep.subr.bf16.mxu1 %v6414_v0 }
 0x2b2   :  { %4121 = vmatpush1.bf16.msra.mxu0 %v6434_v15  ;;  %4185 = vmatpush1.bf16.msra.mxu1 %v6438_v18 }
 0x2b3   :  { %4123 = vmatprep.subr.bf16.mxu0 %v8073_v43  ;;  %4187 = vmatprep.subr.bf16.mxu1 %v8074_v5 }
 0x2b6   :  { %4125 = vmatpush1.bf16.msra.mxu0 %v8075_v44  ;;  %4189 = vmatpush1.bf16.msra.mxu1 %v8076_v10  ;;  %v8128_v10 = vld [vmem:[#allocation62_spill] sm:$0xff] }
 0x2b7   :  { %4127 = vmatprep.subr.bf16.mxu0 %v8077_v3  ;;  %4191 = vmatprep.subr.bf16.mxu1 %v8078_v58  ;;  %v8127_v58 = vld [vmem:[#allocation58_spill] sm:$0xff] }
 0x2ba   :  { %4129 = vmatpush1.bf16.msra.mxu0 %v8079_v47  ;;  %4193 = vmatpush1.bf16.msra.mxu1 %v8080_v62  ;;  %v8090_v47 = vld [vmem:[#allocation23_spill] sm:$0xff]  ;;  %v8091_v62 = vld [vmem:[#allocation24_spill] sm:$0xff] }
 0x2bb   :  { %4131 = vmatprep.subr.bf16.mxu0 %v8081_v51  ;;  %4195 = vmatprep.subr.bf16.mxu1 %v8082_v39  ;;  %v8092_v51 = vld [vmem:[#allocation25_spill] sm:$0xff]  ;;  %v8093_v39 = vld [vmem:[#allocation26_spill] sm:$0xff] }
 0x2be   :  { %4133 = vmatpush1.bf16.msra.mxu0 %v8083_v34  ;;  %4197 = vmatpush1.bf16.msra.mxu1 %v8084_v37  ;;  %v8094_v34 = vld [vmem:[#allocation27_spill] sm:$0xff]  ;;  %v8095_v37 = vld [vmem:[#allocation28_spill] sm:$0xff] }
 0x2bf   :  { %4135 = vmatprep.subr.bf16.mxu0 %v8085_v25  ;;  %4199 = vmatprep.subr.bf16.mxu1 %v8086_v29  ;;  %v8096_v25 = vld [vmem:[#allocation29_spill] sm:$0xff]  ;;  %v8097_v29 = vld [vmem:[#allocation30_spill] sm:$0xff] }
 0x2c2   :  { %4137 = vmatpush1.bf16.msra.mxu0 %v8087_v61  ;;  %4201 = vmatpush1.bf16.msra.mxu1 %v8088_v48  ;;  %v8098_v61 = vld [vmem:[#allocation31_spill] sm:$0xff]  ;;  %v8099_v48 = vld [vmem:[#allocation32_spill] sm:$0xff] }
 0x2c3   :  { %4139 = vmatprep.subr.bf16.mxu0 %v8089_v23  ;;  %4203 = vmatprep.subr.bf16.mxu1 %v8090_v47  ;;  %v8100_v23 = vld [vmem:[#allocation33_spill] sm:$0xff]  ;;  %v8101_v47 = vld [vmem:[#allocation34_spill] sm:$0xff] }
 0x2c6   :  { %4141 = vmatpush1.bf16.msra.mxu0 %v8091_v62  ;;  %4205 = vmatpush1.bf16.msra.mxu1 %v8092_v51  ;;  %v8102_v62 = vld [vmem:[#allocation35_spill] sm:$0xff]  ;;  %v8103_v51 = vld [vmem:[#allocation36_spill] sm:$0xff] }
 0x2c7   :  { %4143 = vmatprep.subr.bf16.mxu0 %v8093_v39  ;;  %4207 = vmatprep.subr.bf16.mxu1 %v8094_v34  ;;  %v8104_v39 = vld [vmem:[#allocation37_spill] sm:$0xff]  ;;  %v8105_v34 = vld [vmem:[#allocation38_spill] sm:$0xff] }
 0x2ca   :  { %4145 = vmatpush1.bf16.msra.mxu0 %v8095_v37  ;;  %4209 = vmatpush1.bf16.msra.mxu1 %v8096_v25  ;;  %v8106_v37 = vld [vmem:[#allocation39_spill] sm:$0xff]  ;;  %v8107_v25 = vld [vmem:[#allocation40_spill] sm:$0xff] }
 0x2cb   :  { %4147 = vmatprep.subr.bf16.mxu0 %v8097_v29  ;;  %4211 = vmatprep.subr.bf16.mxu1 %v8098_v61  ;;  %v8108_v29 = vld [vmem:[#allocation41_spill] sm:$0xff]  ;;  %v8109_v61 = vld [vmem:[#allocation42_spill] sm:$0xff] }
 0x2ce   :  { %4149 = vmatpush1.bf16.msra.mxu0 %v8099_v48  ;;  %4213 = vmatpush1.bf16.msra.mxu1 %v8100_v23  ;;  %v8110_v48 = vld [vmem:[#allocation43_spill] sm:$0xff]  ;;  %v8111_v23 = vld [vmem:[#allocation44_spill] sm:$0xff] }
 0x2cf   :  { %4151 = vmatprep.subr.bf16.mxu0 %v8101_v47  ;;  %4215 = vmatprep.subr.bf16.mxu1 %v8102_v62  ;;  %v8112_v47 = vld [vmem:[#allocation45_spill] sm:$0xff]  ;;  %v8113_v62 = vld [vmem:[#allocation46_spill] sm:$0xff] }
 0x2d2   :  { %4153 = vmatpush1.bf16.msra.mxu0 %v8103_v51  ;;  %4217 = vmatpush1.bf16.msra.mxu1 %v8104_v39  ;;  %v8114_v51 = vld [vmem:[#allocation47_spill] sm:$0xff]  ;;  %v8115_v39 = vld [vmem:[#allocation48_spill] sm:$0xff] }
 0x2d3   :  { %4155 = vmatprep.subr.bf16.mxu0 %v8105_v34  ;;  %4219 = vmatprep.subr.bf16.mxu1 %v8106_v37  ;;  %v8116_v34 = vld [vmem:[#allocation49_spill] sm:$0xff]  ;;  %v8117_v37 = vld [vmem:[#allocation50_spill] sm:$0xff] }
 0x2d6   :  { %4157 = vmatpush1.bf16.msra.mxu0 %v8107_v25  ;;  %4221 = vmatpush1.bf16.msra.mxu1 %v8108_v29  ;;  %v8118_v25 = vld [vmem:[#allocation51_spill] sm:$0xff]  ;;  %v8119_v29 = vld [vmem:[#allocation52_spill] sm:$0xff] }
 0x2d7   :  { %4159 = vmatprep.subr.bf16.mxu0 %v8109_v61  ;;  %4223 = vmatprep.subr.bf16.mxu1 %v8110_v48  ;;  %v8120_v61 = vld [vmem:[#allocation53_spill] sm:$0xff]  ;;  %v8121_v48 = vld [vmem:[#allocation54_spill] sm:$0xff] }
 0x2da   :  { %4161 = vmatpush1.bf16.msra.mxu0 %v8111_v23  ;;  %4225 = vmatpush1.bf16.msra.mxu1 %v8112_v47  ;;  %v8122_v23 = vld [vmem:[#allocation55_spill] sm:$0xff]  ;;  %v8123_v47 = vld [vmem:[#allocation56_spill] sm:$0xff] }
 0x2db   :  { %4163 = vmatprep.subr.bf16.mxu0 %v8113_v62  ;;  %4227 = vmatprep.subr.bf16.mxu1 %v8114_v51  ;;  %v8124_v62 = vld [vmem:[#allocation57_spill] sm:$0xff]  ;;  %v8125_v51 = vld [vmem:[#allocation2_spill] sm:$0xff] }
 0x2de   :  { %4165 = vmatpush1.bf16.msra.mxu0 %v8115_v39  ;;  %4229 = vmatpush1.bf16.msra.mxu1 %v8116_v34  ;;  %v8126_v39 = vld [vmem:[#allocation3_spill] sm:$0xff] }
 0x2df   :  { %4167 = vmatprep.subr.bf16.mxu0 %v8117_v37  ;;  %4231 = vmatprep.subr.bf16.mxu1 %v8118_v25 }
 0x2e2   :  { %4169 = vmatpush1.bf16.msra.mxu0 %v8119_v29  ;;  %4233 = vmatpush1.bf16.msra.mxu1 %v8120_v61 }
 0x2e3   :  { %4171 = vmatprep.subr.bf16.mxu0 %v8121_v48  ;;  %4235 = vmatprep.subr.bf16.mxu1 %v8122_v23  ;;  %v8129_v23 = vld [vmem:[#allocation63_spill] sm:$0xff] }
 0x2e6   :  { %4173 = vmatpush1.bf16.msra.mxu0 %v8123_v47  ;;  %4237 = vmatpush1.bf16.msra.mxu1 %v8124_v62  ;;  %v8130_v62 = vld [vmem:[#allocation64_spill] sm:$0xff] }
 0x2e7   :  { %4239 = vmatprep.subr.bf16.mxu0 %v8125_v51  ;;  %4271 = vmatprep.subr.bf16.mxu1 %v8126_v39 }
 0x35c   :  { %v1207_v34 = vpop.f32.mrb[18].mxu0  ;;  %v1278_v37 = vpop.f32.mrb[18].mxu1 }
 0x35d   :  { %v1208_v25 = vadd.f32 %v1207_v34, %v8127_v58  ;;  %v1209_v3 = vpop.f32.mrb[19].mxu0  ;;  %v1280_v29 = vpop.f32.mrb[19].mxu1  ;;  %v1279_v43 = vadd.f32 %v1278_v37, %v8130_v62  ;;  %v8131_v37 = vld [vmem:[#allocation59_spill] sm:$0xff] }
 0x35e   :  { %v1210_v61 = vadd.f32 %v1209_v3, %v8128_v10  ;;  %v1281_v47 = vadd.f32 %v1280_v29, %v8129_v23 }
 0x35f   :  { %v3442_v44 = vmul.f32 -1.442695, %v1208_v25 }
 0x360   :  { %v3443_v48 = vmul.f32 -1.442695, %v1210_v61  ;;  %v3444_v5 = vmul.f32 -1.442695, %v1281_v47 }
 0x361   :  { %5337 = vpow2.f32 %v3442_v44 }
 0x362   :  { %5339 = vpow2.f32 %v3443_v48 }
 0x363   :  { %5341 = vpow2.f32 %v3444_v5 }
 0x364   :  { %5343 = vtanh.f32 %v1279_v43 }
 0x36b   :  { %v5338_v51 = vpop.eup %5337 }
 0x36c   :  { %v5340_v18 = vpop.eup %5339  ;;  %v1286_v39 = vadd.f32 1.0, %v5338_v51 }
 0x36d   :  { %v1292_v15 = vadd.f32 1.0, %v5340_v18  ;;  %v5342_v34 = vpop.eup %5341 }
 0x36e   :  { %5345 = vrcp.f32 %v1286_v39  ;;  %v5344_v58 = vpop.eup %5343  ;;  %v1299_v44 = vadd.f32 1.0, %v5342_v34 }
 0x36f   :  { %5347 = vrcp.f32 %v1292_v15 }
 0x370   :  { %5349 = vrcp.f32 %v1299_v44 }
 0x378   :  { %v5346_v3 = vpop.eup %5345 }
 0x379   :  { %v5348_v25 = vpop.eup %5347  ;;  %v1303_v61 = vmul.f32 %v5346_v3, %v5344_v58  ;;  %v8132_v58 = vld [vmem:[#allocation61_spill] sm:$0xff] }
 0x37a   :  { %v1302_v48 = vmul.f32 %v5348_v25, %v7054_v9  ;;  %v5350_v9 = vpop.eup %5349 }
 0x37c   :  { %v1373_v29 = vpop.f32.mrb[4].mxu0  ;;  %v1444_v47 = vpop.f32.mrb[4].mxu1  ;;  %v7168_v23 = vadd.f32 %v1303_v61, %v1302_v48 }
 0x37d   :  { %v5226_v51 = vadd.f32 %v1373_v29, %v8131_v37  ;;  %v1375_v5 = vpop.f32.mrb[5].mxu0  ;;  %v1446_v43 = vpop.f32.mrb[5].mxu1  ;;  %v5242_v61 = vadd.f32 %v1444_v47, %v6927_v8 }
 0x37e   :  { %v5227_v18 = vadd.f32 %v1375_v5, %v8071_v19  ;;  %5351 = vtanh.f32 %v7168_v23  ;;  %v5243_v34 = vadd.f32 %v1446_v43, %v8132_v58 }
 0x37f   :  { %v3445_v15 = vmul.f32 -1.442695, %v5226_v51 }
 0x380   :  { %v3446_v39 = vmul.f32 -1.442695, %v5227_v18  ;;  %v3447_v25 = vmul.f32 -1.442695, %v5243_v34 }
 0x381   :  { %5353 = vpow2.f32 %v3445_v15 }
 0x382   :  { %5355 = vpow2.f32 %v3446_v39 }
 0x383   :  { %5357 = vpow2.f32 %v3447_v25 }
 0x384   :  { %5359 = vtanh.f32 %v5242_v61  ;;  %v8136_v61 = vld [vmem:[#allocation7_spill] sm:$0xff] }
 0x388   :  { %v5352_v3 = vpop.eup %5351 }
 0x389   :  { %v1306_v44 = vmul.f32 %v5352_v3, %v5350_v9 }
 0x38b   :  { %v5354_v48 = vpop.eup %5353  ;;  %1541 = vmatprep.mubr.f32.mxu0 %v1306_v44  ;;  %1612 = vmatprep.mubr.f32.mxu1 %v1306_v44  ;;  %v8137_v44 = vld [vmem:[#allocation8_spill] sm:$0xff] }
 0x38c   :  { %v5356_v29 = vpop.eup %5355  ;;  %v1456_v37 = vadd.f32 1.0, %v5354_v48  ;;  %v8138_v48 = vld [vmem:[#allocation9_spill] sm:$0xff] }
 0x38d   :  { %v1462_v5 = vadd.f32 1.0, %v5356_v29  ;;  %v5358_v51 = vpop.eup %5357  ;;  %v8139_v29 = vld [vmem:[#allocation10_spill] sm:$0xff] }
 0x38e   :  { %5361 = vrcp.f32 %v1456_v37  ;;  %v5360_v18 = vpop.eup %5359  ;;  %v1469_v58 = vadd.f32 1.0, %v5358_v51  ;;  %v8134_v37 = vld [vmem:[#allocation5_spill] sm:$0xff]  ;;  %v8141_v51 = vld [vmem:[#allocation12_spill] sm:$0xff] }
 0x38f   :  { %5363 = vrcp.f32 %v1462_v5  ;;  %v8140_v5 = vld [vmem:[#allocation11_spill] sm:$0xff] }
 0x390   :  { %5365 = vrcp.f32 %v1469_v58  ;;  %v8135_v58 = vld [vmem:[#allocation6_spill] sm:$0xff] }
 0x398   :  { %v5362_v15 = vpop.eup %5361 }
 0x399   :  { %v5364_v43 = vpop.eup %5363  ;;  %v1473_v39 = vmul.f32 %v5362_v15, %v5360_v18  ;;  %v8142_v18 = vld [vmem:[#allocation13_spill] sm:$0xff]  ;;  %v8143_v15 = vld [vmem:[#allocation14_spill] sm:$0xff] }
 0x39a   :  { %v1472_v34 = vmul.f32 %v5364_v43, %v7062_v12  ;;  %v5366_v9 = vpop.eup %5365  ;;  %v8133_v12 = vld [vmem:[#allocation4_spill] sm:$0xff]  ;;  %v8144_v43 = vld [vmem:[#allocation15_spill] sm:$0xff] }
 0x39c   :  { %v7176_v47 = vadd.f32 %v1473_v39, %v1472_v34  ;;  %v8145_v39 = vld [vmem:[#allocation16_spill] sm:$0xff]  ;;  %v8146_v34 = vld [vmem:[#allocation17_spill] sm:$0xff] }
 0x39e   :  { %5367 = vtanh.f32 %v7176_v47 }
 0x3a8   :  { %v5368_v3 = vpop.eup %5367 }
 0x3a9   :  { %v1476_v25 = vmul.f32 %v5368_v3, %v5366_v9  ;;  %v8147_v9 = vld [vmem:[#allocation18_spill] sm:$0xff]  ;;  %v8148_v3 = vld [vmem:[#allocation19_spill] sm:$0xff] }
 0x3ab   :  { %1542 = vmatmul.mubr.f32.vlgmr.msra.gmra.mrb[20].mxu0 %v1476_v25  ;;  %1613 = vmatmul.mubr.f32.vlgmr.msra.gmra.mrb[20].mxu1 %v1476_v25 }
 0x3ac   :  { %4241 = vmatpush1.bf16.msra.mxu0 %v6021_v14  ;;  %4273 = vmatpush1.bf16.msra.mxu1 %v6030_v17 }
 0x3ad   :  { %4243 = vmatprep.subr.bf16.mxu0 %v6042_v21  ;;  %4275 = vmatprep.subr.bf16.mxu1 %v6050_v24 }
 0x3ae   :  { %1707 = vmatprep.mubr.f32.mxu0 %v8010_v4  ;;  %1778 = vmatprep.mubr.f32.mxu1 %v8010_v4 }
 0x3b0   :  { %4245 = vmatpush1.bf16.msra.mxu0 %v6062_v28  ;;  %4277 = vmatpush1.bf16.msra.mxu1 %v6071_v31 }
 0x3b1   :  { %4247 = vmatprep.subr.bf16.mxu0 %v6083_v35  ;;  %4279 = vmatprep.subr.bf16.mxu1 %v6092_v38 }
 0x3b4   :  { %4249 = vmatpush1.bf16.msra.mxu0 %v6104_v42  ;;  %4281 = vmatpush1.bf16.msra.mxu1 %v6113_v45 }
 0x3b5   :  { %4251 = vmatprep.subr.bf16.mxu0 %v6125_v49  ;;  %4283 = vmatprep.subr.bf16.mxu1 %v6134_v52 }
 0x3b8   :  { %4253 = vmatpush1.bf16.msra.mxu0 %v6146_v56  ;;  %4285 = vmatpush1.bf16.msra.mxu1 %v6155_v59 }
 0x3b9   :  { %4255 = vmatprep.subr.bf16.mxu0 %v6167_v63  ;;  %4287 = vmatprep.subr.bf16.mxu1 %v6176_v2 }
 0x3bc   :  { %4257 = vmatpush1.bf16.msra.mxu0 %v6188_v7  ;;  %4289 = vmatpush1.bf16.msra.mxu1 %v6197_v11 }
 0x3bd   :  { %4259 = vmatprep.subr.bf16.mxu0 %v6209_v16  ;;  %4291 = vmatprep.subr.bf16.mxu1 %v6218_v20 }
 0x3c0   :  { %4261 = vmatpush1.bf16.msra.mxu0 %v6230_v26  ;;  %4293 = vmatpush1.bf16.msra.mxu1 %v6239_v30 }
 0x3c1   :  { %4263 = vmatprep.subr.bf16.mxu0 %v6251_v36  ;;  %4295 = vmatprep.subr.bf16.mxu1 %v6260_v40 }
 0x3c4   :  { %4265 = vmatpush1.bf16.msra.mxu0 %v6272_v46  ;;  %4297 = vmatpush1.bf16.msra.mxu1 %v6281_v50 }
 0x3c5   :  { %4267 = vmatprep.subr.bf16.mxu0 %v6293_v55  ;;  %4299 = vmatprep.subr.bf16.mxu1 %v6302_v60 }
 0x3c8   :  { %4269 = vmatpush1.bf16.msra.mxu0 %v6314_v1  ;;  %4301 = vmatpush1.bf16.msra.mxu1 %v6323_v6 }
 0x3c9   :  { %4303 = vmatprep.subr.bf16.mxu0 %v6335_v13  ;;  %4367 = vmatprep.subr.bf16.mxu1 %v6347_v22 }
 0x3cb   :  { %1708 = vmatmul.mubr.f32.vlgmr.msra.gmra.mrb[6].mxu0 %v1476_v25  ;;  %1779 = vmatmul.mubr.f32.vlgmr.msra.gmra.mrb[6].mxu1 %v1476_v25  ;;  %v8149_v25 = vld [vmem:[#allocation20_spill] sm:$0xff] }
 0x3cc   :  { %4305 = vmatpush1.bf16.msra.mxu0 %v6356_v27  ;;  %4369 = vmatpush1.bf16.msra.mxu1 %v6360_v32 }
 0x3cd   :  { %4307 = vmatprep.subr.bf16.mxu0 %v6362_v33  ;;  %4371 = vmatprep.subr.bf16.mxu1 %v6375_v41 }
 0x3d0   :  { %4309 = vmatpush1.bf16.msra.mxu0 %v6396_v53  ;;  %4373 = vmatpush1.bf16.msra.mxu1 %v6400_v54 }
 0x3d1   :  { %4311 = vmatprep.subr.bf16.mxu0 %v6402_v57  ;;  %4375 = vmatprep.subr.bf16.mxu1 %v6414_v0 }
 0x3d4   :  { %4313 = vmatpush1.bf16.msra.mxu0 %v8133_v12  ;;  %4377 = vmatpush1.bf16.msra.mxu1 %v8134_v37 }
 0x3d5   :  { %4315 = vmatprep.subr.bf16.mxu0 %v8135_v58  ;;  %4379 = vmatprep.subr.bf16.mxu1 %v8136_v61 }
 0x3d8   :  { %4317 = vmatpush1.bf16.msra.mxu0 %v8137_v44  ;;  %4381 = vmatpush1.bf16.msra.mxu1 %v8138_v48  ;;  %v8189_v48 = vld [vmem:[#allocation58_spill] sm:$0xff] }
 0x3d9   :  { %4319 = vmatprep.subr.bf16.mxu0 %v8139_v29  ;;  %4383 = vmatprep.subr.bf16.mxu1 %v8140_v5  ;;  %v8150_v29 = vld [vmem:[#allocation21_spill] sm:$0xff]  ;;  %v8151_v5 = vld [vmem:[#allocation22_spill] sm:$0xff] }
 0x3dc   :  { %4321 = vmatpush1.bf16.msra.mxu0 %v8141_v51  ;;  %4385 = vmatpush1.bf16.msra.mxu1 %v8142_v18  ;;  %v8152_v51 = vld [vmem:[#allocation23_spill] sm:$0xff]  ;;  %v8153_v18 = vld [vmem:[#allocation24_spill] sm:$0xff] }
 0x3dd   :  { %4323 = vmatprep.subr.bf16.mxu0 %v8143_v15  ;;  %4387 = vmatprep.subr.bf16.mxu1 %v8144_v43  ;;  %v8154_v15 = vld [vmem:[#allocation25_spill] sm:$0xff]  ;;  %v8155_v43 = vld [vmem:[#allocation26_spill] sm:$0xff] }
 0x3e0   :  { %4325 = vmatpush1.bf16.msra.mxu0 %v8145_v39  ;;  %4389 = vmatpush1.bf16.msra.mxu1 %v8146_v34  ;;  %v8156_v39 = vld [vmem:[#allocation27_spill] sm:$0xff]  ;;  %v8157_v34 = vld [vmem:[#allocation28_spill] sm:$0xff] }
 0x3e1   :  { %4327 = vmatprep.subr.bf16.mxu0 %v8147_v9  ;;  %4391 = vmatprep.subr.bf16.mxu1 %v8148_v3  ;;  %v8158_v9 = vld [vmem:[#allocation29_spill] sm:$0xff]  ;;  %v8159_v3 = vld [vmem:[#allocation30_spill] sm:$0xff] }
 0x3e4   :  { %4329 = vmatpush1.bf16.msra.mxu0 %v8149_v25  ;;  %4393 = vmatpush1.bf16.msra.mxu1 %v8150_v29  ;;  %v8160_v25 = vld [vmem:[#allocation31_spill] sm:$0xff]  ;;  %v8161_v29 = vld [vmem:[#allocation32_spill] sm:$0xff] }
 0x3e5   :  { %4331 = vmatprep.subr.bf16.mxu0 %v8151_v5  ;;  %4395 = vmatprep.subr.bf16.mxu1 %v8152_v51  ;;  %v8162_v5 = vld [vmem:[#allocation33_spill] sm:$0xff]  ;;  %v8163_v51 = vld [vmem:[#allocation34_spill] sm:$0xff] }
 0x3e8   :  { %4333 = vmatpush1.bf16.msra.mxu0 %v8153_v18  ;;  %4397 = vmatpush1.bf16.msra.mxu1 %v8154_v15  ;;  %v8164_v18 = vld [vmem:[#allocation35_spill] sm:$0xff]  ;;  %v8165_v15 = vld [vmem:[#allocation36_spill] sm:$0xff] }
 0x3e9   :  { %4335 = vmatprep.subr.bf16.mxu0 %v8155_v43  ;;  %4399 = vmatprep.subr.bf16.mxu1 %v8156_v39  ;;  %v8166_v43 = vld [vmem:[#allocation37_spill] sm:$0xff]  ;;  %v8167_v39 = vld [vmem:[#allocation38_spill] sm:$0xff] }
 0x3ec   :  { %4337 = vmatpush1.bf16.msra.mxu0 %v8157_v34  ;;  %4401 = vmatpush1.bf16.msra.mxu1 %v8158_v9  ;;  %v8168_v34 = vld [vmem:[#allocation39_spill] sm:$0xff]  ;;  %v8169_v9 = vld [vmem:[#allocation40_spill] sm:$0xff] }
 0x3ed   :  { %4339 = vmatprep.subr.bf16.mxu0 %v8159_v3  ;;  %4403 = vmatprep.subr.bf16.mxu1 %v8160_v25  ;;  %v8170_v3 = vld [vmem:[#allocation41_spill] sm:$0xff]  ;;  %v8171_v25 = vld [vmem:[#allocation42_spill] sm:$0xff] }
 0x3f0   :  { %4341 = vmatpush1.bf16.msra.mxu0 %v8161_v29  ;;  %4405 = vmatpush1.bf16.msra.mxu1 %v8162_v5  ;;  %v8172_v29 = vld [vmem:[#allocation43_spill] sm:$0xff]  ;;  %v8173_v5 = vld [vmem:[#allocation44_spill] sm:$0xff] }
 0x3f1   :  { %4343 = vmatprep.subr.bf16.mxu0 %v8163_v51  ;;  %4407 = vmatprep.subr.bf16.mxu1 %v8164_v18  ;;  %v8174_v51 = vld [vmem:[#allocation45_spill] sm:$0xff]  ;;  %v8175_v18 = vld [vmem:[#allocation46_spill] sm:$0xff] }
 0x3f4   :  { %4345 = vmatpush1.bf16.msra.mxu0 %v8165_v15  ;;  %4409 = vmatpush1.bf16.msra.mxu1 %v8166_v43  ;;  %v8176_v15 = vld [vmem:[#allocation47_spill] sm:$0xff]  ;;  %v8177_v43 = vld [vmem:[#allocation48_spill] sm:$0xff] }
 0x3f5   :  { %4347 = vmatprep.subr.bf16.mxu0 %v8167_v39  ;;  %4411 = vmatprep.subr.bf16.mxu1 %v8168_v34  ;;  %v8178_v39 = vld [vmem:[#allocation49_spill] sm:$0xff]  ;;  %v8179_v34 = vld [vmem:[#allocation50_spill] sm:$0xff] }
 0x3f8   :  { %4349 = vmatpush1.bf16.msra.mxu0 %v8169_v9  ;;  %4413 = vmatpush1.bf16.msra.mxu1 %v8170_v3  ;;  %v8180_v9 = vld [vmem:[#allocation51_spill] sm:$0xff]  ;;  %v8181_v3 = vld [vmem:[#allocation52_spill] sm:$0xff] }
 0x3f9   :  { %4351 = vmatprep.subr.bf16.mxu0 %v8171_v25  ;;  %4415 = vmatprep.subr.bf16.mxu1 %v8172_v29  ;;  %v8182_v25 = vld [vmem:[#allocation53_spill] sm:$0xff]  ;;  %v8183_v29 = vld [vmem:[#allocation54_spill] sm:$0xff] }
 0x3fc   :  { %4353 = vmatpush1.bf16.msra.mxu0 %v8173_v5  ;;  %4417 = vmatpush1.bf16.msra.mxu1 %v8174_v51  ;;  %v8184_v5 = vld [vmem:[#allocation55_spill] sm:$0xff]  ;;  %v8185_v51 = vld [vmem:[#allocation56_spill] sm:$0xff] }
 0x3fd   :  { %4355 = vmatprep.subr.bf16.mxu0 %v8175_v18  ;;  %4419 = vmatprep.subr.bf16.mxu1 %v8176_v15  ;;  %v8186_v18 = vld [vmem:[#allocation57_spill] sm:$0xff]  ;;  %v8187_v15 = vld [vmem:[#allocation2_spill] sm:$0xff] }
 0x400   :  { %4357 = vmatpush1.bf16.msra.mxu0 %v8177_v43  ;;  %4421 = vmatpush1.bf16.msra.mxu1 %v8178_v39  ;;  %v8188_v43 = vld [vmem:[#allocation3_spill] sm:$0xff] }
 0x401   :  { %4359 = vmatprep.subr.bf16.mxu0 %v8179_v34  ;;  %4423 = vmatprep.subr.bf16.mxu1 %v8180_v9 }
 0x404   :  { %4361 = vmatpush1.bf16.msra.mxu0 %v8181_v3  ;;  %4425 = vmatpush1.bf16.msra.mxu1 %v8182_v25 }
 0x405   :  { %4363 = vmatprep.subr.bf16.mxu0 %v8183_v29  ;;  %4427 = vmatprep.subr.bf16.mxu1 %v8184_v5  ;;  %v8190_v5 = vld [vmem:[#allocation63_spill] sm:$0xff] }
 0x408   :  { %4365 = vmatpush1.bf16.msra.mxu0 %v8185_v51  ;;  %4429 = vmatpush1.bf16.msra.mxu1 %v8186_v18 }
 0x409   :  { %4431 = vmatprep.subr.bf16.mxu0 %v8187_v15  ;;  %4463 = vmatprep.subr.bf16.mxu1 %v8188_v43 }
 0x47e   :  { %v1543_v39 = vpop.f32.mrb[20].mxu0  ;;  %v1614_v34 = vpop.f32.mrb[20].mxu1 }
 0x47f   :  { %v1544_v9 = vadd.f32 %v1543_v39, %v8189_v48  ;;  %v1545_v44 = vpop.f32.mrb[21].mxu0  ;;  %v1616_v3 = vpop.f32.mrb[21].mxu1  ;;  %v1615_v18 = vadd.f32 %v1614_v34, %v8130_v62  ;;  %v8191_v34 = vld [vmem:[#allocation59_spill] sm:$0xff] }
 0x480   :  { %v1546_v25 = vadd.f32 %v1545_v44, %v8128_v10  ;;  %v1617_v51 = vadd.f32 %v1616_v3, %v8190_v5 }
 0x481   :  { %v3448_v61 = vmul.f32 -1.442695, %v1544_v9 }
 0x482   :  { %v3449_v29 = vmul.f32 -1.442695, %v1546_v25  ;;  %v3450_v58 = vmul.f32 -1.442695, %v1617_v51 }
 0x483   :  { %5369 = vpow2.f32 %v3448_v61 }
 0x484   :  { %5371 = vpow2.f32 %v3449_v29 }
 0x485   :  { %5373 = vpow2.f32 %v3450_v58 }
 0x486   :  { %5375 = vtanh.f32 %v1615_v18 }
 0x48d   :  { %v5370_v15 = vpop.eup %5369 }
 0x48e   :  { %v5372_v37 = vpop.eup %5371  ;;  %v1622_v43 = vadd.f32 1.0, %v5370_v15 }
 0x48f   :  { %v1628_v12 = vadd.f32 1.0, %v5372_v37  ;;  %v5374_v39 = vpop.eup %5373 }
 0x490   :  { %5377 = vrcp.f32 %v1622_v43  ;;  %v5376_v48 = vpop.eup %5375  ;;  %v1635_v61 = vadd.f32 1.0, %v5374_v39 }
 0x491   :  { %5379 = vrcp.f32 %v1628_v12 }
 0x492   :  { %5381 = vrcp.f32 %v1635_v61 }
 0x49a   :  { %v5378_v44 = vpop.eup %5377 }
 0x49b   :  { %v5380_v9 = vpop.eup %5379  ;;  %v1639_v25 = vmul.f32 %v5378_v44, %v5376_v48  ;;  %v8192_v48 = vld [vmem:[#allocation61_spill] sm:$0xff] }
 0x49c   :  { %v1638_v29 = vmul.f32 %v5380_v9, %v7168_v23  ;;  %v5382_v23 = vpop.eup %5381 }
 0x49e   :  { %v1709_v3 = vpop.f32.mrb[6].mxu0  ;;  %v1780_v51 = vpop.f32.mrb[6].mxu1  ;;  %v7282_v5 = vadd.f32 %v1639_v25, %v1638_v29 }
 0x49f   :  { %v5228_v15 = vadd.f32 %v1709_v3, %v8191_v34  ;;  %v1711_v58 = vpop.f32.mrb[7].mxu0  ;;  %v1782_v18 = vpop.f32.mrb[7].mxu1  ;;  %v5244_v25 = vadd.f32 %v1780_v51, %v6927_v8 }
 0x4a0   :  { %v5229_v37 = vadd.f32 %v1711_v58, %v8071_v19  ;;  %5383 = vtanh.f32 %v7282_v5  ;;  %v5245_v39 = vadd.f32 %v1782_v18, %v8192_v48 }
 0x4a1   :  { %v3451_v12 = vmul.f32 -1.442695, %v5228_v15 }
 0x4a2   :  { %v3452_v43 = vmul.f32 -1.442695, %v5229_v37  ;;  %v3453_v9 = vmul.f32 -1.442695, %v5245_v39 }
 0x4a3   :  { %5385 = vpow2.f32 %v3451_v12 }
 0x4a4   :  { %5387 = vpow2.f32 %v3452_v43 }
 0x4a5   :  { %5389 = vpow2.f32 %v3453_v9 }
 0x4a6   :  { %5391 = vtanh.f32 %v5244_v25  ;;  %v8196_v25 = vld [vmem:[#allocation7_spill] sm:$0xff] }
 0x4aa   :  { %v5384_v44 = vpop.eup %5383 }
 0x4ab   :  { %v1642_v61 = vmul.f32 %v5384_v44, %v5382_v23 }
 0x4ad   :  { %v5386_v29 = vpop.eup %5385  ;;  %1877 = vmatprep.mubr.f32.mxu0 %v1642_v61  ;;  %1948 = vmatprep.mubr.f32.mxu1 %v1642_v61  ;;  %v8197_v61 = vld [vmem:[#allocation8_spill] sm:$0xff] }
 0x4ae   :  { %v5388_v3 = vpop.eup %5387  ;;  %v1792_v34 = vadd.f32 1.0, %v5386_v29  ;;  %v8198_v29 = vld [vmem:[#allocation9_spill] sm:$0xff] }
 0x4af   :  { %v1798_v58 = vadd.f32 1.0, %v5388_v3  ;;  %v5390_v15 = vpop.eup %5389  ;;  %v8199_v3 = vld [vmem:[#allocation10_spill] sm:$0xff] }
 0x4b0   :  { %5393 = vrcp.f32 %v1792_v34  ;;  %v5392_v37 = vpop.eup %5391  ;;  %v1805_v48 = vadd.f32 1.0, %v5390_v15  ;;  %v8194_v34 = vld [vmem:[#allocation5_spill] sm:$0xff]  ;;  %v8201_v15 = vld [vmem:[#allocation12_spill] sm:$0xff] }
 0x4b1   :  { %5395 = vrcp.f32 %v1798_v58  ;;  %v8200_v58 = vld [vmem:[#allocation11_spill] sm:$0xff] }
 0x4b2   :  { %5397 = vrcp.f32 %v1805_v48  ;;  %v8195_v48 = vld [vmem:[#allocation6_spill] sm:$0xff] }
 0x4ba   :  { %v5394_v12 = vpop.eup %5393 }
 0x4bb   :  { %v5396_v18 = vpop.eup %5395  ;;  %v1809_v43 = vmul.f32 %v5394_v12, %v5392_v37  ;;  %v8202_v37 = vld [vmem:[#allocation13_spill] sm:$0xff]  ;;  %v8203_v12 = vld [vmem:[#allocation14_spill] sm:$0xff] }
 0x4bc   :  { %v1808_v39 = vmul.f32 %v5396_v18, %v7176_v47  ;;  %v5398_v23 = vpop.eup %5397  ;;  %v8193_v47 = vld [vmem:[#allocation4_spill] sm:$0xff]  ;;  %v8204_v18 = vld [vmem:[#allocation15_spill] sm:$0xff] }
 0x4be   :  { %v7290_v51 = vadd.f32 %v1809_v43, %v1808_v39  ;;  %v8205_v43 = vld [vmem:[#allocation16_spill] sm:$0xff]  ;;  %v8206_v39 = vld [vmem:[#allocation17_spill] sm:$0xff] }
 0x4c0   :  { %5399 = vtanh.f32 %v7290_v51 }
 0x4ca   :  { %v5400_v44 = vpop.eup %5399 }
 0x4cb   :  { %v1812_v9 = vmul.f32 %v5400_v44, %v5398_v23  ;;  %v8207_v23 = vld [vmem:[#allocation18_spill] sm:$0xff]  ;;  %v8208_v44 = vld [vmem:[#allocation19_spill] sm:$0xff] }
 0x4cd   :  { %1878 = vmatmul.mubr.f32.vlgmr.msra.gmra.mrb[22].mxu0 %v1812_v9  ;;  %1949 = vmatmul.mubr.f32.vlgmr.msra.gmra.mrb[22].mxu1 %v1812_v9 }
 0x4ce   :  { %4433 = vmatpush1.bf16.msra.mxu0 %v6021_v14  ;;  %4465 = vmatpush1.bf16.msra.mxu1 %v6030_v17 }
 0x4cf   :  { %4435 = vmatprep.subr.bf16.mxu0 %v6042_v21  ;;  %4467 = vmatprep.subr.bf16.mxu1 %v6050_v24 }
 0x4d0   :  { %2043 = vmatprep.mubr.f32.mxu0 %v8010_v4  ;;  %2114 = vmatprep.mubr.f32.mxu1 %v8010_v4 }
 0x4d2   :  { %4437 = vmatpush1.bf16.msra.mxu0 %v6062_v28  ;;  %4469 = vmatpush1.bf16.msra.mxu1 %v6071_v31 }
 0x4d3   :  { %4439 = vmatprep.subr.bf16.mxu0 %v6083_v35  ;;  %4471 = vmatprep.subr.bf16.mxu1 %v6092_v38 }
 0x4d6   :  { %4441 = vmatpush1.bf16.msra.mxu0 %v6104_v42  ;;  %4473 = vmatpush1.bf16.msra.mxu1 %v6113_v45 }
 0x4d7   :  { %4443 = vmatprep.subr.bf16.mxu0 %v6125_v49  ;;  %4475 = vmatprep.subr.bf16.mxu1 %v6134_v52 }
 0x4da   :  { %4445 = vmatpush1.bf16.msra.mxu0 %v6146_v56  ;;  %4477 = vmatpush1.bf16.msra.mxu1 %v6155_v59 }
 0x4db   :  { %4447 = vmatprep.subr.bf16.mxu0 %v6167_v63  ;;  %4479 = vmatprep.subr.bf16.mxu1 %v6176_v2 }
 0x4de   :  { %4449 = vmatpush1.bf16.msra.mxu0 %v6188_v7  ;;  %4481 = vmatpush1.bf16.msra.mxu1 %v6197_v11 }
 0x4df   :  { %4451 = vmatprep.subr.bf16.mxu0 %v6209_v16  ;;  %4483 = vmatprep.subr.bf16.mxu1 %v6218_v20 }
 0x4e2   :  { %4453 = vmatpush1.bf16.msra.mxu0 %v6230_v26  ;;  %4485 = vmatpush1.bf16.msra.mxu1 %v6239_v30 }
 0x4e3   :  { %4455 = vmatprep.subr.bf16.mxu0 %v6251_v36  ;;  %4487 = vmatprep.subr.bf16.mxu1 %v6260_v40 }
 0x4e6   :  { %4457 = vmatpush1.bf16.msra.mxu0 %v6272_v46  ;;  %4489 = vmatpush1.bf16.msra.mxu1 %v6281_v50 }
 0x4e7   :  { %4459 = vmatprep.subr.bf16.mxu0 %v6293_v55  ;;  %4491 = vmatprep.subr.bf16.mxu1 %v6302_v60 }
 0x4ea   :  { %4461 = vmatpush1.bf16.msra.mxu0 %v6314_v1  ;;  %4493 = vmatpush1.bf16.msra.mxu1 %v6323_v6 }
 0x4eb   :  { %4495 = vmatprep.subr.bf16.mxu0 %v6335_v13  ;;  %4559 = vmatprep.subr.bf16.mxu1 %v6347_v22 }
 0x4ed   :  { %2044 = vmatmul.mubr.f32.vlgmr.msra.gmra.mrb[8].mxu0 %v1812_v9  ;;  %2115 = vmatmul.mubr.f32.vlgmr.msra.gmra.mrb[8].mxu1 %v1812_v9  ;;  %v8209_v9 = vld [vmem:[#allocation20_spill] sm:$0xff] }
 0x4ee   :  { %4497 = vmatpush1.bf16.msra.mxu0 %v6356_v27  ;;  %4561 = vmatpush1.bf16.msra.mxu1 %v6360_v32 }
 0x4ef   :  { %4499 = vmatprep.subr.bf16.mxu0 %v6362_v33  ;;  %4563 = vmatprep.subr.bf16.mxu1 %v6375_v41 }
 0x4f2   :  { %4501 = vmatpush1.bf16.msra.mxu0 %v6396_v53  ;;  %4565 = vmatpush1.bf16.msra.mxu1 %v6400_v54 }
 0x4f3   :  { %4503 = vmatprep.subr.bf16.mxu0 %v6402_v57  ;;  %4567 = vmatprep.subr.bf16.mxu1 %v6414_v0 }
 0x4f6   :  { %4505 = vmatpush1.bf16.msra.mxu0 %v8193_v47  ;;  %4569 = vmatpush1.bf16.msra.mxu1 %v8194_v34 }
 0x4f7   :  { %4507 = vmatprep.subr.bf16.mxu0 %v8195_v48  ;;  %4571 = vmatprep.subr.bf16.mxu1 %v8196_v25 }
 0x4fa   :  { %4509 = vmatpush1.bf16.msra.mxu0 %v8197_v61  ;;  %4573 = vmatpush1.bf16.msra.mxu1 %v8198_v29  ;;  %v8249_v29 = vld [vmem:[#allocation58_spill] sm:$0xff] }
 0x4fb   :  { %4511 = vmatprep.subr.bf16.mxu0 %v8199_v3  ;;  %4575 = vmatprep.subr.bf16.mxu1 %v8200_v58  ;;  %v8210_v3 = vld [vmem:[#allocation21_spill] sm:$0xff]  ;;  %v8211_v58 = vld [vmem:[#allocation22_spill] sm:$0xff] }
 0x4fe   :  { %4513 = vmatpush1.bf16.msra.mxu0 %v8201_v15  ;;  %4577 = vmatpush1.bf16.msra.mxu1 %v8202_v37  ;;  %v8212_v15 = vld [vmem:[#allocation23_spill] sm:$0xff]  ;;  %v8213_v37 = vld [vmem:[#allocation24_spill] sm:$0xff] }
 0x4ff   :  { %4515 = vmatprep.subr.bf16.mxu0 %v8203_v12  ;;  %4579 = vmatprep.subr.bf16.mxu1 %v8204_v18  ;;  %v8214_v12 = vld [vmem:[#allocation25_spill] sm:$0xff]  ;;  %v8215_v18 = vld [vmem:[#allocation26_spill] sm:$0xff] }
 0x502   :  { %4517 = vmatpush1.bf16.msra.mxu0 %v8205_v43  ;;  %4581 = vmatpush1.bf16.msra.mxu1 %v8206_v39  ;;  %v8216_v43 = vld [vmem:[#allocation27_spill] sm:$0xff]  ;;  %v8217_v39 = vld [vmem:[#allocation28_spill] sm:$0xff] }
 0x503   :  { %4519 = vmatprep.subr.bf16.mxu0 %v8207_v23  ;;  %4583 = vmatprep.subr.bf16.mxu1 %v8208_v44  ;;  %v8218_v23 = vld [vmem:[#allocation29_spill] sm:$0xff]  ;;  %v8219_v44 = vld [vmem:[#allocation30_spill] sm:$0xff] }
 0x506   :  { %4521 = vmatpush1.bf16.msra.mxu0 %v8209_v9  ;;  %4585 = vmatpush1.bf16.msra.mxu1 %v8210_v3  ;;  %v8220_v9 = vld [vmem:[#allocation31_spill] sm:$0xff]  ;;  %v8221_v3 = vld [vmem:[#allocation32_spill] sm:$0xff] }
 0x507   :  { %4523 = vmatprep.subr.bf16.mxu0 %v8211_v58  ;;  %4587 = vmatprep.subr.bf16.mxu1 %v8212_v15  ;;  %v8222_v58 = vld [vmem:[#allocation33_spill] sm:$0xff]  ;;  %v8223_v15 = vld [vmem:[#allocation34_spill] sm:$0xff] }
 0x50a   :  { %4525 = vmatpush1.bf16.msra.mxu0 %v8213_v37  ;;  %4589 = vmatpush1.bf16.msra.mxu1 %v8214_v12  ;;  %v8224_v37 = vld [vmem:[#allocation35_spill] sm:$0xff]  ;;  %v8225_v12 = vld [vmem:[#allocation36_spill] sm:$0xff] }
 0x50b   :  { %4527 = vmatprep.subr.bf16.mxu0 %v8215_v18  ;;  %4591 = vmatprep.subr.bf16.mxu1 %v8216_v43  ;;  %v8226_v18 = vld [vmem:[#allocation37_spill] sm:$0xff]  ;;  %v8227_v43 = vld [vmem:[#allocation38_spill] sm:$0xff] }
 0x50e   :  { %4529 = vmatpush1.bf16.msra.mxu0 %v8217_v39  ;;  %4593 = vmatpush1.bf16.msra.mxu1 %v8218_v23  ;;  %v8228_v39 = vld [vmem:[#allocation39_spill] sm:$0xff]  ;;  %v8229_v23 = vld [vmem:[#allocation40_spill] sm:$0xff] }
 0x50f   :  { %4531 = vmatprep.subr.bf16.mxu0 %v8219_v44  ;;  %4595 = vmatprep.subr.bf16.mxu1 %v8220_v9  ;;  %v8230_v44 = vld [vmem:[#allocation41_spill] sm:$0xff]  ;;  %v8231_v9 = vld [vmem:[#allocation42_spill] sm:$0xff] }
 0x512   :  { %4533 = vmatpush1.bf16.msra.mxu0 %v8221_v3  ;;  %4597 = vmatpush1.bf16.msra.mxu1 %v8222_v58  ;;  %v8232_v3 = vld [vmem:[#allocation43_spill] sm:$0xff]  ;;  %v8233_v58 = vld [vmem:[#allocation44_spill] sm:$0xff] }
 0x513   :  { %4535 = vmatprep.subr.bf16.mxu0 %v8223_v15  ;;  %4599 = vmatprep.subr.bf16.mxu1 %v8224_v37  ;;  %v8234_v15 = vld [vmem:[#allocation45_spill] sm:$0xff]  ;;  %v8235_v37 = vld [vmem:[#allocation46_spill] sm:$0xff] }
 0x516   :  { %4537 = vmatpush1.bf16.msra.mxu0 %v8225_v12  ;;  %4601 = vmatpush1.bf16.msra.mxu1 %v8226_v18  ;;  %v8236_v12 = vld [vmem:[#allocation47_spill] sm:$0xff]  ;;  %v8237_v18 = vld [vmem:[#allocation48_spill] sm:$0xff] }
 0x517   :  { %4539 = vmatprep.subr.bf16.mxu0 %v8227_v43  ;;  %4603 = vmatprep.subr.bf16.mxu1 %v8228_v39  ;;  %v8238_v43 = vld [vmem:[#allocation49_spill] sm:$0xff]  ;;  %v8239_v39 = vld [vmem:[#allocation50_spill] sm:$0xff] }
 0x51a   :  { %4541 = vmatpush1.bf16.msra.mxu0 %v8229_v23  ;;  %4605 = vmatpush1.bf16.msra.mxu1 %v8230_v44  ;;  %v8240_v23 = vld [vmem:[#allocation51_spill] sm:$0xff]  ;;  %v8241_v44 = vld [vmem:[#allocation52_spill] sm:$0xff] }
 0x51b   :  { %4543 = vmatprep.subr.bf16.mxu0 %v8231_v9  ;;  %4607 = vmatprep.subr.bf16.mxu1 %v8232_v3  ;;  %v8242_v9 = vld [vmem:[#allocation53_spill] sm:$0xff]  ;;  %v8243_v3 = vld [vmem:[#allocation54_spill] sm:$0xff] }
 0x51e   :  { %4545 = vmatpush1.bf16.msra.mxu0 %v8233_v58  ;;  %4609 = vmatpush1.bf16.msra.mxu1 %v8234_v15  ;;  %v8244_v58 = vld [vmem:[#allocation55_spill] sm:$0xff]  ;;  %v8245_v15 = vld [vmem:[#allocation56_spill] sm:$0xff] }
 0x51f   :  { %4547 = vmatprep.subr.bf16.mxu0 %v8235_v37  ;;  %4611 = vmatprep.subr.bf16.mxu1 %v8236_v12  ;;  %v8246_v37 = vld [vmem:[#allocation57_spill] sm:$0xff]  ;;  %v8247_v12 = vld [vmem:[#allocation2_spill] sm:$0xff] }
 0x522   :  { %4549 = vmatpush1.bf16.msra.mxu0 %v8237_v18  ;;  %4613 = vmatpush1.bf16.msra.mxu1 %v8238_v43  ;;  %v8248_v18 = vld [vmem:[#allocation3_spill] sm:$0xff] }
 0x523   :  { %4551 = vmatprep.subr.bf16.mxu0 %v8239_v39  ;;  %4615 = vmatprep.subr.bf16.mxu1 %v8240_v23 }
 0x526   :  { %4553 = vmatpush1.bf16.msra.mxu0 %v8241_v44  ;;  %4617 = vmatpush1.bf16.msra.mxu1 %v8242_v9 }
 0x527   :  { %4555 = vmatprep.subr.bf16.mxu0 %v8243_v3  ;;  %4619 = vmatprep.subr.bf16.mxu1 %v8244_v58  ;;  %v8250_v58 = vld [vmem:[#allocation63_spill] sm:$0xff] }
 0x52a   :  { %4557 = vmatpush1.bf16.msra.mxu0 %v8245_v15  ;;  %4621 = vmatpush1.bf16.msra.mxu1 %v8246_v37 }
 0x52b   :  { %4623 = vmatprep.subr.bf16.mxu0 %v8247_v12  ;;  %4655 = vmatprep.subr.bf16.mxu1 %v8248_v18 }
 0x5a0   :  { %v1879_v43 = vpop.f32.mrb[22].mxu0  ;;  %v1950_v39 = vpop.f32.mrb[22].mxu1 }
 0x5a1   :  { %v1880_v23 = vadd.f32 %v1879_v43, %v8249_v29  ;;  %v1881_v61 = vpop.f32.mrb[23].mxu0  ;;  %v1952_v44 = vpop.f32.mrb[23].mxu1  ;;  %v1951_v37 = vadd.f32 %v1950_v39, %v8130_v62  ;;  %v8251_v39 = vld [vmem:[#allocation59_spill] sm:$0xff] }
 0x5a2   :  { %v1882_v9 = vadd.f32 %v1881_v61, %v8128_v10  ;;  %v1953_v15 = vadd.f32 %v1952_v44, %v8250_v58 }
 0x5a3   :  { %v3454_v25 = vmul.f32 -1.442695, %v1880_v23 }
 0x5a4   :  { %v3455_v3 = vmul.f32 -1.442695, %v1882_v9  ;;  %v3456_v48 = vmul.f32 -1.442695, %v1953_v15 }
 0x5a5   :  { %5401 = vpow2.f32 %v3454_v25 }
 0x5a6   :  { %5403 = vpow2.f32 %v3455_v3 }
 0x5a7   :  { %5405 = vpow2.f32 %v3456_v48 }
 0x5a8   :  { %5407 = vtanh.f32 %v1951_v37 }
 0x5af   :  { %v5402_v12 = vpop.eup %5401 }
 0x5b0   :  { %v5404_v34 = vpop.eup %5403  ;;  %v1958_v18 = vadd.f32 1.0, %v5402_v12 }
 0x5b1   :  { %v1964_v47 = vadd.f32 1.0, %v5404_v34  ;;  %v5406_v43 = vpop.eup %5405 }
 0x5b2   :  { %5409 = vrcp.f32 %v1958_v18  ;;  %v5408_v29 = vpop.eup %5407  ;;  %v1971_v25 = vadd.f32 1.0, %v5406_v43 }
 0x5b3   :  { %5411 = vrcp.f32 %v1964_v47 }
 0x5b4   :  { %5413 = vrcp.f32 %v1971_v25 }
 0x5bc   :  { %v5410_v61 = vpop.eup %5409 }
 0x5bd   :  { %v5412_v23 = vpop.eup %5411  ;;  %v1975_v9 = vmul.f32 %v5410_v61, %v5408_v29  ;;  %v8252_v29 = vld [vmem:[#allocation61_spill] sm:$0xff] }
 0x5be   :  { %v1974_v3 = vmul.f32 %v5412_v23, %v7282_v5  ;;  %v5414_v5 = vpop.eup %5413 }
 0x5c0   :  { %v2045_v44 = vpop.f32.mrb[8].mxu0  ;;  %v2116_v15 = vpop.f32.mrb[8].mxu1  ;;  %v7396_v58 = vadd.f32 %v1975_v9, %v1974_v3 }
 0x5c1   :  { %v5230_v12 = vadd.f32 %v2045_v44, %v8251_v39  ;;  %v2047_v48 = vpop.f32.mrb[9].mxu0  ;;  %v2118_v37 = vpop.f32.mrb[9].mxu1  ;;  %v5246_v9 = vadd.f32 %v2116_v15, %v6927_v8 }
 0x5c2   :  { %v5231_v34 = vadd.f32 %v2047_v48, %v8071_v19  ;;  %5415 = vtanh.f32 %v7396_v58  ;;  %v5247_v43 = vadd.f32 %v2118_v37, %v8252_v29 }
 0x5c3   :  { %v3457_v47 = vmul.f32 -1.442695, %v5230_v12 }
 0x5c4   :  { %v3458_v18 = vmul.f32 -1.442695, %v5231_v34  ;;  %v3459_v23 = vmul.f32 -1.442695, %v5247_v43 }
 0x5c5   :  { %5417 = vpow2.f32 %v3457_v47 }
 0x5c6   :  { %5419 = vpow2.f32 %v3458_v18 }
 0x5c7   :  { %5421 = vpow2.f32 %v3459_v23 }
 0x5c8   :  { %5423 = vtanh.f32 %v5246_v9  ;;  %v8256_v9 = vld [vmem:[#allocation7_spill] sm:$0xff] }
 0x5cc   :  { %v5416_v61 = vpop.eup %5415 }
 0x5cd   :  { %v1978_v25 = vmul.f32 %v5416_v61, %v5414_v5 }
 0x5cf   :  { %v5418_v3 = vpop.eup %5417  ;;  %2213 = vmatprep.mubr.f32.mxu0 %v1978_v25  ;;  %2284 = vmatprep.mubr.f32.mxu1 %v1978_v25  ;;  %v8257_v25 = vld [vmem:[#allocation8_spill] sm:$0xff] }
 0x5d0   :  { %v5420_v44 = vpop.eup %5419  ;;  %v2128_v39 = vadd.f32 1.0, %v5418_v3  ;;  %v8258_v3 = vld [vmem:[#allocation9_spill] sm:$0xff] }
 0x5d1   :  { %v2134_v48 = vadd.f32 1.0, %v5420_v44  ;;  %v5422_v12 = vpop.eup %5421  ;;  %v8259_v44 = vld [vmem:[#allocation10_spill] sm:$0xff] }
 0x5d2   :  { %5425 = vrcp.f32 %v2128_v39  ;;  %v5424_v34 = vpop.eup %5423  ;;  %v2141_v29 = vadd.f32 1.0, %v5422_v12  ;;  %v8254_v39 = vld [vmem:[#allocation5_spill] sm:$0xff]  ;;  %v8261_v12 = vld [vmem:[#allocation12_spill] sm:$0xff] }
 0x5d3   :  { %5427 = vrcp.f32 %v2134_v48  ;;  %v8260_v48 = vld [vmem:[#allocation11_spill] sm:$0xff] }
 0x5d4   :  { %5429 = vrcp.f32 %v2141_v29  ;;  %v8255_v29 = vld [vmem:[#allocation6_spill] sm:$0xff] }
 0x5dc   :  { %v5426_v47 = vpop.eup %5425 }
 0x5dd   :  { %v5428_v37 = vpop.eup %5427  ;;  %v2145_v18 = vmul.f32 %v5426_v47, %v5424_v34  ;;  %v8262_v34 = vld [vmem:[#allocation13_spill] sm:$0xff]  ;;  %v8263_v47 = vld [vmem:[#allocation14_spill] sm:$0xff] }
 0x5de   :  { %v2144_v43 = vmul.f32 %v5428_v37, %v7290_v51  ;;  %v5430_v5 = vpop.eup %5429  ;;  %v8253_v51 = vld [vmem:[#allocation4_spill] sm:$0xff]  ;;  %v8264_v37 = vld [vmem:[#allocation15_spill] sm:$0xff] }
 0x5e0   :  { %v7404_v15 = vadd.f32 %v2145_v18, %v2144_v43  ;;  %v8265_v18 = vld [vmem:[#allocation16_spill] sm:$0xff]  ;;  %v8266_v43 = vld [vmem:[#allocation17_spill] sm:$0xff] }
 0x5e2   :  { %5431 = vtanh.f32 %v7404_v15 }
 0x5ec   :  { %v5432_v61 = vpop.eup %5431 }
 0x5ed   :  { %v2148_v23 = vmul.f32 %v5432_v61, %v5430_v5  ;;  %v8267_v5 = vld [vmem:[#allocation18_spill] sm:$0xff]  ;;  %v8268_v61 = vld [vmem:[#allocation19_spill] sm:$0xff] }
 0x5ef   :  { %2214 = vmatmul.mubr.f32.vlgmr.msra.gmra.mrb[24].mxu0 %v2148_v23  ;;  %2285 = vmatmul.mubr.f32.vlgmr.msra.gmra.mrb[24].mxu1 %v2148_v23 }
 0x5f0   :  { %4625 = vmatpush1.bf16.msra.mxu0 %v6021_v14  ;;  %4657 = vmatpush1.bf16.msra.mxu1 %v6030_v17 }
 0x5f1   :  { %4627 = vmatprep.subr.bf16.mxu0 %v6042_v21  ;;  %4659 = vmatprep.subr.bf16.mxu1 %v6050_v24 }
 0x5f2   :  { %2379 = vmatprep.mubr.f32.mxu0 %v8010_v4  ;;  %2450 = vmatprep.mubr.f32.mxu1 %v8010_v4 }
 0x5f4   :  { %4629 = vmatpush1.bf16.msra.mxu0 %v6062_v28  ;;  %4661 = vmatpush1.bf16.msra.mxu1 %v6071_v31 }
 0x5f5   :  { %4631 = vmatprep.subr.bf16.mxu0 %v6083_v35  ;;  %4663 = vmatprep.subr.bf16.mxu1 %v6092_v38 }
 0x5f8   :  { %4633 = vmatpush1.bf16.msra.mxu0 %v6104_v42  ;;  %4665 = vmatpush1.bf16.msra.mxu1 %v6113_v45 }
 0x5f9   :  { %4635 = vmatprep.subr.bf16.mxu0 %v6125_v49  ;;  %4667 = vmatprep.subr.bf16.mxu1 %v6134_v52 }
 0x5fc   :  { %4637 = vmatpush1.bf16.msra.mxu0 %v6146_v56  ;;  %4669 = vmatpush1.bf16.msra.mxu1 %v6155_v59 }
 0x5fd   :  { %4639 = vmatprep.subr.bf16.mxu0 %v6167_v63  ;;  %4671 = vmatprep.subr.bf16.mxu1 %v6176_v2 }
 0x600   :  { %4641 = vmatpush1.bf16.msra.mxu0 %v6188_v7  ;;  %4673 = vmatpush1.bf16.msra.mxu1 %v6197_v11 }
 0x601   :  { %4643 = vmatprep.subr.bf16.mxu0 %v6209_v16  ;;  %4675 = vmatprep.subr.bf16.mxu1 %v6218_v20 }
 0x604   :  { %4645 = vmatpush1.bf16.msra.mxu0 %v6230_v26  ;;  %4677 = vmatpush1.bf16.msra.mxu1 %v6239_v30 }
 0x605   :  { %4647 = vmatprep.subr.bf16.mxu0 %v6251_v36  ;;  %4679 = vmatprep.subr.bf16.mxu1 %v6260_v40 }
 0x608   :  { %4649 = vmatpush1.bf16.msra.mxu0 %v6272_v46  ;;  %4681 = vmatpush1.bf16.msra.mxu1 %v6281_v50 }
 0x609   :  { %4651 = vmatprep.subr.bf16.mxu0 %v6293_v55  ;;  %4683 = vmatprep.subr.bf16.mxu1 %v6302_v60 }
 0x60c   :  { %4653 = vmatpush1.bf16.msra.mxu0 %v6314_v1  ;;  %4685 = vmatpush1.bf16.msra.mxu1 %v6323_v6 }
 0x60d   :  { %4687 = vmatprep.subr.bf16.mxu0 %v6335_v13  ;;  %4751 = vmatprep.subr.bf16.mxu1 %v6347_v22 }
 0x60f   :  { %2380 = vmatmul.mubr.f32.vlgmr.msra.gmra.mrb[10].mxu0 %v2148_v23  ;;  %2451 = vmatmul.mubr.f32.vlgmr.msra.gmra.mrb[10].mxu1 %v2148_v23  ;;  %v8269_v23 = vld [vmem:[#allocation20_spill] sm:$0xff] }
 0x610   :  { %4689 = vmatpush1.bf16.msra.mxu0 %v6356_v27  ;;  %4753 = vmatpush1.bf16.msra.mxu1 %v6360_v32 }
 0x611   :  { %4691 = vmatprep.subr.bf16.mxu0 %v6362_v33  ;;  %4755 = vmatprep.subr.bf16.mxu1 %v6375_v41 }
 0x614   :  { %4693 = vmatpush1.bf16.msra.mxu0 %v6396_v53  ;;  %4757 = vmatpush1.bf16.msra.mxu1 %v6400_v54 }
 0x615   :  { %4695 = vmatprep.subr.bf16.mxu0 %v6402_v57  ;;  %4759 = vmatprep.subr.bf16.mxu1 %v6414_v0 }
 0x618   :  { %4697 = vmatpush1.bf16.msra.mxu0 %v8253_v51  ;;  %4761 = vmatpush1.bf16.msra.mxu1 %v8254_v39 }
 0x619   :  { %4699 = vmatprep.subr.bf16.mxu0 %v8255_v29  ;;  %4763 = vmatprep.subr.bf16.mxu1 %v8256_v9 }
 0x61c   :  { %4701 = vmatpush1.bf16.msra.mxu0 %v8257_v25  ;;  %4765 = vmatpush1.bf16.msra.mxu1 %v8258_v3  ;;  %v8309_v3 = vld [vmem:[#allocation58_spill] sm:$0xff] }
 0x61d   :  { %4703 = vmatprep.subr.bf16.mxu0 %v8259_v44  ;;  %4767 = vmatprep.subr.bf16.mxu1 %v8260_v48  ;;  %v8270_v44 = vld [vmem:[#allocation21_spill] sm:$0xff]  ;;  %v8271_v48 = vld [vmem:[#allocation22_spill] sm:$0xff] }
 0x620   :  { %4705 = vmatpush1.bf16.msra.mxu0 %v8261_v12  ;;  %4769 = vmatpush1.bf16.msra.mxu1 %v8262_v34  ;;  %v8272_v12 = vld [vmem:[#allocation23_spill] sm:$0xff]  ;;  %v8273_v34 = vld [vmem:[#allocation24_spill] sm:$0xff] }
 0x621   :  { %4707 = vmatprep.subr.bf16.mxu0 %v8263_v47  ;;  %4771 = vmatprep.subr.bf16.mxu1 %v8264_v37  ;;  %v8274_v47 = vld [vmem:[#allocation25_spill] sm:$0xff]  ;;  %v8275_v37 = vld [vmem:[#allocation26_spill] sm:$0xff] }
 0x624   :  { %4709 = vmatpush1.bf16.msra.mxu0 %v8265_v18  ;;  %4773 = vmatpush1.bf16.msra.mxu1 %v8266_v43  ;;  %v8276_v18 = vld [vmem:[#allocation27_spill] sm:$0xff]  ;;  %v8277_v43 = vld [vmem:[#allocation28_spill] sm:$0xff] }
 0x625   :  { %4711 = vmatprep.subr.bf16.mxu0 %v8267_v5  ;;  %4775 = vmatprep.subr.bf16.mxu1 %v8268_v61  ;;  %v8278_v5 = vld [vmem:[#allocation29_spill] sm:$0xff]  ;;  %v8279_v61 = vld [vmem:[#allocation30_spill] sm:$0xff] }
 0x628   :  { %4713 = vmatpush1.bf16.msra.mxu0 %v8269_v23  ;;  %4777 = vmatpush1.bf16.msra.mxu1 %v8270_v44  ;;  %v8280_v23 = vld [vmem:[#allocation31_spill] sm:$0xff]  ;;  %v8281_v44 = vld [vmem:[#allocation32_spill] sm:$0xff] }
 0x629   :  { %4715 = vmatprep.subr.bf16.mxu0 %v8271_v48  ;;  %4779 = vmatprep.subr.bf16.mxu1 %v8272_v12  ;;  %v8282_v48 = vld [vmem:[#allocation33_spill] sm:$0xff]  ;;  %v8283_v12 = vld [vmem:[#allocation34_spill] sm:$0xff] }
 0x62c   :  { %4717 = vmatpush1.bf16.msra.mxu0 %v8273_v34  ;;  %4781 = vmatpush1.bf16.msra.mxu1 %v8274_v47  ;;  %v8284_v34 = vld [vmem:[#allocation35_spill] sm:$0xff]  ;;  %v8285_v47 = vld [vmem:[#allocation36_spill] sm:$0xff] }
 0x62d   :  { %4719 = vmatprep.subr.bf16.mxu0 %v8275_v37  ;;  %4783 = vmatprep.subr.bf16.mxu1 %v8276_v18  ;;  %v8286_v37 = vld [vmem:[#allocation37_spill] sm:$0xff]  ;;  %v8287_v18 = vld [vmem:[#allocation38_spill] sm:$0xff] }
 0x630   :  { %4721 = vmatpush1.bf16.msra.mxu0 %v8277_v43  ;;  %4785 = vmatpush1.bf16.msra.mxu1 %v8278_v5  ;;  %v8288_v43 = vld [vmem:[#allocation39_spill] sm:$0xff]  ;;  %v8289_v5 = vld [vmem:[#allocation40_spill] sm:$0xff] }
 0x631   :  { %4723 = vmatprep.subr.bf16.mxu0 %v8279_v61  ;;  %4787 = vmatprep.subr.bf16.mxu1 %v8280_v23  ;;  %v8290_v61 = vld [vmem:[#allocation41_spill] sm:$0xff]  ;;  %v8291_v23 = vld [vmem:[#allocation42_spill] sm:$0xff] }
 0x634   :  { %4725 = vmatpush1.bf16.msra.mxu0 %v8281_v44  ;;  %4789 = vmatpush1.bf16.msra.mxu1 %v8282_v48  ;;  %v8292_v44 = vld [vmem:[#allocation43_spill] sm:$0xff]  ;;  %v8293_v48 = vld [vmem:[#allocation44_spill] sm:$0xff] }
 0x635   :  { %4727 = vmatprep.subr.bf16.mxu0 %v8283_v12  ;;  %4791 = vmatprep.subr.bf16.mxu1 %v8284_v34  ;;  %v8294_v12 = vld [vmem:[#allocation45_spill] sm:$0xff]  ;;  %v8295_v34 = vld [vmem:[#allocation46_spill] sm:$0xff] }
 0x638   :  { %4729 = vmatpush1.bf16.msra.mxu0 %v8285_v47  ;;  %4793 = vmatpush1.bf16.msra.mxu1 %v8286_v37  ;;  %v8296_v47 = vld [vmem:[#allocation47_spill] sm:$0xff]  ;;  %v8297_v37 = vld [vmem:[#allocation48_spill] sm:$0xff] }
 0x639   :  { %4731 = vmatprep.subr.bf16.mxu0 %v8287_v18  ;;  %4795 = vmatprep.subr.bf16.mxu1 %v8288_v43  ;;  %v8298_v18 = vld [vmem:[#allocation49_spill] sm:$0xff]  ;;  %v8299_v43 = vld [vmem:[#allocation50_spill] sm:$0xff] }
 0x63c   :  { %4733 = vmatpush1.bf16.msra.mxu0 %v8289_v5  ;;  %4797 = vmatpush1.bf16.msra.mxu1 %v8290_v61  ;;  %v8300_v5 = vld [vmem:[#allocation51_spill] sm:$0xff]  ;;  %v8301_v61 = vld [vmem:[#allocation52_spill] sm:$0xff] }
 0x63d   :  { %4735 = vmatprep.subr.bf16.mxu0 %v8291_v23  ;;  %4799 = vmatprep.subr.bf16.mxu1 %v8292_v44  ;;  %v8302_v23 = vld [vmem:[#allocation53_spill] sm:$0xff]  ;;  %v8303_v44 = vld [vmem:[#allocation54_spill] sm:$0xff] }
 0x640   :  { %4737 = vmatpush1.bf16.msra.mxu0 %v8293_v48  ;;  %4801 = vmatpush1.bf16.msra.mxu1 %v8294_v12  ;;  %v8304_v48 = vld [vmem:[#allocation55_spill] sm:$0xff]  ;;  %v8305_v12 = vld [vmem:[#allocation56_spill] sm:$0xff] }
 0x641   :  { %4739 = vmatprep.subr.bf16.mxu0 %v8295_v34  ;;  %4803 = vmatprep.subr.bf16.mxu1 %v8296_v47  ;;  %v8306_v34 = vld [vmem:[#allocation57_spill] sm:$0xff]  ;;  %v8307_v47 = vld [vmem:[#allocation2_spill] sm:$0xff] }
 0x644   :  { %4741 = vmatpush1.bf16.msra.mxu0 %v8297_v37  ;;  %4805 = vmatpush1.bf16.msra.mxu1 %v8298_v18  ;;  %v8308_v37 = vld [vmem:[#allocation3_spill] sm:$0xff] }
 0x645   :  { %4743 = vmatprep.subr.bf16.mxu0 %v8299_v43  ;;  %4807 = vmatprep.subr.bf16.mxu1 %v8300_v5 }
 0x648   :  { %4745 = vmatpush1.bf16.msra.mxu0 %v8301_v61  ;;  %4809 = vmatpush1.bf16.msra.mxu1 %v8302_v23 }
 0x649   :  { %4747 = vmatprep.subr.bf16.mxu0 %v8303_v44  ;;  %4811 = vmatprep.subr.bf16.mxu1 %v8304_v48  ;;  %v8310_v48 = vld [vmem:[#allocation63_spill] sm:$0xff] }
 0x64c   :  { %4749 = vmatpush1.bf16.msra.mxu0 %v8305_v12  ;;  %4813 = vmatpush1.bf16.msra.mxu1 %v8306_v34 }
 0x64d   :  { %4815 = vmatprep.subr.bf16.mxu0 %v8307_v47  ;;  %4847 = vmatprep.subr.bf16.mxu1 %v8308_v37 }
 0x6c2   :  { %v2215_v18 = vpop.f32.mrb[24].mxu0  ;;  %v2286_v43 = vpop.f32.mrb[24].mxu1 }
 0x6c3   :  { %v2216_v5 = vadd.f32 %v2215_v18, %v8309_v3  ;;  %v2217_v25 = vpop.f32.mrb[25].mxu0  ;;  %v2288_v61 = vpop.f32.mrb[25].mxu1  ;;  %v2287_v34 = vadd.f32 %v2286_v43, %v8130_v62  ;;  %v8311_v43 = vld [vmem:[#allocation59_spill] sm:$0xff] }
 0x6c4   :  { %v2218_v23 = vadd.f32 %v2217_v25, %v8128_v10  ;;  %v2289_v12 = vadd.f32 %v2288_v61, %v8310_v48 }
 0x6c5   :  { %v3460_v9 = vmul.f32 -1.442695, %v2216_v5 }
 0x6c6   :  { %v3461_v44 = vmul.f32 -1.442695, %v2218_v23  ;;  %v3462_v29 = vmul.f32 -1.442695, %v2289_v12 }
 0x6c7   :  { %5433 = vpow2.f32 %v3460_v9 }
 0x6c8   :  { %5435 = vpow2.f32 %v3461_v44 }
 0x6c9   :  { %5437 = vpow2.f32 %v3462_v29 }
 0x6ca   :  { %5439 = vtanh.f32 %v2287_v34 }
 0x6d1   :  { %v5434_v47 = vpop.eup %5433 }
 0x6d2   :  { %v5436_v39 = vpop.eup %5435  ;;  %v2294_v37 = vadd.f32 1.0, %v5434_v47 }
 0x6d3   :  { %v2300_v51 = vadd.f32 1.0, %v5436_v39  ;;  %v5438_v18 = vpop.eup %5437 }
 0x6d4   :  { %5441 = vrcp.f32 %v2294_v37  ;;  %v5440_v3 = vpop.eup %5439  ;;  %v2307_v9 = vadd.f32 1.0, %v5438_v18 }
 0x6d5   :  { %5443 = vrcp.f32 %v2300_v51 }
 0x6d6   :  { %5445 = vrcp.f32 %v2307_v9 }
 0x6de   :  { %v5442_v25 = vpop.eup %5441 }
 0x6df   :  { %v5444_v5 = vpop.eup %5443  ;;  %v2311_v23 = vmul.f32 %v5442_v25, %v5440_v3  ;;  %v8312_v3 = vld [vmem:[#allocation61_spill] sm:$0xff] }
 0x6e0   :  { %v2310_v44 = vmul.f32 %v5444_v5, %v7396_v58  ;;  %v5446_v58 = vpop.eup %5445 }
 0x6e2   :  { %v2381_v61 = vpop.f32.mrb[10].mxu0  ;;  %v2452_v12 = vpop.f32.mrb[10].mxu1  ;;  %v7510_v48 = vadd.f32 %v2311_v23, %v2310_v44 }
 0x6e3   :  { %v5232_v47 = vadd.f32 %v2381_v61, %v8311_v43  ;;  %v2383_v29 = vpop.f32.mrb[11].mxu0  ;;  %v2454_v34 = vpop.f32.mrb[11].mxu1  ;;  %v5248_v23 = vadd.f32 %v2452_v12, %v6927_v8 }
 0x6e4   :  { %v5233_v39 = vadd.f32 %v2383_v29, %v8071_v19  ;;  %5447 = vtanh.f32 %v7510_v48  ;;  %v5249_v18 = vadd.f32 %v2454_v34, %v8312_v3 }
 0x6e5   :  { %v3463_v51 = vmul.f32 -1.442695, %v5232_v47 }
 0x6e6   :  { %v3464_v37 = vmul.f32 -1.442695, %v5233_v39  ;;  %v3465_v5 = vmul.f32 -1.442695, %v5249_v18 }
 0x6e7   :  { %5449 = vpow2.f32 %v3463_v51 }
 0x6e8   :  { %5451 = vpow2.f32 %v3464_v37 }
 0x6e9   :  { %5453 = vpow2.f32 %v3465_v5 }
 0x6ea   :  { %5455 = vtanh.f32 %v5248_v23  ;;  %v8316_v23 = vld [vmem:[#allocation7_spill] sm:$0xff] }
 0x6ee   :  { %v5448_v25 = vpop.eup %5447 }
 0x6ef   :  { %v2314_v9 = vmul.f32 %v5448_v25, %v5446_v58 }
 0x6f1   :  { %v5450_v44 = vpop.eup %5449  ;;  %2549 = vmatprep.mubr.f32.mxu0 %v2314_v9  ;;  %2620 = vmatprep.mubr.f32.mxu1 %v2314_v9  ;;  %v8317_v9 = vld [vmem:[#allocation8_spill] sm:$0xff] }
 0x6f2   :  { %v5452_v61 = vpop.eup %5451  ;;  %v2464_v43 = vadd.f32 1.0, %v5450_v44  ;;  %v8318_v44 = vld [vmem:[#allocation9_spill] sm:$0xff] }
 0x6f3   :  { %v2470_v29 = vadd.f32 1.0, %v5452_v61  ;;  %v5454_v47 = vpop.eup %5453  ;;  %v8319_v61 = vld [vmem:[#allocation10_spill] sm:$0xff] }
 0x6f4   :  { %5457 = vrcp.f32 %v2464_v43  ;;  %v5456_v39 = vpop.eup %5455  ;;  %v2477_v3 = vadd.f32 1.0, %v5454_v47  ;;  %v8314_v43 = vld [vmem:[#allocation5_spill] sm:$0xff]  ;;  %v8321_v47 = vld [vmem:[#allocation12_spill] sm:$0xff] }
 0x6f5   :  { %5459 = vrcp.f32 %v2470_v29  ;;  %v8320_v29 = vld [vmem:[#allocation11_spill] sm:$0xff] }
 0x6f6   :  { %5461 = vrcp.f32 %v2477_v3  ;;  %v8315_v3 = vld [vmem:[#allocation6_spill] sm:$0xff] }
 0x6fe   :  { %v5458_v51 = vpop.eup %5457 }
 0x6ff   :  { %v5460_v34 = vpop.eup %5459  ;;  %v2481_v37 = vmul.f32 %v5458_v51, %v5456_v39  ;;  %v8322_v39 = vld [vmem:[#allocation13_spill] sm:$0xff]  ;;  %v8323_v51 = vld [vmem:[#allocation14_spill] sm:$0xff] }
 0x700   :  { %v2480_v18 = vmul.f32 %v5460_v34, %v7404_v15  ;;  %v5462_v58 = vpop.eup %5461  ;;  %v8313_v15 = vld [vmem:[#allocation4_spill] sm:$0xff]  ;;  %v8324_v34 = vld [vmem:[#allocation15_spill] sm:$0xff] }
 0x702   :  { %v7518_v12 = vadd.f32 %v2481_v37, %v2480_v18  ;;  %v8325_v37 = vld [vmem:[#allocation16_spill] sm:$0xff]  ;;  %v8326_v18 = vld [vmem:[#allocation17_spill] sm:$0xff] }
 0x704   :  { %5463 = vtanh.f32 %v7518_v12 }
 0x70e   :  { %v5464_v25 = vpop.eup %5463 }
 0x70f   :  { %v2484_v5 = vmul.f32 %v5464_v25, %v5462_v58  ;;  %v8327_v58 = vld [vmem:[#allocation18_spill] sm:$0xff]  ;;  %v8328_v25 = vld [vmem:[#allocation19_spill] sm:$0xff] }
 0x711   :  { %2550 = vmatmul.mubr.f32.vlgmr.msra.gmra.mrb[26].mxu0 %v2484_v5  ;;  %2621 = vmatmul.mubr.f32.vlgmr.msra.gmra.mrb[26].mxu1 %v2484_v5 }
 0x712   :  { %4817 = vmatpush1.bf16.msra.mxu0 %v6021_v14  ;;  %4849 = vmatpush1.bf16.msra.mxu1 %v6030_v17 }
 0x713   :  { %4819 = vmatprep.subr.bf16.mxu0 %v6042_v21  ;;  %4851 = vmatprep.subr.bf16.mxu1 %v6050_v24 }
 0x714   :  { %2715 = vmatprep.mubr.f32.mxu0 %v8010_v4  ;;  %2786 = vmatprep.mubr.f32.mxu1 %v8010_v4 }
 0x716   :  { %4821 = vmatpush1.bf16.msra.mxu0 %v6062_v28  ;;  %4853 = vmatpush1.bf16.msra.mxu1 %v6071_v31 }
 0x717   :  { %4823 = vmatprep.subr.bf16.mxu0 %v6083_v35  ;;  %4855 = vmatprep.subr.bf16.mxu1 %v6092_v38 }
 0x71a   :  { %4825 = vmatpush1.bf16.msra.mxu0 %v6104_v42  ;;  %4857 = vmatpush1.bf16.msra.mxu1 %v6113_v45 }
 0x71b   :  { %4827 = vmatprep.subr.bf16.mxu0 %v6125_v49  ;;  %4859 = vmatprep.subr.bf16.mxu1 %v6134_v52 }
 0x71e   :  { %4829 = vmatpush1.bf16.msra.mxu0 %v6146_v56  ;;  %4861 = vmatpush1.bf16.msra.mxu1 %v6155_v59 }
 0x71f   :  { %4831 = vmatprep.subr.bf16.mxu0 %v6167_v63  ;;  %4863 = vmatprep.subr.bf16.mxu1 %v6176_v2 }
 0x722   :  { %4833 = vmatpush1.bf16.msra.mxu0 %v6188_v7  ;;  %4865 = vmatpush1.bf16.msra.mxu1 %v6197_v11 }
 0x723   :  { %4835 = vmatprep.subr.bf16.mxu0 %v6209_v16  ;;  %4867 = vmatprep.subr.bf16.mxu1 %v6218_v20 }
 0x726   :  { %4837 = vmatpush1.bf16.msra.mxu0 %v6230_v26  ;;  %4869 = vmatpush1.bf16.msra.mxu1 %v6239_v30 }
 0x727   :  { %4839 = vmatprep.subr.bf16.mxu0 %v6251_v36  ;;  %4871 = vmatprep.subr.bf16.mxu1 %v6260_v40 }
 0x72a   :  { %4841 = vmatpush1.bf16.msra.mxu0 %v6272_v46  ;;  %4873 = vmatpush1.bf16.msra.mxu1 %v6281_v50 }
 0x72b   :  { %4843 = vmatprep.subr.bf16.mxu0 %v6293_v55  ;;  %4875 = vmatprep.subr.bf16.mxu1 %v6302_v60 }
 0x72e   :  { %4845 = vmatpush1.bf16.msra.mxu0 %v6314_v1  ;;  %4877 = vmatpush1.bf16.msra.mxu1 %v6323_v6 }
 0x72f   :  { %4879 = vmatprep.subr.bf16.mxu0 %v6335_v13  ;;  %4943 = vmatprep.subr.bf16.mxu1 %v6347_v22 }
 0x731   :  { %2716 = vmatmul.mubr.f32.vlgmr.msra.gmra.mrb[12].mxu0 %v2484_v5  ;;  %2787 = vmatmul.mubr.f32.vlgmr.msra.gmra.mrb[12].mxu1 %v2484_v5  ;;  %v8329_v5 = vld [vmem:[#allocation20_spill] sm:$0xff] }
 0x732   :  { %4881 = vmatpush1.bf16.msra.mxu0 %v6356_v27  ;;  %4945 = vmatpush1.bf16.msra.mxu1 %v6360_v32 }
 0x733   :  { %4883 = vmatprep.subr.bf16.mxu0 %v6362_v33  ;;  %4947 = vmatprep.subr.bf16.mxu1 %v6375_v41 }
 0x736   :  { %4885 = vmatpush1.bf16.msra.mxu0 %v6396_v53  ;;  %4949 = vmatpush1.bf16.msra.mxu1 %v6400_v54 }
 0x737   :  { %4887 = vmatprep.subr.bf16.mxu0 %v6402_v57  ;;  %4951 = vmatprep.subr.bf16.mxu1 %v6414_v0 }
 0x73a   :  { %4889 = vmatpush1.bf16.msra.mxu0 %v8313_v15  ;;  %4953 = vmatpush1.bf16.msra.mxu1 %v8314_v43 }
 0x73b   :  { %4891 = vmatprep.subr.bf16.mxu0 %v8315_v3  ;;  %4955 = vmatprep.subr.bf16.mxu1 %v8316_v23 }
 0x73e   :  { %4893 = vmatpush1.bf16.msra.mxu0 %v8317_v9  ;;  %4957 = vmatpush1.bf16.msra.mxu1 %v8318_v44  ;;  %v8369_v44 = vld [vmem:[#allocation58_spill] sm:$0xff] }
 0x73f   :  { %4895 = vmatprep.subr.bf16.mxu0 %v8319_v61  ;;  %4959 = vmatprep.subr.bf16.mxu1 %v8320_v29  ;;  %v8330_v61 = vld [vmem:[#allocation21_spill] sm:$0xff]  ;;  %v8331_v29 = vld [vmem:[#allocation22_spill] sm:$0xff] }
 0x742   :  { %4897 = vmatpush1.bf16.msra.mxu0 %v8321_v47  ;;  %4961 = vmatpush1.bf16.msra.mxu1 %v8322_v39  ;;  %v8332_v47 = vld [vmem:[#allocation23_spill] sm:$0xff]  ;;  %v8333_v39 = vld [vmem:[#allocation24_spill] sm:$0xff] }
 0x743   :  { %4899 = vmatprep.subr.bf16.mxu0 %v8323_v51  ;;  %4963 = vmatprep.subr.bf16.mxu1 %v8324_v34  ;;  %v8334_v51 = vld [vmem:[#allocation25_spill] sm:$0xff]  ;;  %v8335_v34 = vld [vmem:[#allocation26_spill] sm:$0xff] }
 0x746   :  { %4901 = vmatpush1.bf16.msra.mxu0 %v8325_v37  ;;  %4965 = vmatpush1.bf16.msra.mxu1 %v8326_v18  ;;  %v8336_v37 = vld [vmem:[#allocation27_spill] sm:$0xff]  ;;  %v8337_v18 = vld [vmem:[#allocation28_spill] sm:$0xff] }
 0x747   :  { %4903 = vmatprep.subr.bf16.mxu0 %v8327_v58  ;;  %4967 = vmatprep.subr.bf16.mxu1 %v8328_v25  ;;  %v8338_v58 = vld [vmem:[#allocation29_spill] sm:$0xff]  ;;  %v8339_v25 = vld [vmem:[#allocation30_spill] sm:$0xff] }
 0x74a   :  { %4905 = vmatpush1.bf16.msra.mxu0 %v8329_v5  ;;  %4969 = vmatpush1.bf16.msra.mxu1 %v8330_v61  ;;  %v8340_v5 = vld [vmem:[#allocation31_spill] sm:$0xff]  ;;  %v8341_v61 = vld [vmem:[#allocation32_spill] sm:$0xff] }
 0x74b   :  { %4907 = vmatprep.subr.bf16.mxu0 %v8331_v29  ;;  %4971 = vmatprep.subr.bf16.mxu1 %v8332_v47  ;;  %v8342_v29 = vld [vmem:[#allocation33_spill] sm:$0xff]  ;;  %v8343_v47 = vld [vmem:[#allocation34_spill] sm:$0xff] }
 0x74e   :  { %4909 = vmatpush1.bf16.msra.mxu0 %v8333_v39  ;;  %4973 = vmatpush1.bf16.msra.mxu1 %v8334_v51  ;;  %v8344_v39 = vld [vmem:[#allocation35_spill] sm:$0xff]  ;;  %v8345_v51 = vld [vmem:[#allocation36_spill] sm:$0xff] }
 0x74f   :  { %4911 = vmatprep.subr.bf16.mxu0 %v8335_v34  ;;  %4975 = vmatprep.subr.bf16.mxu1 %v8336_v37  ;;  %v8346_v34 = vld [vmem:[#allocation37_spill] sm:$0xff]  ;;  %v8347_v37 = vld [vmem:[#allocation38_spill] sm:$0xff] }
 0x752   :  { %4913 = vmatpush1.bf16.msra.mxu0 %v8337_v18  ;;  %4977 = vmatpush1.bf16.msra.mxu1 %v8338_v58  ;;  %v8348_v18 = vld [vmem:[#allocation39_spill] sm:$0xff]  ;;  %v8349_v58 = vld [vmem:[#allocation40_spill] sm:$0xff] }
 0x753   :  { %4915 = vmatprep.subr.bf16.mxu0 %v8339_v25  ;;  %4979 = vmatprep.subr.bf16.mxu1 %v8340_v5  ;;  %v8350_v25 = vld [vmem:[#allocation41_spill] sm:$0xff]  ;;  %v8351_v5 = vld [vmem:[#allocation42_spill] sm:$0xff] }
 0x756   :  { %4917 = vmatpush1.bf16.msra.mxu0 %v8341_v61  ;;  %4981 = vmatpush1.bf16.msra.mxu1 %v8342_v29  ;;  %v8352_v61 = vld [vmem:[#allocation43_spill] sm:$0xff]  ;;  %v8353_v29 = vld [vmem:[#allocation44_spill] sm:$0xff] }
 0x757   :  { %4919 = vmatprep.subr.bf16.mxu0 %v8343_v47  ;;  %4983 = vmatprep.subr.bf16.mxu1 %v8344_v39  ;;  %v8354_v47 = vld [vmem:[#allocation45_spill] sm:$0xff]  ;;  %v8355_v39 = vld [vmem:[#allocation46_spill] sm:$0xff] }
 0x75a   :  { %4921 = vmatpush1.bf16.msra.mxu0 %v8345_v51  ;;  %4985 = vmatpush1.bf16.msra.mxu1 %v8346_v34  ;;  %v8356_v51 = vld [vmem:[#allocation47_spill] sm:$0xff]  ;;  %v8357_v34 = vld [vmem:[#allocation48_spill] sm:$0xff] }
 0x75b   :  { %4923 = vmatprep.subr.bf16.mxu0 %v8347_v37  ;;  %4987 = vmatprep.subr.bf16.mxu1 %v8348_v18  ;;  %v8358_v37 = vld [vmem:[#allocation49_spill] sm:$0xff]  ;;  %v8359_v18 = vld [vmem:[#allocation50_spill] sm:$0xff] }
 0x75e   :  { %4925 = vmatpush1.bf16.msra.mxu0 %v8349_v58  ;;  %4989 = vmatpush1.bf16.msra.mxu1 %v8350_v25  ;;  %v8360_v58 = vld [vmem:[#allocation51_spill] sm:$0xff]  ;;  %v8361_v25 = vld [vmem:[#allocation52_spill] sm:$0xff] }
 0x75f   :  { %4927 = vmatprep.subr.bf16.mxu0 %v8351_v5  ;;  %4991 = vmatprep.subr.bf16.mxu1 %v8352_v61  ;;  %v8362_v5 = vld [vmem:[#allocation53_spill] sm:$0xff]  ;;  %v8363_v61 = vld [vmem:[#allocation54_spill] sm:$0xff] }
 0x762   :  { %4929 = vmatpush1.bf16.msra.mxu0 %v8353_v29  ;;  %4993 = vmatpush1.bf16.msra.mxu1 %v8354_v47  ;;  %v8364_v29 = vld [vmem:[#allocation55_spill] sm:$0xff]  ;;  %v8365_v47 = vld [vmem:[#allocation56_spill] sm:$0xff] }
 0x763   :  { %4931 = vmatprep.subr.bf16.mxu0 %v8355_v39  ;;  %4995 = vmatprep.subr.bf16.mxu1 %v8356_v51  ;;  %v8366_v39 = vld [vmem:[#allocation57_spill] sm:$0xff]  ;;  %v8367_v51 = vld [vmem:[#allocation2_spill] sm:$0xff] }
 0x766   :  { %4933 = vmatpush1.bf16.msra.mxu0 %v8357_v34  ;;  %4997 = vmatpush1.bf16.msra.mxu1 %v8358_v37  ;;  %v8368_v34 = vld [vmem:[#allocation3_spill] sm:$0xff] }
 0x767   :  { %4935 = vmatprep.subr.bf16.mxu0 %v8359_v18  ;;  %4999 = vmatprep.subr.bf16.mxu1 %v8360_v58 }
 0x76a   :  { %4937 = vmatpush1.bf16.msra.mxu0 %v8361_v25  ;;  %5001 = vmatpush1.bf16.msra.mxu1 %v8362_v5 }
 0x76b   :  { %4939 = vmatprep.subr.bf16.mxu0 %v8363_v61  ;;  %5003 = vmatprep.subr.bf16.mxu1 %v8364_v29  ;;  %v8370_v29 = vld [vmem:[#allocation63_spill] sm:$0xff] }
 0x76e   :  { %4941 = vmatpush1.bf16.msra.mxu0 %v8365_v47  ;;  %5005 = vmatpush1.bf16.msra.mxu1 %v8366_v39 }
 0x76f   :  { %5007 = vmatprep.subr.bf16.mxu0 %v8367_v51  ;;  %5039 = vmatprep.subr.bf16.mxu1 %v8368_v34 }
 0x7e4   :  { %v2551_v37 = vpop.f32.mrb[26].mxu0  ;;  %v2622_v18 = vpop.f32.mrb[26].mxu1 }
 0x7e5   :  { %v2552_v58 = vadd.f32 %v2551_v37, %v8369_v44  ;;  %v2553_v9 = vpop.f32.mrb[27].mxu0  ;;  %v2624_v25 = vpop.f32.mrb[27].mxu1  ;;  %v2623_v39 = vadd.f32 %v2622_v18, %v8130_v62  ;;  %v8371_v18 = vld [vmem:[#allocation59_spill] sm:$0xff] }
 0x7e6   :  { %v2554_v5 = vadd.f32 %v2553_v9, %v8128_v10  ;;  %v2625_v47 = vadd.f32 %v2624_v25, %v8370_v29 }
 0x7e7   :  { %v3466_v23 = vmul.f32 -1.442695, %v2552_v58 }
 0x7e8   :  { %v3467_v61 = vmul.f32 -1.442695, %v2554_v5  ;;  %v3468_v3 = vmul.f32 -1.442695, %v2625_v47 }
 0x7e9   :  { %5465 = vpow2.f32 %v3466_v23 }
 0x7ea   :  { %5467 = vpow2.f32 %v3467_v61 }
 0x7eb   :  { %5469 = vpow2.f32 %v3468_v3 }
 0x7ec   :  { %5471 = vtanh.f32 %v2623_v39 }
 0x7f3   :  { %v5466_v51 = vpop.eup %5465 }
 0x7f4   :  { %v5468_v43 = vpop.eup %5467  ;;  %v2630_v34 = vadd.f32 1.0, %v5466_v51 }
 0x7f5   :  { %v2636_v15 = vadd.f32 1.0, %v5468_v43  ;;  %v5470_v37 = vpop.eup %5469 }
 0x7f6   :  { %5473 = vrcp.f32 %v2630_v34  ;;  %v5472_v44 = vpop.eup %5471  ;;  %v2643_v23 = vadd.f32 1.0, %v5470_v37 }
 0x7f7   :  { %5475 = vrcp.f32 %v2636_v15 }
 0x7f8   :  { %5477 = vrcp.f32 %v2643_v23 }
 0x800   :  { %v5474_v9 = vpop.eup %5473 }
 0x801   :  { %v5476_v58 = vpop.eup %5475  ;;  %v2647_v5 = vmul.f32 %v5474_v9, %v5472_v44  ;;  %v8372_v44 = vld [vmem:[#allocation61_spill] sm:$0xff] }
 0x802   :  { %v2646_v61 = vmul.f32 %v5476_v58, %v7510_v48  ;;  %v5478_v48 = vpop.eup %5477 }
 0x804   :  { %v2717_v25 = vpop.f32.mrb[12].mxu0  ;;  %v2788_v47 = vpop.f32.mrb[12].mxu1  ;;  %v7624_v29 = vadd.f32 %v2647_v5, %v2646_v61 }
 0x805   :  { %v5234_v51 = vadd.f32 %v2717_v25, %v8371_v18  ;;  %v2719_v3 = vpop.f32.mrb[13].mxu0  ;;  %v2790_v39 = vpop.f32.mrb[13].mxu1  ;;  %v5250_v5 = vadd.f32 %v2788_v47, %v6927_v8 }
 0x806   :  { %v5235_v43 = vadd.f32 %v2719_v3, %v8071_v19  ;;  %5479 = vtanh.f32 %v7624_v29  ;;  %v5251_v37 = vadd.f32 %v2790_v39, %v8372_v44 }
 0x807   :  { %v3469_v15 = vmul.f32 -1.442695, %v5234_v51 }
 0x808   :  { %v3470_v34 = vmul.f32 -1.442695, %v5235_v43  ;;  %v3471_v58 = vmul.f32 -1.442695, %v5251_v37 }
 0x809   :  { %5481 = vpow2.f32 %v3469_v15 }
 0x80a   :  { %5483 = vpow2.f32 %v3470_v34 }
 0x80b   :  { %5485 = vpow2.f32 %v3471_v58 }
 0x80c   :  { %5487 = vtanh.f32 %v5250_v5  ;;  %v8416_v5 = vld [vmem:[#allocation47_spill] sm:$0xff] }
 0x810   :  { %v5480_v9 = vpop.eup %5479 }
 0x811   :  { %v2650_v23 = vmul.f32 %v5480_v9, %v5478_v48 }
 0x813   :  { %v5482_v61 = vpop.eup %5481  ;;  %2885 = vmatprep.mubr.f32.mxu0 %v2650_v23  ;;  %2956 = vmatprep.mubr.f32.mxu1 %v2650_v23  ;;  %v8417_v23 = vld [vmem:[#allocation48_spill] sm:$0xff] }
 0x814   :  { %v5484_v25 = vpop.eup %5483  ;;  %v2800_v18 = vadd.f32 1.0, %v5482_v61  ;;  %v8418_v61 = vld [vmem:[#allocation49_spill] sm:$0xff] }
 0x815   :  { %v2806_v3 = vadd.f32 1.0, %v5484_v25  ;;  %v5486_v51 = vpop.eup %5485  ;;  %v8419_v25 = vld [vmem:[#allocation50_spill] sm:$0xff] }
 0x816   :  { %5489 = vrcp.f32 %v2800_v18  ;;  %v5488_v43 = vpop.eup %5487  ;;  %v2813_v44 = vadd.f32 1.0, %v5486_v51  ;;  %v8414_v18 = vld [vmem:[#allocation45_spill] sm:$0xff]  ;;  %v8421_v51 = vld [vmem:[#allocation52_spill] sm:$0xff] }
 0x817   :  { %5491 = vrcp.f32 %v2806_v3  ;;  %v8420_v3 = vld [vmem:[#allocation51_spill] sm:$0xff] }
 0x818   :  { %5493 = vrcp.f32 %v2813_v44  ;;  %v8415_v44 = vld [vmem:[#allocation46_spill] sm:$0xff] }
 0x820   :  { %v5490_v15 = vpop.eup %5489 }
 0x821   :  { %v5492_v39 = vpop.eup %5491  ;;  %v2817_v34 = vmul.f32 %v5490_v15, %v5488_v43  ;;  %v8422_v43 = vld [vmem:[#allocation53_spill] sm:$0xff]  ;;  %v8423_v15 = vld [vmem:[#allocation54_spill] sm:$0xff] }
 0x822   :  { %v2816_v37 = vmul.f32 %v5492_v39, %v7518_v12  ;;  %v5494_v48 = vpop.eup %5493  ;;  %v8413_v12 = vld [vmem:[#allocation44_spill] sm:$0xff]  ;;  %v8424_v39 = vld [vmem:[#allocation55_spill] sm:$0xff] }
 0x824   :  { %v7632_v47 = vadd.f32 %v2817_v34, %v2816_v37  ;;  %v8425_v34 = vld [vmem:[#allocation56_spill] sm:$0xff]  ;;  %v8426_v37 = vld [vmem:[#allocation57_spill] sm:$0xff] }
 0x826   :  { %5495 = vtanh.f32 %v7632_v47 }
 0x830   :  { %v5496_v9 = vpop.eup %5495 }
 0x831   :  { %v2820_v58 = vmul.f32 %v5496_v9, %v5494_v48 }
 0x833   :  { %2886 = vmatmul.mubr.f32.vlgmr.msra.gmra.mrb[28].mxu0 %v2820_v58  ;;  %2957 = vmatmul.mubr.f32.vlgmr.msra.gmra.mrb[28].mxu1 %v2820_v58 }
 0x834   :  { %5009 = vmatpush1.bf16.msra.mxu0 %v6021_v14  ;;  %5041 = vmatpush1.bf16.msra.mxu1 %v6030_v17  ;;  %v8373_v14 = vld [vmem:[#allocation4_spill] sm:$0xff]  ;;  %v8374_v17 = vld [vmem:[#allocation5_spill] sm:$0xff] }
 0x835   :  { %5011 = vmatprep.subr.bf16.mxu0 %v6042_v21  ;;  %5043 = vmatprep.subr.bf16.mxu1 %v6050_v24  ;;  %v8375_v21 = vld [vmem:[#allocation6_spill] sm:$0xff]  ;;  %v8376_v24 = vld [vmem:[#allocation7_spill] sm:$0xff] }
 0x836   :  { %3051 = vmatprep.mubr.f32.mxu0 %v8010_v4  ;;  %3122 = vmatprep.mubr.f32.mxu1 %v8010_v4 }
 0x838   :  { %5013 = vmatpush1.bf16.msra.mxu0 %v6062_v28  ;;  %5045 = vmatpush1.bf16.msra.mxu1 %v6071_v31  ;;  %v8377_v28 = vld [vmem:[#allocation8_spill] sm:$0xff]  ;;  %v8378_v31 = vld [vmem:[#allocation9_spill] sm:$0xff] }
 0x839   :  { %5015 = vmatprep.subr.bf16.mxu0 %v6083_v35  ;;  %5047 = vmatprep.subr.bf16.mxu1 %v6092_v38  ;;  %v8379_v35 = vld [vmem:[#allocation10_spill] sm:$0xff]  ;;  %v8380_v38 = vld [vmem:[#allocation11_spill] sm:$0xff] }
 0x83c   :  { %5017 = vmatpush1.bf16.msra.mxu0 %v6104_v42  ;;  %5049 = vmatpush1.bf16.msra.mxu1 %v6113_v45  ;;  %v8381_v42 = vld [vmem:[#allocation12_spill] sm:$0xff]  ;;  %v8382_v45 = vld [vmem:[#allocation13_spill] sm:$0xff] }
 0x83d   :  { %5019 = vmatprep.subr.bf16.mxu0 %v6125_v49  ;;  %5051 = vmatprep.subr.bf16.mxu1 %v6134_v52  ;;  %v8383_v49 = vld [vmem:[#allocation14_spill] sm:$0xff]  ;;  %v8384_v52 = vld [vmem:[#allocation15_spill] sm:$0xff] }
 0x840   :  { %5021 = vmatpush1.bf16.msra.mxu0 %v6146_v56  ;;  %5053 = vmatpush1.bf16.msra.mxu1 %v6155_v59  ;;  %v8385_v56 = vld [vmem:[#allocation16_spill] sm:$0xff]  ;;  %v8386_v59 = vld [vmem:[#allocation17_spill] sm:$0xff] }
 0x841   :  { %5023 = vmatprep.subr.bf16.mxu0 %v6167_v63  ;;  %5055 = vmatprep.subr.bf16.mxu1 %v6176_v2  ;;  %v8387_v63 = vld [vmem:[#allocation18_spill] sm:$0xff]  ;;  %v8388_v2 = vld [vmem:[#allocation19_spill] sm:$0xff] }
 0x844   :  { %5025 = vmatpush1.bf16.msra.mxu0 %v6188_v7  ;;  %5057 = vmatpush1.bf16.msra.mxu1 %v6197_v11  ;;  %v8389_v7 = vld [vmem:[#allocation20_spill] sm:$0xff]  ;;  %v8390_v11 = vld [vmem:[#allocation21_spill] sm:$0xff] }
 0x845   :  { %5027 = vmatprep.subr.bf16.mxu0 %v6209_v16  ;;  %5059 = vmatprep.subr.bf16.mxu1 %v6218_v20  ;;  %v8391_v16 = vld [vmem:[#allocation22_spill] sm:$0xff]  ;;  %v8392_v20 = vld [vmem:[#allocation23_spill] sm:$0xff] }
 0x848   :  { %5029 = vmatpush1.bf16.msra.mxu0 %v6230_v26  ;;  %5061 = vmatpush1.bf16.msra.mxu1 %v6239_v30  ;;  %v8393_v26 = vld [vmem:[#allocation24_spill] sm:$0xff]  ;;  %v8394_v30 = vld [vmem:[#allocation25_spill] sm:$0xff] }
 0x849   :  { %5031 = vmatprep.subr.bf16.mxu0 %v6251_v36  ;;  %5063 = vmatprep.subr.bf16.mxu1 %v6260_v40  ;;  %v8395_v36 = vld [vmem:[#allocation26_spill] sm:$0xff]  ;;  %v8396_v40 = vld [vmem:[#allocation27_spill] sm:$0xff] }
 0x84c   :  { %5033 = vmatpush1.bf16.msra.mxu0 %v6272_v46  ;;  %5065 = vmatpush1.bf16.msra.mxu1 %v6281_v50  ;;  %v8397_v46 = vld [vmem:[#allocation28_spill] sm:$0xff]  ;;  %v8398_v50 = vld [vmem:[#allocation29_spill] sm:$0xff] }
 0x84d   :  { %5035 = vmatprep.subr.bf16.mxu0 %v6293_v55  ;;  %5067 = vmatprep.subr.bf16.mxu1 %v6302_v60  ;;  %v8399_v55 = vld [vmem:[#allocation30_spill] sm:$0xff]  ;;  %v8400_v60 = vld [vmem:[#allocation31_spill] sm:$0xff] }
 0x850   :  { %5037 = vmatpush1.bf16.msra.mxu0 %v6314_v1  ;;  %5069 = vmatpush1.bf16.msra.mxu1 %v6323_v6  ;;  %v8401_v1 = vld [vmem:[#allocation32_spill] sm:$0xff]  ;;  %v8402_v6 = vld [vmem:[#allocation33_spill] sm:$0xff] }
 0x851   :  { %5071 = vmatprep.subr.bf16.mxu0 %v6335_v13  ;;  %5135 = vmatprep.subr.bf16.mxu1 %v6347_v22  ;;  %v8403_v13 = vld [vmem:[#allocation34_spill] sm:$0xff]  ;;  %v8404_v22 = vld [vmem:[#allocation35_spill] sm:$0xff] }
 0x853   :  { %3052 = vmatmul.mubr.f32.vlgmr.msra.gmra.mrb[14].mxu0 %v2820_v58  ;;  %3123 = vmatmul.mubr.f32.vlgmr.msra.gmra.mrb[14].mxu1 %v2820_v58  ;;  %v8427_v58 = vld [vmem:[#allocation58_spill] sm:$0xff] }
 0x854   :  { %5073 = vmatpush1.bf16.msra.mxu0 %v6356_v27  ;;  %5137 = vmatpush1.bf16.msra.mxu1 %v6360_v32  ;;  %v8405_v27 = vld [vmem:[#allocation36_spill] sm:$0xff]  ;;  %v8406_v32 = vld [vmem:[#allocation37_spill] sm:$0xff] }
 0x855   :  { %5075 = vmatprep.subr.bf16.mxu0 %v6362_v33  ;;  %5139 = vmatprep.subr.bf16.mxu1 %v6375_v41  ;;  %v8407_v33 = vld [vmem:[#allocation38_spill] sm:$0xff]  ;;  %v8408_v41 = vld [vmem:[#allocation39_spill] sm:$0xff] }
 0x858   :  { %5077 = vmatpush1.bf16.msra.mxu0 %v6396_v53  ;;  %5141 = vmatpush1.bf16.msra.mxu1 %v6400_v54  ;;  %v8409_v53 = vld [vmem:[#allocation40_spill] sm:$0xff]  ;;  %v8410_v54 = vld [vmem:[#allocation41_spill] sm:$0xff] }
 0x859   :  { %5079 = vmatprep.subr.bf16.mxu0 %v6402_v57  ;;  %5143 = vmatprep.subr.bf16.mxu1 %v6414_v0  ;;  %v8411_v57 = vld [vmem:[#allocation42_spill] sm:$0xff]  ;;  %v8412_v0 = vld [vmem:[#allocation43_spill] sm:$0xff] }
 0x85c   :  { %5081 = vmatpush1.bf16.msra.mxu0 %v8373_v14  ;;  %5145 = vmatpush1.bf16.msra.mxu1 %v8374_v17 }
 0x85d   :  { %5083 = vmatprep.subr.bf16.mxu0 %v8375_v21  ;;  %5147 = vmatprep.subr.bf16.mxu1 %v8376_v24 }
 0x860   :  { %5085 = vmatpush1.bf16.msra.mxu0 %v8377_v28  ;;  %5149 = vmatpush1.bf16.msra.mxu1 %v8378_v31 }
 0x861   :  { %5087 = vmatprep.subr.bf16.mxu0 %v8379_v35  ;;  %5151 = vmatprep.subr.bf16.mxu1 %v8380_v38  ;;  %v8428_v35 = vld [vmem:[#allocation63_spill] sm:$0xff] }
 0x864   :  { %5089 = vmatpush1.bf16.msra.mxu0 %v8381_v42  ;;  %5153 = vmatpush1.bf16.msra.mxu1 %v8382_v45 }
 0x865   :  { %5091 = vmatprep.subr.bf16.mxu0 %v8383_v49  ;;  %5155 = vmatprep.subr.bf16.mxu1 %v8384_v52 }
 0x868   :  { %5093 = vmatpush1.bf16.msra.mxu0 %v8385_v56  ;;  %5157 = vmatpush1.bf16.msra.mxu1 %v8386_v59 }
 0x869   :  { %5095 = vmatprep.subr.bf16.mxu0 %v8387_v63  ;;  %5159 = vmatprep.subr.bf16.mxu1 %v8388_v2 }
 0x86c   :  { %5097 = vmatpush1.bf16.msra.mxu0 %v8389_v7  ;;  %5161 = vmatpush1.bf16.msra.mxu1 %v8390_v11 }
 0x86d   :  { %5099 = vmatprep.subr.bf16.mxu0 %v8391_v16  ;;  %5163 = vmatprep.subr.bf16.mxu1 %v8392_v20 }
 0x870   :  { %5101 = vmatpush1.bf16.msra.mxu0 %v8393_v26  ;;  %5165 = vmatpush1.bf16.msra.mxu1 %v8394_v30 }
 0x871   :  { %5103 = vmatprep.subr.bf16.mxu0 %v8395_v36  ;;  %5167 = vmatprep.subr.bf16.mxu1 %v8396_v40 }
 0x874   :  { %5105 = vmatpush1.bf16.msra.mxu0 %v8397_v46  ;;  %5169 = vmatpush1.bf16.msra.mxu1 %v8398_v50  ;;  %v8429_v46 = vld [vmem:[#allocation59_spill] sm:$0xff] }
 0x875   :  { %5107 = vmatprep.subr.bf16.mxu0 %v8399_v55  ;;  %5171 = vmatprep.subr.bf16.mxu1 %v8400_v60 }
 0x878   :  { %5109 = vmatpush1.bf16.msra.mxu0 %v8401_v1  ;;  %5173 = vmatpush1.bf16.msra.mxu1 %v8402_v6 }
 0x879   :  { %5111 = vmatprep.subr.bf16.mxu0 %v8403_v13  ;;  %5175 = vmatprep.subr.bf16.mxu1 %v8404_v22  ;;  %v8430_v22 = vld [vmem:[#allocation61_spill] sm:$0xff] }
 0x87c   :  { %5113 = vmatpush1.bf16.msra.mxu0 %v8405_v27  ;;  %5177 = vmatpush1.bf16.msra.mxu1 %v8406_v32 }
 0x87d   :  { %5115 = vmatprep.subr.bf16.mxu0 %v8407_v33  ;;  %5179 = vmatprep.subr.bf16.mxu1 %v8408_v41 }
 0x880   :  { %5117 = vmatpush1.bf16.msra.mxu0 %v8409_v53  ;;  %5181 = vmatpush1.bf16.msra.mxu1 %v8410_v54 }
 0x881   :  { %5119 = vmatprep.subr.bf16.mxu0 %v8411_v57  ;;  %5183 = vmatprep.subr.bf16.mxu1 %v8412_v0 }
 0x884   :  { %5121 = vmatpush1.bf16.msra.mxu0 %v8413_v12  ;;  %5185 = vmatpush1.bf16.msra.mxu1 %v8414_v18 }
 0x885   :  { %5123 = vmatprep.subr.bf16.mxu0 %v8415_v44  ;;  %5187 = vmatprep.subr.bf16.mxu1 %v8416_v5 }
 0x888   :  { %5125 = vmatpush1.bf16.msra.mxu0 %v8417_v23  ;;  %5189 = vmatpush1.bf16.msra.mxu1 %v8418_v61 }
 0x889   :  { %5127 = vmatprep.subr.bf16.mxu0 %v8419_v25  ;;  %5191 = vmatprep.subr.bf16.mxu1 %v8420_v3 }
 0x88c   :  { %5129 = vmatpush1.bf16.msra.mxu0 %v8421_v51  ;;  %5193 = vmatpush1.bf16.msra.mxu1 %v8422_v43 }
 0x88d   :  { %5131 = vmatprep.subr.bf16.mxu0 %v8423_v15  ;;  %5195 = vmatprep.subr.bf16.mxu1 %v8424_v39  ;;  %v3323_v15 = vld [vmem:[%s7813_s6] sm:$0xff]  ;;  %v3324_v39 = vld [vmem:[%s7813_s6 + $0x8] sm:$0xff] }
 0x890   :  { %5133 = vmatpush1.bf16.msra.mxu0 %v8425_v34  ;;  %5197 = vmatpush1.bf16.msra.mxu1 %v8426_v37  ;;  %v5199_v34 = vpack.c.bf16 %v3324_v39, %v3323_v15  ;;  %v5550_v37 = vmov 0.0|0.0  }
 0x891   :  { %5198 = vmatprep.subr.bf16.mxu0 %v5550_v37 }
 0x906   :  { %v2887_v48 = vpop.f32.mrb[28].mxu0  ;;  %v2958_v9 = vpop.f32.mrb[28].mxu1 }
 0x907   :  { %v2888_v14 = vadd.f32 %v2887_v48, %v8427_v58  ;;  %v2889_v17 = vpop.f32.mrb[29].mxu0  ;;  %v2960_v21 = vpop.f32.mrb[29].mxu1  ;;  %v2959_v45 = vadd.f32 %v2958_v9, %v8130_v62  ;;  %v3326_v48 = vld [vmem:[%s7813_s6 + $0x18] sm:$0xff] }
 0x908   :  { %v2890_v24 = vadd.f32 %v2889_v17, %v8128_v10  ;;  %v2961_v38 = vadd.f32 %v2960_v21, %v8428_v35  ;;  %v3328_v17 = vld [vmem:[%s7813_s6 + $0x28] sm:$0xff] }
 0x909   :  { %v3472_v28 = vmul.f32 -1.442695, %v2888_v14  ;;  %v3327_v14 = vld [vmem:[%s7813_s6 + $0x20] sm:$0xff] }
 0x90a   :  { %v3473_v31 = vmul.f32 -1.442695, %v2890_v24  ;;  %v3474_v42 = vmul.f32 -1.442695, %v2961_v38  ;;  %v5205_v21 = vpack.c.bf16 %v3328_v17, %v3327_v14  ;;  %v3329_v24 = vld [vmem:[%s7813_s6 + $0x30] sm:$0xff]  ;;  %v3331_v38 = vld [vmem:[%s7813_s6 + $0x40] sm:$0xff] }
 0x90b   :  { %5497 = vpow2.f32 %v3472_v28  ;;  %v3330_v28 = vld [vmem:[%s7813_s6 + $0x38] sm:$0xff] }
 0x90c   :  { %5499 = vpow2.f32 %v3473_v31  ;;  %v5208_v31 = vpack.c.bf16 %v3330_v28, %v3329_v24 }
 0x90d   :  { %5501 = vpow2.f32 %v3474_v42  ;;  %v3332_v42 = vld [vmem:[%s7813_s6 + $0x48] sm:$0xff] }
 0x90e   :  { %5503 = vtanh.f32 %v2959_v45  ;;  %v5211_v45 = vpack.c.bf16 %v3332_v42, %v3331_v38 }
 0x915   :  { %v5498_v49 = vpop.eup %5497 }
 0x916   :  { %v5500_v52 = vpop.eup %5499  ;;  %v2966_v56 = vadd.f32 1.0, %v5498_v49  ;;  %v3333_v49 = vld [vmem:[%s7813_s6 + $0x50] sm:$0xff] }
 0x917   :  { %v2972_v59 = vadd.f32 1.0, %v5500_v52  ;;  %v5502_v63 = vpop.eup %5501  ;;  %v3334_v52 = vld [vmem:[%s7813_s6 + $0x58] sm:$0xff] }
 0x918   :  { %5505 = vrcp.f32 %v2966_v56  ;;  %v5504_v2 = vpop.eup %5503  ;;  %v2979_v20 = vadd.f32 1.0, %v5502_v63  ;;  %v3335_v56 = vld [vmem:[%s7813_s6 + $0x60] sm:$0xff]  ;;  %v3336_v63 = vld [vmem:[%s7813_s6 + $0x68] sm:$0xff] }
 0x919   :  { %5507 = vrcp.f32 %v2972_v59  ;;  %v5214_v59 = vpack.c.bf16 %v3334_v52, %v3333_v49 }
 0x91a   :  { %5509 = vrcp.f32 %v2979_v20 }
 0x922   :  { %v5506_v7 = vpop.eup %5505 }
 0x923   :  { %v5508_v11 = vpop.eup %5507  ;;  %v2983_v16 = vmul.f32 %v5506_v7, %v5504_v2  ;;  %v5217_v2 = vpack.c.bf16 %v3336_v63, %v3335_v56  ;;  %v3337_v7 = vld [vmem:[%s7813_s6 + $0x70] sm:$0xff] }
 0x924   :  { %v2982_v26 = vmul.f32 %v5508_v11, %v7624_v29  ;;  %v5510_v29 = vpop.eup %5509  ;;  %v3338_v11 = vld [vmem:[%s7813_s6 + $0x78] sm:$0xff] }
 0x926   :  { %v3053_v30 = vpop.f32.mrb[14].mxu0  ;;  %v3124_v36 = vpop.f32.mrb[14].mxu1  ;;  %v7736_v40 = vadd.f32 %v2983_v16, %v2982_v26  ;;  %v5220_v16 = vpack.c.bf16 %v3338_v11, %v3337_v7 }
 0x927   :  { %v5236_v50 = vadd.f32 %v3053_v30, %v8429_v46  ;;  %v3055_v55 = vpop.f32.mrb[15].mxu0  ;;  %v3126_v60 = vpop.f32.mrb[15].mxu1  ;;  %v5252_v41 = vadd.f32 %v3124_v36, %v6927_v8 }
 0x928   :  { %v5237_v1 = vadd.f32 %v3055_v55, %v8071_v19  ;;  %5511 = vtanh.f32 %v7736_v40  ;;  %v5253_v27 = vadd.f32 %v3126_v60, %v8430_v22 }
 0x929   :  { %v3475_v6 = vmul.f32 -1.442695, %v5236_v50 }
 0x92a   :  { %v3476_v13 = vmul.f32 -1.442695, %v5237_v1  ;;  %v3477_v33 = vmul.f32 -1.442695, %v5253_v27 }
 0x92b   :  { %5513 = vpow2.f32 %v3475_v6 }
 0x92c   :  { %5515 = vpow2.f32 %v3476_v13 }
 0x92d   :  { %5517 = vpow2.f32 %v3477_v33 }
 0x92e   :  { %5519 = vtanh.f32 %v5252_v41 }
 0x932   :  { %v5512_v32 = vpop.eup %5511 }
 0x933   :  { %v2986_v53 = vmul.f32 %v5512_v32, %v5510_v29 }
 0x935   :  { %v5514_v54 = vpop.eup %5513  ;;  %3221 = vmatprep.mubr.f32.mxu0 %v2986_v53  ;;  %3292 = vmatprep.mubr.f32.mxu1 %v2986_v53 }
 0x936   :  { %v5516_v57 = vpop.eup %5515  ;;  %v3136_v0 = vadd.f32 1.0, %v5514_v54 }
 0x937   :  { %v3142_v19 = vadd.f32 1.0, %v5516_v57  ;;  %v5518_v12 = vpop.eup %5517 }
 0x938   :  { %5521 = vrcp.f32 %v3136_v0  ;;  %v5520_v18 = vpop.eup %5519  ;;  %v3149_v61 = vadd.f32 1.0, %v5518_v12 }
 0x939   :  { %5523 = vrcp.f32 %v3142_v19  ;;  %v3481_v19 = vld [vmem:[%s7814_s7] ss:$0 sm:$0xff] }
 0x93a   :  { %5525 = vrcp.f32 %v3149_v61 }
 0x942   :  { %v5522_v44 = vpop.eup %5521 }
 0x943   :  { %v5524_v5 = vpop.eup %5523  ;;  %v3153_v23 = vmul.f32 %v5522_v44, %v5520_v18 }
 0x944   :  { %v3152_v25 = vmul.f32 %v5524_v5, %v7632_v47  ;;  %v5526_v3 = vpop.eup %5525  ;;  %v3325_v47 = vld [vmem:[%s7813_s6 + $0x10] sm:$0xff] }
 0x945   :  { %v5202_v9 = vpack.c.bf16 %v3326_v48, %v3325_v47 }
 0x946   :  { %v3154_v8 = vadd.f32 %v3153_v23, %v3152_v25 }
 0x948   :  { %5527 = vtanh.f32 %v3154_v8 }
 0x952   :  { %v5528_v51 = vpop.eup %5527 }
 0x953   :  { %v3156_v43 = vmul.f32 %v5528_v51, %v5526_v3 }
 0x955   :  { %3222 = vmatmul.mubr.f32.vlgmr.msra.gmra.mrb[30].mxu0 %v3156_v43  ;;  %3293 = vmatmul.mubr.f32.vlgmr.msra.gmra.mrb[30].mxu1 %v3156_v43 }
 0x956   :  { %5200 = vmatpush3.bf16.msra.mxu0 %v5199_v34  ;;  %3531 = vmatprep.mubr.msk.f32.mxu0 %vm5551_vm0, %v8010_v4 }
 0x957   :  { %5201 = vmatprep.subr.bf16.mxu0 %v5550_v37 }
 0x95a   :  { %5203 = vmatpush3.bf16.msra.mxu0 %v5202_v9 }
 0x95b   :  { %5204 = vmatprep.subr.bf16.mxu0 %v5550_v37 }
 0x95e   :  { %5206 = vmatpush3.bf16.msra.mxu0 %v5205_v21 }
 0x95f   :  { %5207 = vmatprep.subr.bf16.mxu0 %v5550_v37 }
 0x962   :  { %5209 = vmatpush3.bf16.msra.mxu0 %v5208_v31 }
 0x963   :  { %5210 = vmatprep.subr.bf16.mxu0 %v5550_v37 }
 0x966   :  { %5212 = vmatpush3.bf16.msra.mxu0 %v5211_v45 }
 0x967   :  { %5213 = vmatprep.subr.bf16.mxu0 %v5550_v37 }
 0x96a   :  { %5215 = vmatpush3.bf16.msra.mxu0 %v5214_v59 }
 0x96b   :  { %5216 = vmatprep.subr.bf16.mxu0 %v5550_v37 }
 0x96e   :  { %5218 = vmatpush3.bf16.msra.mxu0 %v5217_v2 }
 0x96f   :  { %5219 = vmatprep.subr.bf16.mxu0 %v5550_v37 }
 0x972   :  { %5221 = vmatpush3.bf16.msra.mxu0 %v5220_v16 }
 0xa28   :  { %v3223_v20 = vpop.f32.mrb[30].mxu0  ;;  %v3294_v26 = vpop.f32.mrb[30].mxu1 }
 0xa29   :  { %v3224_v30 = vadd.f32 %v3223_v20, %v8427_v58  ;;  %v3225_v4 = vpop.f32.mrb[31].mxu0  ;;  %v3296_v36 = vpop.f32.mrb[31].mxu1  ;;  %v3295_v6 = vadd.f32 %v3294_v26, %v8130_v62 }
 0xa2a   :  { %v3226_v46 = vadd.f32 %v3225_v4, %v8128_v10  ;;  %v3297_v60 = vadd.f32 %v3296_v36, %v8428_v35 }
 0xa2b   :  { %v3478_v50 = vmul.f32 -1.442695, %v3224_v30 }
 0xa2c   :  { %v3479_v55 = vmul.f32 -1.442695, %v3226_v46  ;;  %v3480_v1 = vmul.f32 -1.442695, %v3297_v60 }
 0xa2d   :  { %5529 = vpow2.f32 %v3478_v50 }
 0xa2e   :  { %5531 = vpow2.f32 %v3479_v55 }
 0xa2f   :  { %5533 = vpow2.f32 %v3480_v1 }
 0xa30   :  { %5535 = vtanh.f32 %v3295_v6 }
 0xa37   :  { %v5530_v13 = vpop.eup %5529 }
 0xa38   :  { %v5532_v22 = vpop.eup %5531  ;;  %v3302_v27 = vadd.f32 1.0, %v5530_v13 }
 0xa39   :  { %v3308_v29 = vadd.f32 1.0, %v5532_v22  ;;  %v5534_v58 = vpop.eup %5533 }
 0xa3a   :  { %5537 = vrcp.f32 %v3302_v27  ;;  %v5536_v32 = vpop.eup %5535  ;;  %v3315_v53 = vadd.f32 1.0, %v5534_v58 }
 0xa3b   :  { %5539 = vrcp.f32 %v3308_v29 }
 0xa3c   :  { %5541 = vrcp.f32 %v3315_v53 }
 0xa44   :  { %v5538_v10 = vpop.eup %5537 }
 0xa45   :  { %v5540_v33 = vpop.eup %5539  ;;  %v3319_v41 = vmul.f32 %v5538_v10, %v5536_v32 }
 0xa46   :  { %v3318_v54 = vmul.f32 %v5540_v33, %v7736_v40  ;;  %v5542_v62 = vpop.eup %5541 }
 0xa48   :  { %v3320_v35 = vadd.f32 %v3319_v41, %v3318_v54 }
 0xa4a   :  { %5543 = vtanh.f32 %v3320_v35 }
 0xa54   :  { %v5544_v57 = vpop.eup %5543 }
 0xa55   :  { %v3322_v0 = vmul.f32 %v5544_v57, %v5542_v62 }
 0xa57   :  { %3532 = vmatmul.mubr.f32.vlgmr.msra.gmra.mrb[32].mxu0 %v3322_v0 }
 0xb2a   :  { %v3412_v12 = vpop.f32.mrb[32].mxu0 }
 0xb2b   :  { %v3413_v18 = vadd.f32 %v3481_v19, %v3412_v12  ;;  %v3533_v44 = vpop.f32.mrb[33].mxu0 }
 0xb2d   :  { %v3417_v5 = vsel %vm3416_vm1, %v3413_v18, -inf }
 0xb2e   :  { %3418 = vmax.xlane.f32.xlu0 %v3417_v5 }
 0xbbb   :  { %v3419_v23 = vpop.xlane.xlu0 %3418 }
 0xbbc   :  { %v3420_v40 = vsub.f32 %v3413_v18, %v3419_v23 }
 0xbbe   :  { %v3421_v61 = vmul.f32 1.442695, %v3420_v40 }
 0xbc0   :  { %5545 = vpow2.f32 %v3421_v61 }
 0xbca   :  { %v5546_v25 = vpop.eup %5545 }
 0xbcb   :  { %v3423_v8 = vsel %vm3416_vm1, %v5546_v25, 0.0 }
 0xbcc   :  { %3424 = vadd.xlane.f32.xlu0 %v3423_v8 }
 0xc59   :  { %v3425_v3 = vpop.xlane.xlu0 %3424 }
 0xc5a   :  { %5547 = vrcp.f32 %v3425_v3 }
 0xc64   :  { %v5548_v51 = vpop.eup %5547 }
 0xc65   :  { %v3427_v43 = vmul.f32 %v5548_v51, %v5546_v25 }
 0xc67   :  { %3428 = vst.msk [vmem:[%s7815_s8] sm:$0xff] %vm3416_vm1, %v3427_v43 }

</bundles_post_ra>
